<compile_context>
chip_gen: v7x
topology: tpu7x:2x2x1
jax: 0.10.0
libtpu: 0.0.40
codegen_flags: <defaults>
</compile_context>

<pallas_src>
import functools
import math

import jax
import jax.numpy as jnp
from jax import lax
from jax.experimental import pallas as pl
from jax.experimental.pallas import tpu as pltpu

DFF = 16  # dim_feedforward in the reference module


def tranad_kernel(src_ref, tgt_ref, pe_ref, bid_sub_ref, bid_lane_ref,
                  wq_ref, bq_ref, wk_ref, bk_ref, wv_ref, bv_ref, wo_ref, bo_ref,
                  wff1_ref, bff1_ref, wff2_ref, bff2_ref,
                  wfcn_ref, bfcn_ref,
                  x1_ref, x2_ref,
                  *, feats, nhead, n_window):
    F = feats
    E = 2 * F
    hd = E // nhead
    W = n_window
    Bb = tgt_ref.shape[0]                      # batch block size
    rows = Bb * W                              # flattened (batch, window) rows
    sqrt_f = math.sqrt(F)
    NEG = jnp.float32(-1e30)

    src2 = src_ref[...]                        # (rows, F), batch-major rows
    tgt2 = tgt_ref[...]                        # (Bb, F)
    pe = pe_ref[...]                           # (rows, E), pre-tiled per batch block
    bid_sub = bid_sub_ref[...]                 # (rows, 1) int32 batch-id per row
    bid_lane = bid_lane_ref[...]               # (1, rows) int32 batch-id per key row

    # Per-sample attention masks, built in-kernel from the O(rows) id vectors
    # (exact: masked scores -> -1e30 -> exp == 0).
    enc_mask = bid_sub == bid_lane                                            # (rows, rows)
    cross_mask = lax.broadcasted_iota(jnp.int32, (Bb, rows), 0) == bid_lane   # (Bb, rows)

    def linear(x, w, b):
        # x: (M, I); w: (I, O) (stored pre-transposed vs torch's (O, I)); b: (1, O)
        return jnp.dot(x, w, preferred_element_type=jnp.float32) + b

    def softmax_masked(s, mask):
        s = jnp.where(mask, s, NEG)
        m = jnp.max(s, axis=-1, keepdims=True)
        e = jnp.exp(s - m)
        return e * pl.reciprocal(jnp.sum(e, axis=-1, keepdims=True), approx=True)

    def mha(q_in, kv_in, mask, idx):
        # nn.MultiheadAttention (eval mode).  1/sqrt(hd) folded into W_q / b_q at pack time.
        k = linear(kv_in, wk_ref[idx], bk_ref[idx])                 # (Mk, E)
        kt = k.T                                                    # (E, Mk): one transpose
        heads = []
        for h in range(nhead):                                      # static unrolled head loop
            q_h = linear(q_in, wq_ref[idx, h], bq_ref[idx, h])      # (Mq, hd)
            v_h = linear(kv_in, wv_ref[idx, h], bv_ref[idx, h])     # (Mk, hd)
            s = jnp.dot(q_h, kt[h * hd:(h + 1) * hd, :],
                        preferred_element_type=jnp.float32)         # (Mq, Mk)
            p = softmax_masked(s, mask)
            heads.append(jnp.dot(p, v_h, preferred_element_type=jnp.float32))
        ctx = jnp.concatenate(heads, axis=-1)                       # (Mq, E), stays in vregs
        return linear(ctx, wo_ref[idx], bo_ref[idx])                # fused out-projection

    def self_attn_len1(t, idx):
        # Sequence length 1: softmax over a single key is exactly 1, so the block reduces
        # exactly to out_proj(v_proj(t)).
        v = jnp.concatenate([linear(t, wv_ref[idx, h], bv_ref[idx, h])
                             for h in range(nhead)], axis=-1)
        return linear(v, wo_ref[idx], bo_ref[idx])

    def ffn(x, idx):
        # nn.LeakyReLU(True): negative_slope == 1.0 -> identity (reference quirk), omitted.
        h = linear(x, wff1_ref[idx], bff1_ref[idx])
        return linear(h, wff2_ref[idx], bff2_ref[idx])

    def fcn(x):
        y = linear(x, wfcn_ref[...], bfcn_ref[...])
        return 1.0 / (1.0 + jnp.exp(-y))                            # exact sigmoid

    src_scaled = src2 * sqrt_f
    t0 = jnp.concatenate([tgt2, tgt2], axis=-1)                     # tgt.repeat(1, 1, 2)

    def encode(c_scaled):
        # torch.cat((src, c), -1) * sqrt(F) + PositionalEncoding (dropout off)
        s = jnp.concatenate([src_scaled, c_scaled], axis=-1) + pe
        s = s + mha(s, s, enc_mask, 0)                              # TransformerEncoderLayer
        s = s + ffn(s, 0)
        return s                                                    # memory, (rows, E)

    def decode(mem, self_idx, cross_idx, ffn_idx):
        t = t0 + self_attn_len1(t0, self_idx)
        t = t + mha(t, mem, cross_mask, cross_idx)
        t = t + ffn(t, ffn_idx)
        return t

    # ---- phase 1: c = 0 ----
    x1 = fcn(decode(encode(jnp.zeros_like(src_scaled)), 1, 2, 1))   # (Bb, F)
    x1_ref[...] = x1

    # ---- phase 2: c = (x1 - src)^2, x1 broadcast over the window via a selector matmul ----
    sel = (bid_sub == lax.broadcasted_iota(jnp.int32, (rows, Bb), 1)).astype(jnp.float32)
    x1_rep = jnp.dot(sel, x1, preferred_element_type=jnp.float32)   # (rows, F)
    c2 = ((x1_rep - src2) ** 2) * sqrt_f
    x2_ref[...] = fcn(decode(encode(c2), 3, 4, 2))


def init_params(feats, n_window, key):
    """Deterministic synthetic parameters with the shapes TranADNet.__init__ implies.
    Linear weights are stored pre-transposed, i.e. (in_features, out_features)."""
    E = 2 * feats
    ks = jax.random.split(key, 10)

    def nrm(k, shape, scale):
        return jax.random.normal(k, shape, jnp.float32) * scale

    params = {
        # 5 MultiheadAttentions: [enc.self, dec1.self, dec1.cross, dec2.self, dec2.cross]
        'wqkv': nrm(ks[0], (5, 3, E, E), 1.0 / math.sqrt(E)),
        'bqkv': nrm(ks[1], (5, 3, E), 0.02),
        'wo':   nrm(ks[2], (5, E, E), 1.0 / math.sqrt(E)),
        'bo':   nrm(ks[3], (5, E), 0.02),
        # 3 feed-forward blocks: [enc, dec1, dec2]
        'wff1': nrm(ks[4], (3, E, DFF), 1.0 / math.sqrt(E)),
        'bff1': nrm(ks[5], (3, DFF), 0.02),
        'wff2': nrm(ks[6], (3, DFF, E), 1.0 / math.sqrt(DFF)),
        'bff2': nrm(ks[7], (3, E), 0.02),
        # fcn: Linear(2*feats -> feats) + Sigmoid
        'wfcn': nrm(ks[8], (E, feats), 1.0 / math.sqrt(E)),
        'bfcn': nrm(ks[9], (1, feats), 0.02),
    }
    # TranAD's (non-standard) PositionalEncoding: pe[t, d] = sin(t*div[d]) + cos(t*div[d])
    # with div over *all* lanes — matches the reference module exactly.
    pos = jnp.arange(n_window, dtype=jnp.float32)[:, None]
    div = jnp.exp(jnp.arange(E, dtype=jnp.float32) * (-math.log(10000.0) / E))[None, :]
    params['pe'] = jnp.sin(pos * div) + jnp.cos(pos * div)          # (W, E)
    return params


def _pack_params(params, feats, b_blk, n_window):
    """Fold the 1/sqrt(head_dim) scale into W_q/b_q, split q/v projections per head, pre-tile
    the positional encoding for one batch block, and build the tiny O(rows) batch-id vectors
    the kernel uses to generate the attention masks in VMEM."""
    E = 2 * feats
    nhead = feats
    hd = E // nhead
    scale = 1.0 / math.sqrt(hd)
    W = n_window

    def split_heads(w):       # (5, E, E) -> (5, nhead, E, hd): out-columns grouped per head
        return w.reshape(5, E, nhead, hd).transpose(0, 2, 1, 3)

    def split_head_bias(b):   # (5, E) -> (5, nhead, 1, hd)
        return b.reshape(5, nhead, hd)[:, :, None, :]

    wq = split_heads(params['wqkv'][:, 0] * scale)        # fold 1/sqrt(hd) into W_q
    bq = split_head_bias(params['bqkv'][:, 0] * scale)    # ... and into b_q
    wk = params['wqkv'][:, 1]
    bk = params['bqkv'][:, 1][:, None, :]
    wv = split_heads(params['wqkv'][:, 2])
    bv = split_head_bias(params['bqkv'][:, 2])
    wo = params['wo']
    bo = params['bo'][:, None, :]

    pe_t = jnp.tile(params['pe'], (b_blk, 1)).astype(jnp.float32)   # (rows, E)

    bid = jnp.repeat(jnp.arange(b_blk, dtype=jnp.int32), W)         # (rows,)
    bid_sub = bid[:, None]                                          # (rows, 1)
    bid_lane = bid[None, :]                                         # (1, rows)

    return [pe_t, bid_sub, bid_lane,
            wq, bq, wk, bk, wv, bv, wo, bo,
            params['wff1'], params['bff1'][:, None, :],
            params['wff2'], params['bff2'][:, None, :],
            params['wfcn'], params['bfcn']]


def _choose_block(B, max_block_b):
    """Pick (b_blk, n_blocks).  Multi-block grids need b_blk % 8 == 0 (sublane tiling of the
    (b_blk, F) tgt/output blocks).  Prefer >= 2 blocks when B >= 16 so the "parallel" batch
    axis can be split across the two v7x TensorCores, and balance the padded tail."""
    cdiv = lambda a, b: -(-a // b)
    rup8 = lambda x: ((x + 7) // 8) * 8
    if B < 16:                                  # too small to split into two 8-aligned blocks
        return B, 1                             # single block == full array (no alignment need)
    n_blocks = max(2, cdiv(B, max(8, max_block_b)))
    if n_blocks % 2:
        n_blocks += 1                           # even block count -> v7x megacore friendly
    b_blk = rup8(cdiv(B, n_blocks))             # balanced tail, 8-aligned sublanes
    n_blocks = cdiv(B, b_blk)
    return b_blk, n_blocks


def _cost_estimate(b_blk, W, F, n_blocks):
    """Rough advisory cost for XLA's scheduler (2 phases per block)."""
    E, nhead, hd = 2 * F, F, 2
    rows = b_blk * W
    macs_per_phase = (
        (2 * nhead + 2) * rows * E * hd + rows * E * E          # encoder q/v/k/out projections
        + 2 * rows * E * DFF                                    # encoder FFN
        + 2 * nhead * rows * rows * hd                          # encoder scores + context
        + (3 * nhead + 3) * b_blk * E * hd + 2 * b_blk * E * E  # decoder projections
        + 2 * b_blk * E * DFF                                   # decoder FFN
        + 2 * nhead * b_blk * rows * hd                         # cross scores + context
        + b_blk * E * F                                         # fcn
    )
    flops = int(2 * 2 * macs_per_phase * n_blocks + 2 * rows * b_blk * F * n_blocks)
    transcend = int(2 * n_blocks * (nhead * (rows * rows + b_blk * rows) + b_blk * F))
    bytes_acc = int(4 * n_blocks * (rows * F + 3 * b_blk * F) + 4 * rows * (E + 2))
    return pl.CostEstimate(flops=flops, transcendentals=transcend, bytes_accessed=bytes_acc)


def tranad_forward(src, tgt, params, *, max_block_b=16):
    """src: (W, B, F), tgt: (1, B, F)  (PyTorch seq-first) -> (x1, x2), each (1, B, F)."""
    W, B, F = src.shape
    b_blk, n_blocks = _choose_block(B, max_block_b)
    Bp = n_blocks * b_blk
    rows = b_blk * W

    src_b = jnp.transpose(src, (1, 0, 2)).astype(jnp.float32)        # (B, W, F)
    tgt_b = jnp.transpose(tgt, (1, 0, 2)).astype(jnp.float32)        # (B, 1, F)
    if Bp != B:
        pad = Bp - B
        src_b = jnp.pad(src_b, ((0, pad), (0, 0), (0, 0)))
        tgt_b = jnp.pad(tgt_b, ((0, pad), (0, 0), (0, 0)))
    src_flat = src_b.reshape(Bp * W, F)                              # batch-major rows
    tgt_flat = tgt_b.reshape(Bp, F)

    packed = _pack_params(params, F, b_blk, W)

    def const_spec(a):
        nd = a.ndim
        return pl.BlockSpec(a.shape, lambda g, _nd=nd: (0,) * _nd)

    in_specs = ([pl.BlockSpec((rows, F), lambda g: (g, 0)),
                 pl.BlockSpec((b_blk, F), lambda g: (g, 0))]
                + [const_spec(a) for a in packed])
    out_specs = (pl.BlockSpec((b_blk, F), lambda g: (g, 0)),
                 pl.BlockSpec((b_blk, F), lambda g: (g, 0)))
    out_shape = (jax.ShapeDtypeStruct((Bp, F), jnp.float32),
                 jax.ShapeDtypeStruct((Bp, F), jnp.float32))

    kernel = functools.partial(tranad_kernel, feats=F, nhead=F, n_window=W)
    x1_p, x2_p = pl.pallas_call(
        kernel,
        grid=(n_blocks,),
        in_specs=in_specs,
        out_specs=out_specs,
        out_shape=out_shape,
        compiler_params=pltpu.CompilerParams(
            dimension_semantics=("parallel",)),   # batch blocks are independent (2 TCs on v7x)
        cost_estimate=_cost_estimate(b_blk, W, F, n_blocks),
    )(src_flat, tgt_flat, *packed)

    # back to PyTorch layout (1, B, F)
    return x1_p[:B][None, :, :], x2_p[:B][None, :, :]


if __name__ == "__main__":
    feats = 4          # n_feats
    n_window = 10      # W (sequence length)
    batch = 2

    key = jax.random.PRNGKey(0)
    k_src, k_par = jax.random.split(key, 2)
    src = jax.random.normal(k_src, (n_window, batch, feats), jnp.float32)
    tgt = src[-1:, :, :]            # as in deepod: last window element, (1, B, F)
    params = init_params(feats, n_window, k_par)

    x1, x2 = jax.jit(tranad_forward)(src, tgt, params)
    jax.block_until_ready((x1, x2))
    assert x1.shape == (1, batch, feats) and x2.shape == (1, batch, feats)
    assert x1.dtype == jnp.float32 and x2.dtype == jnp.float32
    assert bool(jnp.all(jnp.isfinite(x1))) and bool(jnp.all(jnp.isfinite(x2)))
    print("KERNEL_OK")
</pallas_src>

<mosaic_0001>
module attributes {stable_mosaic.version = 11 : i64} {
  func.func @tranad_kernel(%arg0: i32, %arg1: memref<20x4xf32, #tpu.memory_space<vmem>>, %arg2: memref<2x4xf32, #tpu.memory_space<vmem>>, %arg3: memref<20x8xf32, #tpu.memory_space<vmem>>, %arg4: memref<20x1xi32, #tpu.memory_space<vmem>>, %arg5: memref<1x20xi32, #tpu.memory_space<vmem>>, %arg6: memref<5x4x8x2xf32, #tpu.memory_space<vmem>>, %arg7: memref<5x4x1x2xf32, #tpu.memory_space<vmem>>, %arg8: memref<5x8x8xf32, #tpu.memory_space<vmem>>, %arg9: memref<5x1x8xf32, #tpu.memory_space<vmem>>, %arg10: memref<5x4x8x2xf32, #tpu.memory_space<vmem>>, %arg11: memref<5x4x1x2xf32, #tpu.memory_space<vmem>>, %arg12: memref<5x8x8xf32, #tpu.memory_space<vmem>>, %arg13: memref<5x1x8xf32, #tpu.memory_space<vmem>>, %arg14: memref<3x8x16xf32, #tpu.memory_space<vmem>>, %arg15: memref<3x1x16xf32, #tpu.memory_space<vmem>>, %arg16: memref<3x16x8xf32, #tpu.memory_space<vmem>>, %arg17: memref<3x1x8xf32, #tpu.memory_space<vmem>>, %arg18: memref<8x4xf32, #tpu.memory_space<vmem>>, %arg19: memref<1x4xf32, #tpu.memory_space<vmem>>, %arg20: memref<2x4xf32, #tpu.memory_space<vmem>>, %arg21: memref<2x4xf32, #tpu.memory_space<vmem>>) attributes {dimension_semantics = [#tpu.dimension_semantics<parallel>], iteration_bounds = array<i64: 1>, scalar_prefetch = 0 : i64, scratch_operands = 0 : i64, tpu.core_type = #tpu.core_type<tc>, window_params = [{transform_indices = @transform_0, window_bounds = array<i64: 20, 4>}, {transform_indices = @transform_1, window_bounds = array<i64: 2, 4>}, {pipeline_mode = #tpu.pipeline_mode<synchronous>, transform_indices = @transform_2, window_bounds = array<i64: 20, 8>}, {pipeline_mode = #tpu.pipeline_mode<synchronous>, transform_indices = @transform_3, window_bounds = array<i64: 20, 1>}, {pipeline_mode = #tpu.pipeline_mode<synchronous>, transform_indices = @transform_4, window_bounds = array<i64: 1, 20>}, {pipeline_mode = #tpu.pipeline_mode<synchronous>, transform_indices = @transform_5, window_bounds = array<i64: 5, 4, 8, 2>}, {pipeline_mode = #tpu.pipeline_mode<synchronous>, transform_indices = @transform_6, window_bounds = array<i64: 5, 4, 1, 2>}, {pipeline_mode = #tpu.pipeline_mode<synchronous>, transform_indices = @transform_7, window_bounds = array<i64: 5, 8, 8>}, {pipeline_mode = #tpu.pipeline_mode<synchronous>, transform_indices = @transform_8, window_bounds = array<i64: 5, 1, 8>}, {pipeline_mode = #tpu.pipeline_mode<synchronous>, transform_indices = @transform_9, window_bounds = array<i64: 5, 4, 8, 2>}, {pipeline_mode = #tpu.pipeline_mode<synchronous>, transform_indices = @transform_10, window_bounds = array<i64: 5, 4, 1, 2>}, {pipeline_mode = #tpu.pipeline_mode<synchronous>, transform_indices = @transform_11, window_bounds = array<i64: 5, 8, 8>}, {pipeline_mode = #tpu.pipeline_mode<synchronous>, transform_indices = @transform_12, window_bounds = array<i64: 5, 1, 8>}, {pipeline_mode = #tpu.pipeline_mode<synchronous>, transform_indices = @transform_13, window_bounds = array<i64: 3, 8, 16>}, {pipeline_mode = #tpu.pipeline_mode<synchronous>, transform_indices = @transform_14, window_bounds = array<i64: 3, 1, 16>}, {pipeline_mode = #tpu.pipeline_mode<synchronous>, transform_indices = @transform_15, window_bounds = array<i64: 3, 16, 8>}, {pipeline_mode = #tpu.pipeline_mode<synchronous>, transform_indices = @transform_16, window_bounds = array<i64: 3, 1, 8>}, {pipeline_mode = #tpu.pipeline_mode<synchronous>, transform_indices = @transform_17, window_bounds = array<i64: 8, 4>}, {pipeline_mode = #tpu.pipeline_mode<synchronous>, transform_indices = @transform_18, window_bounds = array<i64: 1, 4>}, {transform_indices = @transform_19, window_bounds = array<i64: 2, 4>}, {transform_indices = @transform_20, window_bounds = array<i64: 2, 4>}]} {
    %c0 = arith.constant 0 : index
    %c0_0 = arith.constant 0 : index
    %0 = vector.load %arg1[%c0, %c0_0] : memref<20x4xf32, #tpu.memory_space<vmem>>, vector<20x4xf32>
    %c0_1 = arith.constant 0 : index
    %c0_2 = arith.constant 0 : index
    %1 = vector.load %arg2[%c0_1, %c0_2] : memref<2x4xf32, #tpu.memory_space<vmem>>, vector<2x4xf32>
    %c0_3 = arith.constant 0 : index
    %c0_4 = arith.constant 0 : index
    %2 = vector.load %arg3[%c0_3, %c0_4] : memref<20x8xf32, #tpu.memory_space<vmem>>, vector<20x8xf32>
    %c0_5 = arith.constant 0 : index
    %c0_6 = arith.constant 0 : index
    %3 = vector.load %arg4[%c0_5, %c0_6] : memref<20x1xi32, #tpu.memory_space<vmem>>, vector<20x1xi32>
    %c0_7 = arith.constant 0 : index
    %c0_8 = arith.constant 0 : index
    %4 = vector.load %arg5[%c0_7, %c0_8] : memref<1x20xi32, #tpu.memory_space<vmem>>, vector<1x20xi32>
    %5 = vector.broadcast %3 : vector<20x1xi32> to vector<20x20xi32>
    %6 = vector.broadcast %4 : vector<1x20xi32> to vector<20x20xi32>
    %7 = arith.cmpi eq, %5, %6 : vector<20x20xi32>
    %8 = tpu.iota {dimensions = array<i32: 0>} : vector<2x20xi32>
    %9 = vector.broadcast %4 : vector<1x20xi32> to vector<2x20xi32>
    %10 = arith.cmpi eq, %8, %9 : vector<2x20xi32>
    %cst = arith.constant 2.000000e+00 : f32
    %11 = vector.broadcast %cst : f32 to vector<20x4xf32>
    %12 = arith.mulf %0, %11 : vector<20x4xf32>
    %13 = tpu.concatenate %1, %1 in 1 : vector<2x4xf32>, vector<2x4xf32> -> vector<2x8xf32>
    %cst_9 = arith.constant 0.000000e+00 : f32
    %14 = vector.broadcast %cst_9 : f32 to vector<20x4xf32>
    %15 = tpu.concatenate %12, %14 in 1 : vector<20x4xf32>, vector<20x4xf32> -> vector<20x8xf32>
    %16 = arith.addf %15, %2 : vector<20x8xf32>
    %c0_10 = arith.constant 0 : index
    %c0_11 = arith.constant 0 : index
    %c0_12 = arith.constant 0 : index
    %17 = vector.load %arg8[%c0_10, %c0_11, %c0_12] : memref<5x8x8xf32, #tpu.memory_space<vmem>>, vector<1x8x8xf32>
    %18 = vector.shape_cast %17 : vector<1x8x8xf32> to vector<8x8xf32>
    %c0_13 = arith.constant 0 : index
    %c0_14 = arith.constant 0 : index
    %c0_15 = arith.constant 0 : index
    %19 = vector.load %arg9[%c0_13, %c0_14, %c0_15] : memref<5x1x8xf32, #tpu.memory_space<vmem>>, vector<1x1x8xf32>
    %20 = vector.shape_cast %19 : vector<1x1x8xf32> to vector<1x8xf32>
    %cst_16 = arith.constant dense<0.000000e+00> : vector<20x8xf32>
    %21 = tpu.matmul %16, %18, %cst_16 {dimension_numbers = #tpu.dot_dimension_numbers<[1], [0], [0], [1], [0, 0, 1, 1], [], []>} : vector<20x8xf32>, vector<8x8xf32>, vector<20x8xf32> -> vector<20x8xf32>
    %22 = vector.broadcast %20 : vector<1x8xf32> to vector<20x8xf32>
    %23 = arith.addf %21, %22 : vector<20x8xf32>
    %24 = tpu.transpose %23, [1, 0] : vector<20x8xf32> -> vector<8x20xf32>
    %c0_17 = arith.constant 0 : index
    %c0_18 = arith.constant 0 : index
    %c0_19 = arith.constant 0 : index
    %c0_20 = arith.constant 0 : index
    %25 = vector.load %arg6[%c0_17, %c0_18, %c0_19, %c0_20] : memref<5x4x8x2xf32, #tpu.memory_space<vmem>>, vector<1x1x8x2xf32>
    %26 = vector.shape_cast %25 : vector<1x1x8x2xf32> to vector<8x2xf32>
    %c0_21 = arith.constant 0 : index
    %c0_22 = arith.constant 0 : index
    %c0_23 = arith.constant 0 : index
    %c0_24 = arith.constant 0 : index
    %27 = vector.load %arg7[%c0_21, %c0_22, %c0_23, %c0_24] : memref<5x4x1x2xf32, #tpu.memory_space<vmem>>, vector<1x1x1x2xf32>
    %28 = vector.shape_cast %27 : vector<1x1x1x2xf32> to vector<1x2xf32>
    %cst_25 = arith.constant dense<0.000000e+00> : vector<20x2xf32>
    %29 = tpu.matmul %16, %26, %cst_25 {dimension_numbers = #tpu.dot_dimension_numbers<[1], [0], [0], [1], [0, 0, 1, 1], [], []>} : vector<20x8xf32>, vector<8x2xf32>, vector<20x2xf32> -> vector<20x2xf32>
    %30 = vector.broadcast %28 : vector<1x2xf32> to vector<20x2xf32>
    %31 = arith.addf %29, %30 : vector<20x2xf32>
    %c0_26 = arith.constant 0 : index
    %c0_27 = arith.constant 0 : index
    %c0_28 = arith.constant 0 : index
    %c0_29 = arith.constant 0 : index
    %32 = vector.load %arg10[%c0_26, %c0_27, %c0_28, %c0_29] : memref<5x4x8x2xf32, #tpu.memory_space<vmem>>, vector<1x1x8x2xf32>
    %33 = vector.shape_cast %32 : vector<1x1x8x2xf32> to vector<8x2xf32>
    %c0_30 = arith.constant 0 : index
    %c0_31 = arith.constant 0 : index
    %c0_32 = arith.constant 0 : index
    %c0_33 = arith.constant 0 : index
    %34 = vector.load %arg11[%c0_30, %c0_31, %c0_32, %c0_33] : memref<5x4x1x2xf32, #tpu.memory_space<vmem>>, vector<1x1x1x2xf32>
    %35 = vector.shape_cast %34 : vector<1x1x1x2xf32> to vector<1x2xf32>
    %cst_34 = arith.constant dense<0.000000e+00> : vector<20x2xf32>
    %36 = tpu.matmul %16, %33, %cst_34 {dimension_numbers = #tpu.dot_dimension_numbers<[1], [0], [0], [1], [0, 0, 1, 1], [], []>} : vector<20x8xf32>, vector<8x2xf32>, vector<20x2xf32> -> vector<20x2xf32>
    %37 = vector.broadcast %35 : vector<1x2xf32> to vector<20x2xf32>
    %38 = arith.addf %36, %37 : vector<20x2xf32>
    %39 = vector.extract_strided_slice %24 {offsets = [0, 0], sizes = [2, 20], strides = [1, 1]} : vector<8x20xf32> to vector<2x20xf32>
    %cst_35 = arith.constant dense<0.000000e+00> : vector<20x20xf32>
    %40 = tpu.matmul %31, %39, %cst_35 {dimension_numbers = #tpu.dot_dimension_numbers<[1], [0], [0], [1], [0, 0, 1, 1], [], []>} : vector<20x2xf32>, vector<2x20xf32>, vector<20x20xf32> -> vector<20x20xf32>
    %cst_36 = arith.constant -1.000000e+30 : f32
    %41 = vector.broadcast %cst_36 : f32 to vector<20x20xf32>
    %42 = arith.select %7, %40, %41 : vector<20x20xi1>, vector<20x20xf32>
    %cst_37 = arith.constant dense<0xFF800000> : vector<20xf32>
    %43 = vector.multi_reduction <maximumf>, %42, %cst_37 [1] : vector<20x20xf32> to vector<20xf32>
    %44 = vector.shape_cast %43 : vector<20xf32> to vector<20x1xf32>
    %45 = vector.broadcast %44 : vector<20x1xf32> to vector<20x20xf32>
    %46 = arith.subf %42, %45 : vector<20x20xf32>
    %47 = math.exp %46 : vector<20x20xf32>
    %cst_38 = arith.constant dense<0.000000e+00> : vector<20xf32>
    %48 = vector.multi_reduction <add>, %47, %cst_38 [1] : vector<20x20xf32> to vector<20xf32>
    %49 = vector.shape_cast %48 : vector<20xf32> to vector<20x1xf32>
    %50 = tpu.reciprocal %49 {approx = true} : vector<20x1xf32> -> vector<20x1xf32>
    %51 = vector.broadcast %50 : vector<20x1xf32> to vector<20x20xf32>
    %52 = arith.mulf %47, %51 : vector<20x20xf32>
    %cst_39 = arith.constant dense<0.000000e+00> : vector<20x2xf32>
    %53 = tpu.matmul %52, %38, %cst_39 {dimension_numbers = #tpu.dot_dimension_numbers<[1], [0], [0], [1], [0, 0, 1, 1], [], []>} : vector<20x20xf32>, vector<20x2xf32>, vector<20x2xf32> -> vector<20x2xf32>
    %c0_40 = arith.constant 0 : index
    %c1 = arith.constant 1 : index
    %c0_41 = arith.constant 0 : index
    %c0_42 = arith.constant 0 : index
    %54 = vector.load %arg6[%c0_40, %c1, %c0_41, %c0_42] : memref<5x4x8x2xf32, #tpu.memory_space<vmem>>, vector<1x1x8x2xf32>
    %55 = vector.shape_cast %54 : vector<1x1x8x2xf32> to vector<8x2xf32>
    %c0_43 = arith.constant 0 : index
    %c1_44 = arith.constant 1 : index
    %c0_45 = arith.constant 0 : index
    %c0_46 = arith.constant 0 : index
    %56 = vector.load %arg7[%c0_43, %c1_44, %c0_45, %c0_46] : memref<5x4x1x2xf32, #tpu.memory_space<vmem>>, vector<1x1x1x2xf32>
    %57 = vector.shape_cast %56 : vector<1x1x1x2xf32> to vector<1x2xf32>
    %cst_47 = arith.constant dense<0.000000e+00> : vector<20x2xf32>
    %58 = tpu.matmul %16, %55, %cst_47 {dimension_numbers = #tpu.dot_dimension_numbers<[1], [0], [0], [1], [0, 0, 1, 1], [], []>} : vector<20x8xf32>, vector<8x2xf32>, vector<20x2xf32> -> vector<20x2xf32>
    %59 = vector.broadcast %57 : vector<1x2xf32> to vector<20x2xf32>
    %60 = arith.addf %58, %59 : vector<20x2xf32>
    %c0_48 = arith.constant 0 : index
    %c1_49 = arith.constant 1 : index
    %c0_50 = arith.constant 0 : index
    %c0_51 = arith.constant 0 : index
    %61 = vector.load %arg10[%c0_48, %c1_49, %c0_50, %c0_51] : memref<5x4x8x2xf32, #tpu.memory_space<vmem>>, vector<1x1x8x2xf32>
    %62 = vector.shape_cast %61 : vector<1x1x8x2xf32> to vector<8x2xf32>
    %c0_52 = arith.constant 0 : index
    %c1_53 = arith.constant 1 : index
    %c0_54 = arith.constant 0 : index
    %c0_55 = arith.constant 0 : index
    %63 = vector.load %arg11[%c0_52, %c1_53, %c0_54, %c0_55] : memref<5x4x1x2xf32, #tpu.memory_space<vmem>>, vector<1x1x1x2xf32>
    %64 = vector.shape_cast %63 : vector<1x1x1x2xf32> to vector<1x2xf32>
    %cst_56 = arith.constant dense<0.000000e+00> : vector<20x2xf32>
    %65 = tpu.matmul %16, %62, %cst_56 {dimension_numbers = #tpu.dot_dimension_numbers<[1], [0], [0], [1], [0, 0, 1, 1], [], []>} : vector<20x8xf32>, vector<8x2xf32>, vector<20x2xf32> -> vector<20x2xf32>
    %66 = vector.broadcast %64 : vector<1x2xf32> to vector<20x2xf32>
    %67 = arith.addf %65, %66 : vector<20x2xf32>
    %68 = vector.extract_strided_slice %24 {offsets = [2, 0], sizes = [2, 20], strides = [1, 1]} : vector<8x20xf32> to vector<2x20xf32>
    %cst_57 = arith.constant dense<0.000000e+00> : vector<20x20xf32>
    %69 = tpu.matmul %60, %68, %cst_57 {dimension_numbers = #tpu.dot_dimension_numbers<[1], [0], [0], [1], [0, 0, 1, 1], [], []>} : vector<20x2xf32>, vector<2x20xf32>, vector<20x20xf32> -> vector<20x20xf32>
    %cst_58 = arith.constant -1.000000e+30 : f32
    %70 = vector.broadcast %cst_58 : f32 to vector<20x20xf32>
    %71 = arith.select %7, %69, %70 : vector<20x20xi1>, vector<20x20xf32>
    %cst_59 = arith.constant dense<0xFF800000> : vector<20xf32>
    %72 = vector.multi_reduction <maximumf>, %71, %cst_59 [1] : vector<20x20xf32> to vector<20xf32>
    %73 = vector.shape_cast %72 : vector<20xf32> to vector<20x1xf32>
    %74 = vector.broadcast %73 : vector<20x1xf32> to vector<20x20xf32>
    %75 = arith.subf %71, %74 : vector<20x20xf32>
    %76 = math.exp %75 : vector<20x20xf32>
    %cst_60 = arith.constant dense<0.000000e+00> : vector<20xf32>
    %77 = vector.multi_reduction <add>, %76, %cst_60 [1] : vector<20x20xf32> to vector<20xf32>
    %78 = vector.shape_cast %77 : vector<20xf32> to vector<20x1xf32>
    %79 = tpu.reciprocal %78 {approx = true} : vector<20x1xf32> -> vector<20x1xf32>
    %80 = vector.broadcast %79 : vector<20x1xf32> to vector<20x20xf32>
    %81 = arith.mulf %76, %80 : vector<20x20xf32>
    %cst_61 = arith.constant dense<0.000000e+00> : vector<20x2xf32>
    %82 = tpu.matmul %81, %67, %cst_61 {dimension_numbers = #tpu.dot_dimension_numbers<[1], [0], [0], [1], [0, 0, 1, 1], [], []>} : vector<20x20xf32>, vector<20x2xf32>, vector<20x2xf32> -> vector<20x2xf32>
    %c0_62 = arith.constant 0 : index
    %c2 = arith.constant 2 : index
    %c0_63 = arith.constant 0 : index
    %c0_64 = arith.constant 0 : index
    %83 = vector.load %arg6[%c0_62, %c2, %c0_63, %c0_64] : memref<5x4x8x2xf32, #tpu.memory_space<vmem>>, vector<1x1x8x2xf32>
    %84 = vector.shape_cast %83 : vector<1x1x8x2xf32> to vector<8x2xf32>
    %c0_65 = arith.constant 0 : index
    %c2_66 = arith.constant 2 : index
    %c0_67 = arith.constant 0 : index
    %c0_68 = arith.constant 0 : index
    %85 = vector.load %arg7[%c0_65, %c2_66, %c0_67, %c0_68] : memref<5x4x1x2xf32, #tpu.memory_space<vmem>>, vector<1x1x1x2xf32>
    %86 = vector.shape_cast %85 : vector<1x1x1x2xf32> to vector<1x2xf32>
    %cst_69 = arith.constant dense<0.000000e+00> : vector<20x2xf32>
    %87 = tpu.matmul %16, %84, %cst_69 {dimension_numbers = #tpu.dot_dimension_numbers<[1], [0], [0], [1], [0, 0, 1, 1], [], []>} : vector<20x8xf32>, vector<8x2xf32>, vector<20x2xf32> -> vector<20x2xf32>
    %88 = vector.broadcast %86 : vector<1x2xf32> to vector<20x2xf32>
    %89 = arith.addf %87, %88 : vector<20x2xf32>
    %c0_70 = arith.constant 0 : index
    %c2_71 = arith.constant 2 : index
    %c0_72 = arith.constant 0 : index
    %c0_73 = arith.constant 0 : index
    %90 = vector.load %arg10[%c0_70, %c2_71, %c0_72, %c0_73] : memref<5x4x8x2xf32, #tpu.memory_space<vmem>>, vector<1x1x8x2xf32>
    %91 = vector.shape_cast %90 : vector<1x1x8x2xf32> to vector<8x2xf32>
    %c0_74 = arith.constant 0 : index
    %c2_75 = arith.constant 2 : index
    %c0_76 = arith.constant 0 : index
    %c0_77 = arith.constant 0 : index
    %92 = vector.load %arg11[%c0_74, %c2_75, %c0_76, %c0_77] : memref<5x4x1x2xf32, #tpu.memory_space<vmem>>, vector<1x1x1x2xf32>
    %93 = vector.shape_cast %92 : vector<1x1x1x2xf32> to vector<1x2xf32>
    %cst_78 = arith.constant dense<0.000000e+00> : vector<20x2xf32>
    %94 = tpu.matmul %16, %91, %cst_78 {dimension_numbers = #tpu.dot_dimension_numbers<[1], [0], [0], [1], [0, 0, 1, 1], [], []>} : vector<20x8xf32>, vector<8x2xf32>, vector<20x2xf32> -> vector<20x2xf32>
    %95 = vector.broadcast %93 : vector<1x2xf32> to vector<20x2xf32>
    %96 = arith.addf %94, %95 : vector<20x2xf32>
    %97 = vector.extract_strided_slice %24 {offsets = [4, 0], sizes = [2, 20], strides = [1, 1]} : vector<8x20xf32> to vector<2x20xf32>
    %cst_79 = arith.constant dense<0.000000e+00> : vector<20x20xf32>
    %98 = tpu.matmul %89, %97, %cst_79 {dimension_numbers = #tpu.dot_dimension_numbers<[1], [0], [0], [1], [0, 0, 1, 1], [], []>} : vector<20x2xf32>, vector<2x20xf32>, vector<20x20xf32> -> vector<20x20xf32>
    %cst_80 = arith.constant -1.000000e+30 : f32
    %99 = vector.broadcast %cst_80 : f32 to vector<20x20xf32>
    %100 = arith.select %7, %98, %99 : vector<20x20xi1>, vector<20x20xf32>
    %cst_81 = arith.constant dense<0xFF800000> : vector<20xf32>
    %101 = vector.multi_reduction <maximumf>, %100, %cst_81 [1] : vector<20x20xf32> to vector<20xf32>
    %102 = vector.shape_cast %101 : vector<20xf32> to vector<20x1xf32>
    %103 = vector.broadcast %102 : vector<20x1xf32> to vector<20x20xf32>
    %104 = arith.subf %100, %103 : vector<20x20xf32>
    %105 = math.exp %104 : vector<20x20xf32>
    %cst_82 = arith.constant dense<0.000000e+00> : vector<20xf32>
    %106 = vector.multi_reduction <add>, %105, %cst_82 [1] : vector<20x20xf32> to vector<20xf32>
    %107 = vector.shape_cast %106 : vector<20xf32> to vector<20x1xf32>
    %108 = tpu.reciprocal %107 {approx = true} : vector<20x1xf32> -> vector<20x1xf32>
    %109 = vector.broadcast %108 : vector<20x1xf32> to vector<20x20xf32>
    %110 = arith.mulf %105, %109 : vector<20x20xf32>
    %cst_83 = arith.constant dense<0.000000e+00> : vector<20x2xf32>
    %111 = tpu.matmul %110, %96, %cst_83 {dimension_numbers = #tpu.dot_dimension_numbers<[1], [0], [0], [1], [0, 0, 1, 1], [], []>} : vector<20x20xf32>, vector<20x2xf32>, vector<20x2xf32> -> vector<20x2xf32>
    %c0_84 = arith.constant 0 : index
    %c3 = arith.constant 3 : index
    %c0_85 = arith.constant 0 : index
    %c0_86 = arith.constant 0 : index
    %112 = vector.load %arg6[%c0_84, %c3, %c0_85, %c0_86] : memref<5x4x8x2xf32, #tpu.memory_space<vmem>>, vector<1x1x8x2xf32>
    %113 = vector.shape_cast %112 : vector<1x1x8x2xf32> to vector<8x2xf32>
    %c0_87 = arith.constant 0 : index
    %c3_88 = arith.constant 3 : index
    %c0_89 = arith.constant 0 : index
    %c0_90 = arith.constant 0 : index
    %114 = vector.load %arg7[%c0_87, %c3_88, %c0_89, %c0_90] : memref<5x4x1x2xf32, #tpu.memory_space<vmem>>, vector<1x1x1x2xf32>
    %115 = vector.shape_cast %114 : vector<1x1x1x2xf32> to vector<1x2xf32>
    %cst_91 = arith.constant dense<0.000000e+00> : vector<20x2xf32>
    %116 = tpu.matmul %16, %113, %cst_91 {dimension_numbers = #tpu.dot_dimension_numbers<[1], [0], [0], [1], [0, 0, 1, 1], [], []>} : vector<20x8xf32>, vector<8x2xf32>, vector<20x2xf32> -> vector<20x2xf32>
    %117 = vector.broadcast %115 : vector<1x2xf32> to vector<20x2xf32>
    %118 = arith.addf %116, %117 : vector<20x2xf32>
    %c0_92 = arith.constant 0 : index
    %c3_93 = arith.constant 3 : index
    %c0_94 = arith.constant 0 : index
    %c0_95 = arith.constant 0 : index
    %119 = vector.load %arg10[%c0_92, %c3_93, %c0_94, %c0_95] : memref<5x4x8x2xf32, #tpu.memory_space<vmem>>, vector<1x1x8x2xf32>
    %120 = vector.shape_cast %119 : vector<1x1x8x2xf32> to vector<8x2xf32>
    %c0_96 = arith.constant 0 : index
    %c3_97 = arith.constant 3 : index
    %c0_98 = arith.constant 0 : index
    %c0_99 = arith.constant 0 : index
    %121 = vector.load %arg11[%c0_96, %c3_97, %c0_98, %c0_99] : memref<5x4x1x2xf32, #tpu.memory_space<vmem>>, vector<1x1x1x2xf32>
    %122 = vector.shape_cast %121 : vector<1x1x1x2xf32> to vector<1x2xf32>
    %cst_100 = arith.constant dense<0.000000e+00> : vector<20x2xf32>
    %123 = tpu.matmul %16, %120, %cst_100 {dimension_numbers = #tpu.dot_dimension_numbers<[1], [0], [0], [1], [0, 0, 1, 1], [], []>} : vector<20x8xf32>, vector<8x2xf32>, vector<20x2xf32> -> vector<20x2xf32>
    %124 = vector.broadcast %122 : vector<1x2xf32> to vector<20x2xf32>
    %125 = arith.addf %123, %124 : vector<20x2xf32>
    %126 = vector.extract_strided_slice %24 {offsets = [6, 0], sizes = [2, 20], strides = [1, 1]} : vector<8x20xf32> to vector<2x20xf32>
    %cst_101 = arith.constant dense<0.000000e+00> : vector<20x20xf32>
    %127 = tpu.matmul %118, %126, %cst_101 {dimension_numbers = #tpu.dot_dimension_numbers<[1], [0], [0], [1], [0, 0, 1, 1], [], []>} : vector<20x2xf32>, vector<2x20xf32>, vector<20x20xf32> -> vector<20x20xf32>
    %cst_102 = arith.constant -1.000000e+30 : f32
    %128 = vector.broadcast %cst_102 : f32 to vector<20x20xf32>
    %129 = arith.select %7, %127, %128 : vector<20x20xi1>, vector<20x20xf32>
    %cst_103 = arith.constant dense<0xFF800000> : vector<20xf32>
    %130 = vector.multi_reduction <maximumf>, %129, %cst_103 [1] : vector<20x20xf32> to vector<20xf32>
    %131 = vector.shape_cast %130 : vector<20xf32> to vector<20x1xf32>
    %132 = vector.broadcast %131 : vector<20x1xf32> to vector<20x20xf32>
    %133 = arith.subf %129, %132 : vector<20x20xf32>
    %134 = math.exp %133 : vector<20x20xf32>
    %cst_104 = arith.constant dense<0.000000e+00> : vector<20xf32>
    %135 = vector.multi_reduction <add>, %134, %cst_104 [1] : vector<20x20xf32> to vector<20xf32>
    %136 = vector.shape_cast %135 : vector<20xf32> to vector<20x1xf32>
    %137 = tpu.reciprocal %136 {approx = true} : vector<20x1xf32> -> vector<20x1xf32>
    %138 = vector.broadcast %137 : vector<20x1xf32> to vector<20x20xf32>
    %139 = arith.mulf %134, %138 : vector<20x20xf32>
    %cst_105 = arith.constant dense<0.000000e+00> : vector<20x2xf32>
    %140 = tpu.matmul %139, %125, %cst_105 {dimension_numbers = #tpu.dot_dimension_numbers<[1], [0], [0], [1], [0, 0, 1, 1], [], []>} : vector<20x20xf32>, vector<20x2xf32>, vector<20x2xf32> -> vector<20x2xf32>
    %141 = tpu.concatenate %53, %82, %111, %140 in 1 : vector<20x2xf32>, vector<20x2xf32>, vector<20x2xf32>, vector<20x2xf32> -> vector<20x8xf32>
    %c0_106 = arith.constant 0 : index
    %c0_107 = arith.constant 0 : index
    %c0_108 = arith.constant 0 : index
    %142 = vector.load %arg12[%c0_106, %c0_107, %c0_108] : memref<5x8x8xf32, #tpu.memory_space<vmem>>, vector<1x8x8xf32>
    %143 = vector.shape_cast %142 : vector<1x8x8xf32> to vector<8x8xf32>
    %c0_109 = arith.constant 0 : index
    %c0_110 = arith.constant 0 : index
    %c0_111 = arith.constant 0 : index
    %144 = vector.load %arg13[%c0_109, %c0_110, %c0_111] : memref<5x1x8xf32, #tpu.memory_space<vmem>>, vector<1x1x8xf32>
    %145 = vector.shape_cast %144 : vector<1x1x8xf32> to vector<1x8xf32>
    %cst_112 = arith.constant dense<0.000000e+00> : vector<20x8xf32>
    %146 = tpu.matmul %141, %143, %cst_112 {dimension_numbers = #tpu.dot_dimension_numbers<[1], [0], [0], [1], [0, 0, 1, 1], [], []>} : vector<20x8xf32>, vector<8x8xf32>, vector<20x8xf32> -> vector<20x8xf32>
    %147 = vector.broadcast %145 : vector<1x8xf32> to vector<20x8xf32>
    %148 = arith.addf %146, %147 : vector<20x8xf32>
    %149 = arith.addf %16, %148 : vector<20x8xf32>
    %c0_113 = arith.constant 0 : index
    %c0_114 = arith.constant 0 : index
    %c0_115 = arith.constant 0 : index
    %150 = vector.load %arg14[%c0_113, %c0_114, %c0_115] : memref<3x8x16xf32, #tpu.memory_space<vmem>>, vector<1x8x16xf32>
    %151 = vector.shape_cast %150 : vector<1x8x16xf32> to vector<8x16xf32>
    %c0_116 = arith.constant 0 : index
    %c0_117 = arith.constant 0 : index
    %c0_118 = arith.constant 0 : index
    %152 = vector.load %arg15[%c0_116, %c0_117, %c0_118] : memref<3x1x16xf32, #tpu.memory_space<vmem>>, vector<1x1x16xf32>
    %153 = vector.shape_cast %152 : vector<1x1x16xf32> to vector<1x16xf32>
    %cst_119 = arith.constant dense<0.000000e+00> : vector<20x16xf32>
    %154 = tpu.matmul %149, %151, %cst_119 {dimension_numbers = #tpu.dot_dimension_numbers<[1], [0], [0], [1], [0, 0, 1, 1], [], []>} : vector<20x8xf32>, vector<8x16xf32>, vector<20x16xf32> -> vector<20x16xf32>
    %155 = vector.broadcast %153 : vector<1x16xf32> to vector<20x16xf32>
    %156 = arith.addf %154, %155 : vector<20x16xf32>
    %c0_120 = arith.constant 0 : index
    %c0_121 = arith.constant 0 : index
    %c0_122 = arith.constant 0 : index
    %157 = vector.load %arg16[%c0_120, %c0_121, %c0_122] : memref<3x16x8xf32, #tpu.memory_space<vmem>>, vector<1x16x8xf32>
    %158 = vector.shape_cast %157 : vector<1x16x8xf32> to vector<16x8xf32>
    %c0_123 = arith.constant 0 : index
    %c0_124 = arith.constant 0 : index
    %c0_125 = arith.constant 0 : index
    %159 = vector.load %arg17[%c0_123, %c0_124, %c0_125] : memref<3x1x8xf32, #tpu.memory_space<vmem>>, vector<1x1x8xf32>
    %160 = vector.shape_cast %159 : vector<1x1x8xf32> to vector<1x8xf32>
    %cst_126 = arith.constant dense<0.000000e+00> : vector<20x8xf32>
    %161 = tpu.matmul %156, %158, %cst_126 {dimension_numbers = #tpu.dot_dimension_numbers<[1], [0], [0], [1], [0, 0, 1, 1], [], []>} : vector<20x16xf32>, vector<16x8xf32>, vector<20x8xf32> -> vector<20x8xf32>
    %162 = vector.broadcast %160 : vector<1x8xf32> to vector<20x8xf32>
    %163 = arith.addf %161, %162 : vector<20x8xf32>
    %164 = arith.addf %149, %163 : vector<20x8xf32>
    %c1_127 = arith.constant 1 : index
    %c0_128 = arith.constant 0 : index
    %c0_129 = arith.constant 0 : index
    %c0_130 = arith.constant 0 : index
    %165 = vector.load %arg10[%c1_127, %c0_128, %c0_129, %c0_130] : memref<5x4x8x2xf32, #tpu.memory_space<vmem>>, vector<1x1x8x2xf32>
    %166 = vector.shape_cast %165 : vector<1x1x8x2xf32> to vector<8x2xf32>
    %c1_131 = arith.constant 1 : index
    %c0_132 = arith.constant 0 : index
    %c0_133 = arith.constant 0 : index
    %c0_134 = arith.constant 0 : index
    %167 = vector.load %arg11[%c1_131, %c0_132, %c0_133, %c0_134] : memref<5x4x1x2xf32, #tpu.memory_space<vmem>>, vector<1x1x1x2xf32>
    %168 = vector.shape_cast %167 : vector<1x1x1x2xf32> to vector<1x2xf32>
    %cst_135 = arith.constant dense<0.000000e+00> : vector<2x2xf32>
    %169 = tpu.matmul %13, %166, %cst_135 {dimension_numbers = #tpu.dot_dimension_numbers<[1], [0], [0], [1], [0, 0, 1, 1], [], []>} : vector<2x8xf32>, vector<8x2xf32>, vector<2x2xf32> -> vector<2x2xf32>
    %170 = vector.broadcast %168 : vector<1x2xf32> to vector<2x2xf32>
    %171 = arith.addf %169, %170 : vector<2x2xf32>
    %c1_136 = arith.constant 1 : index
    %c1_137 = arith.constant 1 : index
    %c0_138 = arith.constant 0 : index
    %c0_139 = arith.constant 0 : index
    %172 = vector.load %arg10[%c1_136, %c1_137, %c0_138, %c0_139] : memref<5x4x8x2xf32, #tpu.memory_space<vmem>>, vector<1x1x8x2xf32>
    %173 = vector.shape_cast %172 : vector<1x1x8x2xf32> to vector<8x2xf32>
    %c1_140 = arith.constant 1 : index
    %c1_141 = arith.constant 1 : index
    %c0_142 = arith.constant 0 : index
    %c0_143 = arith.constant 0 : index
    %174 = vector.load %arg11[%c1_140, %c1_141, %c0_142, %c0_143] : memref<5x4x1x2xf32, #tpu.memory_space<vmem>>, vector<1x1x1x2xf32>
    %175 = vector.shape_cast %174 : vector<1x1x1x2xf32> to vector<1x2xf32>
    %cst_144 = arith.constant dense<0.000000e+00> : vector<2x2xf32>
    %176 = tpu.matmul %13, %173, %cst_144 {dimension_numbers = #tpu.dot_dimension_numbers<[1], [0], [0], [1], [0, 0, 1, 1], [], []>} : vector<2x8xf32>, vector<8x2xf32>, vector<2x2xf32> -> vector<2x2xf32>
    %177 = vector.broadcast %175 : vector<1x2xf32> to vector<2x2xf32>
    %178 = arith.addf %176, %177 : vector<2x2xf32>
    %c1_145 = arith.constant 1 : index
    %c2_146 = arith.constant 2 : index
    %c0_147 = arith.constant 0 : index
    %c0_148 = arith.constant 0 : index
    %179 = vector.load %arg10[%c1_145, %c2_146, %c0_147, %c0_148] : memref<5x4x8x2xf32, #tpu.memory_space<vmem>>, vector<1x1x8x2xf32>
    %180 = vector.shape_cast %179 : vector<1x1x8x2xf32> to vector<8x2xf32>
    %c1_149 = arith.constant 1 : index
    %c2_150 = arith.constant 2 : index
    %c0_151 = arith.constant 0 : index
    %c0_152 = arith.constant 0 : index
    %181 = vector.load %arg11[%c1_149, %c2_150, %c0_151, %c0_152] : memref<5x4x1x2xf32, #tpu.memory_space<vmem>>, vector<1x1x1x2xf32>
    %182 = vector.shape_cast %181 : vector<1x1x1x2xf32> to vector<1x2xf32>
    %cst_153 = arith.constant dense<0.000000e+00> : vector<2x2xf32>
    %183 = tpu.matmul %13, %180, %cst_153 {dimension_numbers = #tpu.dot_dimension_numbers<[1], [0], [0], [1], [0, 0, 1, 1], [], []>} : vector<2x8xf32>, vector<8x2xf32>, vector<2x2xf32> -> vector<2x2xf32>
    %184 = vector.broadcast %182 : vector<1x2xf32> to vector<2x2xf32>
    %185 = arith.addf %183, %184 : vector<2x2xf32>
    %c1_154 = arith.constant 1 : index
    %c3_155 = arith.constant 3 : index
    %c0_156 = arith.constant 0 : index
    %c0_157 = arith.constant 0 : index
    %186 = vector.load %arg10[%c1_154, %c3_155, %c0_156, %c0_157] : memref<5x4x8x2xf32, #tpu.memory_space<vmem>>, vector<1x1x8x2xf32>
    %187 = vector.shape_cast %186 : vector<1x1x8x2xf32> to vector<8x2xf32>
    %c1_158 = arith.constant 1 : index
    %c3_159 = arith.constant 3 : index
    %c0_160 = arith.constant 0 : index
    %c0_161 = arith.constant 0 : index
    %188 = vector.load %arg11[%c1_158, %c3_159, %c0_160, %c0_161] : memref<5x4x1x2xf32, #tpu.memory_space<vmem>>, vector<1x1x1x2xf32>
    %189 = vector.shape_cast %188 : vector<1x1x1x2xf32> to vector<1x2xf32>
    %cst_162 = arith.constant dense<0.000000e+00> : vector<2x2xf32>
    %190 = tpu.matmul %13, %187, %cst_162 {dimension_numbers = #tpu.dot_dimension_numbers<[1], [0], [0], [1], [0, 0, 1, 1], [], []>} : vector<2x8xf32>, vector<8x2xf32>, vector<2x2xf32> -> vector<2x2xf32>
    %191 = vector.broadcast %189 : vector<1x2xf32> to vector<2x2xf32>
    %192 = arith.addf %190, %191 : vector<2x2xf32>
    %193 = tpu.concatenate %171, %178, %185, %192 in 1 : vector<2x2xf32>, vector<2x2xf32>, vector<2x2xf32>, vector<2x2xf32> -> vector<2x8xf32>
    %c1_163 = arith.constant 1 : index
    %c0_164 = arith.constant 0 : index
    %c0_165 = arith.constant 0 : index
    %194 = vector.load %arg12[%c1_163, %c0_164, %c0_165] : memref<5x8x8xf32, #tpu.memory_space<vmem>>, vector<1x8x8xf32>
    %195 = vector.shape_cast %194 : vector<1x8x8xf32> to vector<8x8xf32>
    %c1_166 = arith.constant 1 : index
    %c0_167 = arith.constant 0 : index
    %c0_168 = arith.constant 0 : index
    %196 = vector.load %arg13[%c1_166, %c0_167, %c0_168] : memref<5x1x8xf32, #tpu.memory_space<vmem>>, vector<1x1x8xf32>
    %197 = vector.shape_cast %196 : vector<1x1x8xf32> to vector<1x8xf32>
    %cst_169 = arith.constant dense<0.000000e+00> : vector<2x8xf32>
    %198 = tpu.matmul %193, %195, %cst_169 {dimension_numbers = #tpu.dot_dimension_numbers<[1], [0], [0], [1], [0, 0, 1, 1], [], []>} : vector<2x8xf32>, vector<8x8xf32>, vector<2x8xf32> -> vector<2x8xf32>
    %199 = vector.broadcast %197 : vector<1x8xf32> to vector<2x8xf32>
    %200 = arith.addf %198, %199 : vector<2x8xf32>
    %201 = arith.addf %13, %200 : vector<2x8xf32>
    %c2_170 = arith.constant 2 : index
    %c0_171 = arith.constant 0 : index
    %c0_172 = arith.constant 0 : index
    %202 = vector.load %arg8[%c2_170, %c0_171, %c0_172] : memref<5x8x8xf32, #tpu.memory_space<vmem>>, vector<1x8x8xf32>
    %203 = vector.shape_cast %202 : vector<1x8x8xf32> to vector<8x8xf32>
    %c2_173 = arith.constant 2 : index
    %c0_174 = arith.constant 0 : index
    %c0_175 = arith.constant 0 : index
    %204 = vector.load %arg9[%c2_173, %c0_174, %c0_175] : memref<5x1x8xf32, #tpu.memory_space<vmem>>, vector<1x1x8xf32>
    %205 = vector.shape_cast %204 : vector<1x1x8xf32> to vector<1x8xf32>
    %cst_176 = arith.constant dense<0.000000e+00> : vector<20x8xf32>
    %206 = tpu.matmul %164, %203, %cst_176 {dimension_numbers = #tpu.dot_dimension_numbers<[1], [0], [0], [1], [0, 0, 1, 1], [], []>} : vector<20x8xf32>, vector<8x8xf32>, vector<20x8xf32> -> vector<20x8xf32>
    %207 = vector.broadcast %205 : vector<1x8xf32> to vector<20x8xf32>
    %208 = arith.addf %206, %207 : vector<20x8xf32>
    %209 = tpu.transpose %208, [1, 0] : vector<20x8xf32> -> vector<8x20xf32>
    %c2_177 = arith.constant 2 : index
    %c0_178 = arith.constant 0 : index
    %c0_179 = arith.constant 0 : index
    %c0_180 = arith.constant 0 : index
    %210 = vector.load %arg6[%c2_177, %c0_178, %c0_179, %c0_180] : memref<5x4x8x2xf32, #tpu.memory_space<vmem>>, vector<1x1x8x2xf32>
    %211 = vector.shape_cast %210 : vector<1x1x8x2xf32> to vector<8x2xf32>
    %c2_181 = arith.constant 2 : index
    %c0_182 = arith.constant 0 : index
    %c0_183 = arith.constant 0 : index
    %c0_184 = arith.constant 0 : index
    %212 = vector.load %arg7[%c2_181, %c0_182, %c0_183, %c0_184] : memref<5x4x1x2xf32, #tpu.memory_space<vmem>>, vector<1x1x1x2xf32>
    %213 = vector.shape_cast %212 : vector<1x1x1x2xf32> to vector<1x2xf32>
    %cst_185 = arith.constant dense<0.000000e+00> : vector<2x2xf32>
    %214 = tpu.matmul %201, %211, %cst_185 {dimension_numbers = #tpu.dot_dimension_numbers<[1], [0], [0], [1], [0, 0, 1, 1], [], []>} : vector<2x8xf32>, vector<8x2xf32>, vector<2x2xf32> -> vector<2x2xf32>
    %215 = vector.broadcast %213 : vector<1x2xf32> to vector<2x2xf32>
    %216 = arith.addf %214, %215 : vector<2x2xf32>
    %c2_186 = arith.constant 2 : index
    %c0_187 = arith.constant 0 : index
    %c0_188 = arith.constant 0 : index
    %c0_189 = arith.constant 0 : index
    %217 = vector.load %arg10[%c2_186, %c0_187, %c0_188, %c0_189] : memref<5x4x8x2xf32, #tpu.memory_space<vmem>>, vector<1x1x8x2xf32>
    %218 = vector.shape_cast %217 : vector<1x1x8x2xf32> to vector<8x2xf32>
    %c2_190 = arith.constant 2 : index
    %c0_191 = arith.constant 0 : index
    %c0_192 = arith.constant 0 : index
    %c0_193 = arith.constant 0 : index
    %219 = vector.load %arg11[%c2_190, %c0_191, %c0_192, %c0_193] : memref<5x4x1x2xf32, #tpu.memory_space<vmem>>, vector<1x1x1x2xf32>
    %220 = vector.shape_cast %219 : vector<1x1x1x2xf32> to vector<1x2xf32>
    %cst_194 = arith.constant dense<0.000000e+00> : vector<20x2xf32>
    %221 = tpu.matmul %164, %218, %cst_194 {dimension_numbers = #tpu.dot_dimension_numbers<[1], [0], [0], [1], [0, 0, 1, 1], [], []>} : vector<20x8xf32>, vector<8x2xf32>, vector<20x2xf32> -> vector<20x2xf32>
    %222 = vector.broadcast %220 : vector<1x2xf32> to vector<20x2xf32>
    %223 = arith.addf %221, %222 : vector<20x2xf32>
    %224 = vector.extract_strided_slice %209 {offsets = [0, 0], sizes = [2, 20], strides = [1, 1]} : vector<8x20xf32> to vector<2x20xf32>
    %cst_195 = arith.constant dense<0.000000e+00> : vector<2x20xf32>
    %225 = tpu.matmul %216, %224, %cst_195 {dimension_numbers = #tpu.dot_dimension_numbers<[1], [0], [0], [1], [0, 0, 1, 1], [], []>} : vector<2x2xf32>, vector<2x20xf32>, vector<2x20xf32> -> vector<2x20xf32>
    %cst_196 = arith.constant -1.000000e+30 : f32
    %226 = vector.broadcast %cst_196 : f32 to vector<2x20xf32>
    %227 = arith.select %10, %225, %226 : vector<2x20xi1>, vector<2x20xf32>
    %cst_197 = arith.constant dense<0xFF800000> : vector<2xf32>
    %228 = vector.multi_reduction <maximumf>, %227, %cst_197 [1] : vector<2x20xf32> to vector<2xf32>
    %229 = vector.shape_cast %228 : vector<2xf32> to vector<2x1xf32>
    %230 = vector.broadcast %229 : vector<2x1xf32> to vector<2x20xf32>
    %231 = arith.subf %227, %230 : vector<2x20xf32>
    %232 = math.exp %231 : vector<2x20xf32>
    %cst_198 = arith.constant dense<0.000000e+00> : vector<2xf32>
    %233 = vector.multi_reduction <add>, %232, %cst_198 [1] : vector<2x20xf32> to vector<2xf32>
    %234 = vector.shape_cast %233 : vector<2xf32> to vector<2x1xf32>
    %235 = tpu.reciprocal %234 {approx = true} : vector<2x1xf32> -> vector<2x1xf32>
    %236 = vector.broadcast %235 : vector<2x1xf32> to vector<2x20xf32>
    %237 = arith.mulf %232, %236 : vector<2x20xf32>
    %cst_199 = arith.constant dense<0.000000e+00> : vector<2x2xf32>
    %238 = tpu.matmul %237, %223, %cst_199 {dimension_numbers = #tpu.dot_dimension_numbers<[1], [0], [0], [1], [0, 0, 1, 1], [], []>} : vector<2x20xf32>, vector<20x2xf32>, vector<2x2xf32> -> vector<2x2xf32>
    %c2_200 = arith.constant 2 : index
    %c1_201 = arith.constant 1 : index
    %c0_202 = arith.constant 0 : index
    %c0_203 = arith.constant 0 : index
    %239 = vector.load %arg6[%c2_200, %c1_201, %c0_202, %c0_203] : memref<5x4x8x2xf32, #tpu.memory_space<vmem>>, vector<1x1x8x2xf32>
    %240 = vector.shape_cast %239 : vector<1x1x8x2xf32> to vector<8x2xf32>
    %c2_204 = arith.constant 2 : index
    %c1_205 = arith.constant 1 : index
    %c0_206 = arith.constant 0 : index
    %c0_207 = arith.constant 0 : index
    %241 = vector.load %arg7[%c2_204, %c1_205, %c0_206, %c0_207] : memref<5x4x1x2xf32, #tpu.memory_space<vmem>>, vector<1x1x1x2xf32>
    %242 = vector.shape_cast %241 : vector<1x1x1x2xf32> to vector<1x2xf32>
    %cst_208 = arith.constant dense<0.000000e+00> : vector<2x2xf32>
    %243 = tpu.matmul %201, %240, %cst_208 {dimension_numbers = #tpu.dot_dimension_numbers<[1], [0], [0], [1], [0, 0, 1, 1], [], []>} : vector<2x8xf32>, vector<8x2xf32>, vector<2x2xf32> -> vector<2x2xf32>
    %244 = vector.broadcast %242 : vector<1x2xf32> to vector<2x2xf32>
    %245 = arith.addf %243, %244 : vector<2x2xf32>
    %c2_209 = arith.constant 2 : index
    %c1_210 = arith.constant 1 : index
    %c0_211 = arith.constant 0 : index
    %c0_212 = arith.constant 0 : index
    %246 = vector.load %arg10[%c2_209, %c1_210, %c0_211, %c0_212] : memref<5x4x8x2xf32, #tpu.memory_space<vmem>>, vector<1x1x8x2xf32>
    %247 = vector.shape_cast %246 : vector<1x1x8x2xf32> to vector<8x2xf32>
    %c2_213 = arith.constant 2 : index
    %c1_214 = arith.constant 1 : index
    %c0_215 = arith.constant 0 : index
    %c0_216 = arith.constant 0 : index
    %248 = vector.load %arg11[%c2_213, %c1_214, %c0_215, %c0_216] : memref<5x4x1x2xf32, #tpu.memory_space<vmem>>, vector<1x1x1x2xf32>
    %249 = vector.shape_cast %248 : vector<1x1x1x2xf32> to vector<1x2xf32>
    %cst_217 = arith.constant dense<0.000000e+00> : vector<20x2xf32>
    %250 = tpu.matmul %164, %247, %cst_217 {dimension_numbers = #tpu.dot_dimension_numbers<[1], [0], [0], [1], [0, 0, 1, 1], [], []>} : vector<20x8xf32>, vector<8x2xf32>, vector<20x2xf32> -> vector<20x2xf32>
    %251 = vector.broadcast %249 : vector<1x2xf32> to vector<20x2xf32>
    %252 = arith.addf %250, %251 : vector<20x2xf32>
    %253 = vector.extract_strided_slice %209 {offsets = [2, 0], sizes = [2, 20], strides = [1, 1]} : vector<8x20xf32> to vector<2x20xf32>
    %cst_218 = arith.constant dense<0.000000e+00> : vector<2x20xf32>
    %254 = tpu.matmul %245, %253, %cst_218 {dimension_numbers = #tpu.dot_dimension_numbers<[1], [0], [0], [1], [0, 0, 1, 1], [], []>} : vector<2x2xf32>, vector<2x20xf32>, vector<2x20xf32> -> vector<2x20xf32>
    %cst_219 = arith.constant -1.000000e+30 : f32
    %255 = vector.broadcast %cst_219 : f32 to vector<2x20xf32>
    %256 = arith.select %10, %254, %255 : vector<2x20xi1>, vector<2x20xf32>
    %cst_220 = arith.constant dense<0xFF800000> : vector<2xf32>
    %257 = vector.multi_reduction <maximumf>, %256, %cst_220 [1] : vector<2x20xf32> to vector<2xf32>
    %258 = vector.shape_cast %257 : vector<2xf32> to vector<2x1xf32>
    %259 = vector.broadcast %258 : vector<2x1xf32> to vector<2x20xf32>
    %260 = arith.subf %256, %259 : vector<2x20xf32>
    %261 = math.exp %260 : vector<2x20xf32>
    %cst_221 = arith.constant dense<0.000000e+00> : vector<2xf32>
    %262 = vector.multi_reduction <add>, %261, %cst_221 [1] : vector<2x20xf32> to vector<2xf32>
    %263 = vector.shape_cast %262 : vector<2xf32> to vector<2x1xf32>
    %264 = tpu.reciprocal %263 {approx = true} : vector<2x1xf32> -> vector<2x1xf32>
    %265 = vector.broadcast %264 : vector<2x1xf32> to vector<2x20xf32>
    %266 = arith.mulf %261, %265 : vector<2x20xf32>
    %cst_222 = arith.constant dense<0.000000e+00> : vector<2x2xf32>
    %267 = tpu.matmul %266, %252, %cst_222 {dimension_numbers = #tpu.dot_dimension_numbers<[1], [0], [0], [1], [0, 0, 1, 1], [], []>} : vector<2x20xf32>, vector<20x2xf32>, vector<2x2xf32> -> vector<2x2xf32>
    %c2_223 = arith.constant 2 : index
    %c2_224 = arith.constant 2 : index
    %c0_225 = arith.constant 0 : index
    %c0_226 = arith.constant 0 : index
    %268 = vector.load %arg6[%c2_223, %c2_224, %c0_225, %c0_226] : memref<5x4x8x2xf32, #tpu.memory_space<vmem>>, vector<1x1x8x2xf32>
    %269 = vector.shape_cast %268 : vector<1x1x8x2xf32> to vector<8x2xf32>
    %c2_227 = arith.constant 2 : index
    %c2_228 = arith.constant 2 : index
    %c0_229 = arith.constant 0 : index
    %c0_230 = arith.constant 0 : index
    %270 = vector.load %arg7[%c2_227, %c2_228, %c0_229, %c0_230] : memref<5x4x1x2xf32, #tpu.memory_space<vmem>>, vector<1x1x1x2xf32>
    %271 = vector.shape_cast %270 : vector<1x1x1x2xf32> to vector<1x2xf32>
    %cst_231 = arith.constant dense<0.000000e+00> : vector<2x2xf32>
    %272 = tpu.matmul %201, %269, %cst_231 {dimension_numbers = #tpu.dot_dimension_numbers<[1], [0], [0], [1], [0, 0, 1, 1], [], []>} : vector<2x8xf32>, vector<8x2xf32>, vector<2x2xf32> -> vector<2x2xf32>
    %273 = vector.broadcast %271 : vector<1x2xf32> to vector<2x2xf32>
    %274 = arith.addf %272, %273 : vector<2x2xf32>
    %c2_232 = arith.constant 2 : index
    %c2_233 = arith.constant 2 : index
    %c0_234 = arith.constant 0 : index
    %c0_235 = arith.constant 0 : index
    %275 = vector.load %arg10[%c2_232, %c2_233, %c0_234, %c0_235] : memref<5x4x8x2xf32, #tpu.memory_space<vmem>>, vector<1x1x8x2xf32>
    %276 = vector.shape_cast %275 : vector<1x1x8x2xf32> to vector<8x2xf32>
    %c2_236 = arith.constant 2 : index
    %c2_237 = arith.constant 2 : index
    %c0_238 = arith.constant 0 : index
    %c0_239 = arith.constant 0 : index
    %277 = vector.load %arg11[%c2_236, %c2_237, %c0_238, %c0_239] : memref<5x4x1x2xf32, #tpu.memory_space<vmem>>, vector<1x1x1x2xf32>
    %278 = vector.shape_cast %277 : vector<1x1x1x2xf32> to vector<1x2xf32>
    %cst_240 = arith.constant dense<0.000000e+00> : vector<20x2xf32>
    %279 = tpu.matmul %164, %276, %cst_240 {dimension_numbers = #tpu.dot_dimension_numbers<[1], [0], [0], [1], [0, 0, 1, 1], [], []>} : vector<20x8xf32>, vector<8x2xf32>, vector<20x2xf32> -> vector<20x2xf32>
    %280 = vector.broadcast %278 : vector<1x2xf32> to vector<20x2xf32>
    %281 = arith.addf %279, %280 : vector<20x2xf32>
    %282 = vector.extract_strided_slice %209 {offsets = [4, 0], sizes = [2, 20], strides = [1, 1]} : vector<8x20xf32> to vector<2x20xf32>
    %cst_241 = arith.constant dense<0.000000e+00> : vector<2x20xf32>
    %283 = tpu.matmul %274, %282, %cst_241 {dimension_numbers = #tpu.dot_dimension_numbers<[1], [0], [0], [1], [0, 0, 1, 1], [], []>} : vector<2x2xf32>, vector<2x20xf32>, vector<2x20xf32> -> vector<2x20xf32>
    %cst_242 = arith.constant -1.000000e+30 : f32
    %284 = vector.broadcast %cst_242 : f32 to vector<2x20xf32>
    %285 = arith.select %10, %283, %284 : vector<2x20xi1>, vector<2x20xf32>
    %cst_243 = arith.constant dense<0xFF800000> : vector<2xf32>
    %286 = vector.multi_reduction <maximumf>, %285, %cst_243 [1] : vector<2x20xf32> to vector<2xf32>
    %287 = vector.shape_cast %286 : vector<2xf32> to vector<2x1xf32>
    %288 = vector.broadcast %287 : vector<2x1xf32> to vector<2x20xf32>
    %289 = arith.subf %285, %288 : vector<2x20xf32>
    %290 = math.exp %289 : vector<2x20xf32>
    %cst_244 = arith.constant dense<0.000000e+00> : vector<2xf32>
    %291 = vector.multi_reduction <add>, %290, %cst_244 [1] : vector<2x20xf32> to vector<2xf32>
    %292 = vector.shape_cast %291 : vector<2xf32> to vector<2x1xf32>
    %293 = tpu.reciprocal %292 {approx = true} : vector<2x1xf32> -> vector<2x1xf32>
    %294 = vector.broadcast %293 : vector<2x1xf32> to vector<2x20xf32>
    %295 = arith.mulf %290, %294 : vector<2x20xf32>
    %cst_245 = arith.constant dense<0.000000e+00> : vector<2x2xf32>
    %296 = tpu.matmul %295, %281, %cst_245 {dimension_numbers = #tpu.dot_dimension_numbers<[1], [0], [0], [1], [0, 0, 1, 1], [], []>} : vector<2x20xf32>, vector<20x2xf32>, vector<2x2xf32> -> vector<2x2xf32>
    %c2_246 = arith.constant 2 : index
    %c3_247 = arith.constant 3 : index
    %c0_248 = arith.constant 0 : index
    %c0_249 = arith.constant 0 : index
    %297 = vector.load %arg6[%c2_246, %c3_247, %c0_248, %c0_249] : memref<5x4x8x2xf32, #tpu.memory_space<vmem>>, vector<1x1x8x2xf32>
    %298 = vector.shape_cast %297 : vector<1x1x8x2xf32> to vector<8x2xf32>
    %c2_250 = arith.constant 2 : index
    %c3_251 = arith.constant 3 : index
    %c0_252 = arith.constant 0 : index
    %c0_253 = arith.constant 0 : index
    %299 = vector.load %arg7[%c2_250, %c3_251, %c0_252, %c0_253] : memref<5x4x1x2xf32, #tpu.memory_space<vmem>>, vector<1x1x1x2xf32>
    %300 = vector.shape_cast %299 : vector<1x1x1x2xf32> to vector<1x2xf32>
    %cst_254 = arith.constant dense<0.000000e+00> : vector<2x2xf32>
    %301 = tpu.matmul %201, %298, %cst_254 {dimension_numbers = #tpu.dot_dimension_numbers<[1], [0], [0], [1], [0, 0, 1, 1], [], []>} : vector<2x8xf32>, vector<8x2xf32>, vector<2x2xf32> -> vector<2x2xf32>
    %302 = vector.broadcast %300 : vector<1x2xf32> to vector<2x2xf32>
    %303 = arith.addf %301, %302 : vector<2x2xf32>
    %c2_255 = arith.constant 2 : index
    %c3_256 = arith.constant 3 : index
    %c0_257 = arith.constant 0 : index
    %c0_258 = arith.constant 0 : index
    %304 = vector.load %arg10[%c2_255, %c3_256, %c0_257, %c0_258] : memref<5x4x8x2xf32, #tpu.memory_space<vmem>>, vector<1x1x8x2xf32>
    %305 = vector.shape_cast %304 : vector<1x1x8x2xf32> to vector<8x2xf32>
    %c2_259 = arith.constant 2 : index
    %c3_260 = arith.constant 3 : index
    %c0_261 = arith.constant 0 : index
    %c0_262 = arith.constant 0 : index
    %306 = vector.load %arg11[%c2_259, %c3_260, %c0_261, %c0_262] : memref<5x4x1x2xf32, #tpu.memory_space<vmem>>, vector<1x1x1x2xf32>
    %307 = vector.shape_cast %306 : vector<1x1x1x2xf32> to vector<1x2xf32>
    %cst_263 = arith.constant dense<0.000000e+00> : vector<20x2xf32>
    %308 = tpu.matmul %164, %305, %cst_263 {dimension_numbers = #tpu.dot_dimension_numbers<[1], [0], [0], [1], [0, 0, 1, 1], [], []>} : vector<20x8xf32>, vector<8x2xf32>, vector<20x2xf32> -> vector<20x2xf32>
    %309 = vector.broadcast %307 : vector<1x2xf32> to vector<20x2xf32>
    %310 = arith.addf %308, %309 : vector<20x2xf32>
    %311 = vector.extract_strided_slice %209 {offsets = [6, 0], sizes = [2, 20], strides = [1, 1]} : vector<8x20xf32> to vector<2x20xf32>
    %cst_264 = arith.constant dense<0.000000e+00> : vector<2x20xf32>
    %312 = tpu.matmul %303, %311, %cst_264 {dimension_numbers = #tpu.dot_dimension_numbers<[1], [0], [0], [1], [0, 0, 1, 1], [], []>} : vector<2x2xf32>, vector<2x20xf32>, vector<2x20xf32> -> vector<2x20xf32>
    %cst_265 = arith.constant -1.000000e+30 : f32
    %313 = vector.broadcast %cst_265 : f32 to vector<2x20xf32>
    %314 = arith.select %10, %312, %313 : vector<2x20xi1>, vector<2x20xf32>
    %cst_266 = arith.constant dense<0xFF800000> : vector<2xf32>
    %315 = vector.multi_reduction <maximumf>, %314, %cst_266 [1] : vector<2x20xf32> to vector<2xf32>
    %316 = vector.shape_cast %315 : vector<2xf32> to vector<2x1xf32>
    %317 = vector.broadcast %316 : vector<2x1xf32> to vector<2x20xf32>
    %318 = arith.subf %314, %317 : vector<2x20xf32>
    %319 = math.exp %318 : vector<2x20xf32>
    %cst_267 = arith.constant dense<0.000000e+00> : vector<2xf32>
    %320 = vector.multi_reduction <add>, %319, %cst_267 [1] : vector<2x20xf32> to vector<2xf32>
    %321 = vector.shape_cast %320 : vector<2xf32> to vector<2x1xf32>
    %322 = tpu.reciprocal %321 {approx = true} : vector<2x1xf32> -> vector<2x1xf32>
    %323 = vector.broadcast %322 : vector<2x1xf32> to vector<2x20xf32>
    %324 = arith.mulf %319, %323 : vector<2x20xf32>
    %cst_268 = arith.constant dense<0.000000e+00> : vector<2x2xf32>
    %325 = tpu.matmul %324, %310, %cst_268 {dimension_numbers = #tpu.dot_dimension_numbers<[1], [0], [0], [1], [0, 0, 1, 1], [], []>} : vector<2x20xf32>, vector<20x2xf32>, vector<2x2xf32> -> vector<2x2xf32>
    %326 = tpu.concatenate %238, %267, %296, %325 in 1 : vector<2x2xf32>, vector<2x2xf32>, vector<2x2xf32>, vector<2x2xf32> -> vector<2x8xf32>
    %c2_269 = arith.constant 2 : index
    %c0_270 = arith.constant 0 : index
    %c0_271 = arith.constant 0 : index
    %327 = vector.load %arg12[%c2_269, %c0_270, %c0_271] : memref<5x8x8xf32, #tpu.memory_space<vmem>>, vector<1x8x8xf32>
    %328 = vector.shape_cast %327 : vector<1x8x8xf32> to vector<8x8xf32>
    %c2_272 = arith.constant 2 : index
    %c0_273 = arith.constant 0 : index
    %c0_274 = arith.constant 0 : index
    %329 = vector.load %arg13[%c2_272, %c0_273, %c0_274] : memref<5x1x8xf32, #tpu.memory_space<vmem>>, vector<1x1x8xf32>
    %330 = vector.shape_cast %329 : vector<1x1x8xf32> to vector<1x8xf32>
    %cst_275 = arith.constant dense<0.000000e+00> : vector<2x8xf32>
    %331 = tpu.matmul %326, %328, %cst_275 {dimension_numbers = #tpu.dot_dimension_numbers<[1], [0], [0], [1], [0, 0, 1, 1], [], []>} : vector<2x8xf32>, vector<8x8xf32>, vector<2x8xf32> -> vector<2x8xf32>
    %332 = vector.broadcast %330 : vector<1x8xf32> to vector<2x8xf32>
    %333 = arith.addf %331, %332 : vector<2x8xf32>
    %334 = arith.addf %201, %333 : vector<2x8xf32>
    %c1_276 = arith.constant 1 : index
    %c0_277 = arith.constant 0 : index
    %c0_278 = arith.constant 0 : index
    %335 = vector.load %arg14[%c1_276, %c0_277, %c0_278] : memref<3x8x16xf32, #tpu.memory_space<vmem>>, vector<1x8x16xf32>
    %336 = vector.shape_cast %335 : vector<1x8x16xf32> to vector<8x16xf32>
    %c1_279 = arith.constant 1 : index
    %c0_280 = arith.constant 0 : index
    %c0_281 = arith.constant 0 : index
    %337 = vector.load %arg15[%c1_279, %c0_280, %c0_281] : memref<3x1x16xf32, #tpu.memory_space<vmem>>, vector<1x1x16xf32>
    %338 = vector.shape_cast %337 : vector<1x1x16xf32> to vector<1x16xf32>
    %cst_282 = arith.constant dense<0.000000e+00> : vector<2x16xf32>
    %339 = tpu.matmul %334, %336, %cst_282 {dimension_numbers = #tpu.dot_dimension_numbers<[1], [0], [0], [1], [0, 0, 1, 1], [], []>} : vector<2x8xf32>, vector<8x16xf32>, vector<2x16xf32> -> vector<2x16xf32>
    %340 = vector.broadcast %338 : vector<1x16xf32> to vector<2x16xf32>
    %341 = arith.addf %339, %340 : vector<2x16xf32>
    %c1_283 = arith.constant 1 : index
    %c0_284 = arith.constant 0 : index
    %c0_285 = arith.constant 0 : index
    %342 = vector.load %arg16[%c1_283, %c0_284, %c0_285] : memref<3x16x8xf32, #tpu.memory_space<vmem>>, vector<1x16x8xf32>
    %343 = vector.shape_cast %342 : vector<1x16x8xf32> to vector<16x8xf32>
    %c1_286 = arith.constant 1 : index
    %c0_287 = arith.constant 0 : index
    %c0_288 = arith.constant 0 : index
    %344 = vector.load %arg17[%c1_286, %c0_287, %c0_288] : memref<3x1x8xf32, #tpu.memory_space<vmem>>, vector<1x1x8xf32>
    %345 = vector.shape_cast %344 : vector<1x1x8xf32> to vector<1x8xf32>
    %cst_289 = arith.constant dense<0.000000e+00> : vector<2x8xf32>
    %346 = tpu.matmul %341, %343, %cst_289 {dimension_numbers = #tpu.dot_dimension_numbers<[1], [0], [0], [1], [0, 0, 1, 1], [], []>} : vector<2x16xf32>, vector<16x8xf32>, vector<2x8xf32> -> vector<2x8xf32>
    %347 = vector.broadcast %345 : vector<1x8xf32> to vector<2x8xf32>
    %348 = arith.addf %346, %347 : vector<2x8xf32>
    %349 = arith.addf %334, %348 : vector<2x8xf32>
    %c0_290 = arith.constant 0 : index
    %c0_291 = arith.constant 0 : index
    %350 = vector.load %arg18[%c0_290, %c0_291] : memref<8x4xf32, #tpu.memory_space<vmem>>, vector<8x4xf32>
    %c0_292 = arith.constant 0 : index
    %c0_293 = arith.constant 0 : index
    %351 = vector.load %arg19[%c0_292, %c0_293] : memref<1x4xf32, #tpu.memory_space<vmem>>, vector<1x4xf32>
    %cst_294 = arith.constant dense<0.000000e+00> : vector<2x4xf32>
    %352 = tpu.matmul %349, %350, %cst_294 {dimension_numbers = #tpu.dot_dimension_numbers<[1], [0], [0], [1], [0, 0, 1, 1], [], []>} : vector<2x8xf32>, vector<8x4xf32>, vector<2x4xf32> -> vector<2x4xf32>
    %353 = vector.broadcast %351 : vector<1x4xf32> to vector<2x4xf32>
    %354 = arith.addf %352, %353 : vector<2x4xf32>
    %cst_295 = arith.constant 0.000000e+00 : f32
    %355 = vector.broadcast %cst_295 : f32 to vector<2x4xf32>
    %356 = arith.subf %355, %354 : vector<2x4xf32>
    %357 = math.exp %356 : vector<2x4xf32>
    %cst_296 = arith.constant 1.000000e+00 : f32
    %358 = vector.broadcast %cst_296 : f32 to vector<2x4xf32>
    %359 = arith.addf %358, %357 : vector<2x4xf32>
    %cst_297 = arith.constant 1.000000e+00 : f32
    %360 = vector.broadcast %cst_297 : f32 to vector<2x4xf32>
    %361 = arith.divf %360, %359 : vector<2x4xf32>
    %c0_298 = arith.constant 0 : index
    %c0_299 = arith.constant 0 : index
    %362 = vector.load %arg20[%c0_298, %c0_299] : memref<2x4xf32, #tpu.memory_space<vmem>>, vector<2x4xf32>
    tpu.vector_store %arg20[%c0_298, %c0_299], %361 {strides = array<i32>} : memref<2x4xf32, #tpu.memory_space<vmem>>, vector<2x4xf32>,
    %363 = tpu.iota {dimensions = array<i32: 1>} : vector<20x2xi32>
    %364 = vector.broadcast %3 : vector<20x1xi32> to vector<20x2xi32>
    %365 = arith.cmpi eq, %364, %363 : vector<20x2xi32>
    %366 = arith.extui %365 : vector<20x2xi1> to vector<20x2xi32>
    %367 = arith.sitofp %366 : vector<20x2xi32> to vector<20x2xf32>
    %cst_300 = arith.constant dense<0.000000e+00> : vector<20x4xf32>
    %368 = tpu.matmul %367, %361, %cst_300 {dimension_numbers = #tpu.dot_dimension_numbers<[1], [0], [0], [1], [0, 0, 1, 1], [], []>} : vector<20x2xf32>, vector<2x4xf32>, vector<20x4xf32> -> vector<20x4xf32>
    %369 = arith.subf %368, %0 : vector<20x4xf32>
    %370 = arith.mulf %369, %369 : vector<20x4xf32>
    %cst_301 = arith.constant 2.000000e+00 : f32
    %371 = vector.broadcast %cst_301 : f32 to vector<20x4xf32>
    %372 = arith.mulf %370, %371 : vector<20x4xf32>
    %373 = tpu.concatenate %12, %372 in 1 : vector<20x4xf32>, vector<20x4xf32> -> vector<20x8xf32>
    %374 = arith.addf %373, %2 : vector<20x8xf32>
    %c0_302 = arith.constant 0 : index
    %c0_303 = arith.constant 0 : index
    %c0_304 = arith.constant 0 : index
    %375 = vector.load %arg8[%c0_302, %c0_303, %c0_304] : memref<5x8x8xf32, #tpu.memory_space<vmem>>, vector<1x8x8xf32>
    %376 = vector.shape_cast %375 : vector<1x8x8xf32> to vector<8x8xf32>
    %c0_305 = arith.constant 0 : index
    %c0_306 = arith.constant 0 : index
    %c0_307 = arith.constant 0 : index
    %377 = vector.load %arg9[%c0_305, %c0_306, %c0_307] : memref<5x1x8xf32, #tpu.memory_space<vmem>>, vector<1x1x8xf32>
    %378 = vector.shape_cast %377 : vector<1x1x8xf32> to vector<1x8xf32>
    %cst_308 = arith.constant dense<0.000000e+00> : vector<20x8xf32>
    %379 = tpu.matmul %374, %376, %cst_308 {dimension_numbers = #tpu.dot_dimension_numbers<[1], [0], [0], [1], [0, 0, 1, 1], [], []>} : vector<20x8xf32>, vector<8x8xf32>, vector<20x8xf32> -> vector<20x8xf32>
    %380 = vector.broadcast %378 : vector<1x8xf32> to vector<20x8xf32>
    %381 = arith.addf %379, %380 : vector<20x8xf32>
    %382 = tpu.transpose %381, [1, 0] : vector<20x8xf32> -> vector<8x20xf32>
    %c0_309 = arith.constant 0 : index
    %c0_310 = arith.constant 0 : index
    %c0_311 = arith.constant 0 : index
    %c0_312 = arith.constant 0 : index
    %383 = vector.load %arg6[%c0_309, %c0_310, %c0_311, %c0_312] : memref<5x4x8x2xf32, #tpu.memory_space<vmem>>, vector<1x1x8x2xf32>
    %384 = vector.shape_cast %383 : vector<1x1x8x2xf32> to vector<8x2xf32>
    %c0_313 = arith.constant 0 : index
    %c0_314 = arith.constant 0 : index
    %c0_315 = arith.constant 0 : index
    %c0_316 = arith.constant 0 : index
    %385 = vector.load %arg7[%c0_313, %c0_314, %c0_315, %c0_316] : memref<5x4x1x2xf32, #tpu.memory_space<vmem>>, vector<1x1x1x2xf32>
    %386 = vector.shape_cast %385 : vector<1x1x1x2xf32> to vector<1x2xf32>
    %cst_317 = arith.constant dense<0.000000e+00> : vector<20x2xf32>
    %387 = tpu.matmul %374, %384, %cst_317 {dimension_numbers = #tpu.dot_dimension_numbers<[1], [0], [0], [1], [0, 0, 1, 1], [], []>} : vector<20x8xf32>, vector<8x2xf32>, vector<20x2xf32> -> vector<20x2xf32>
    %388 = vector.broadcast %386 : vector<1x2xf32> to vector<20x2xf32>
    %389 = arith.addf %387, %388 : vector<20x2xf32>
    %c0_318 = arith.constant 0 : index
    %c0_319 = arith.constant 0 : index
    %c0_320 = arith.constant 0 : index
    %c0_321 = arith.constant 0 : index
    %390 = vector.load %arg10[%c0_318, %c0_319, %c0_320, %c0_321] : memref<5x4x8x2xf32, #tpu.memory_space<vmem>>, vector<1x1x8x2xf32>
    %391 = vector.shape_cast %390 : vector<1x1x8x2xf32> to vector<8x2xf32>
    %c0_322 = arith.constant 0 : index
    %c0_323 = arith.constant 0 : index
    %c0_324 = arith.constant 0 : index
    %c0_325 = arith.constant 0 : index
    %392 = vector.load %arg11[%c0_322, %c0_323, %c0_324, %c0_325] : memref<5x4x1x2xf32, #tpu.memory_space<vmem>>, vector<1x1x1x2xf32>
    %393 = vector.shape_cast %392 : vector<1x1x1x2xf32> to vector<1x2xf32>
    %cst_326 = arith.constant dense<0.000000e+00> : vector<20x2xf32>
    %394 = tpu.matmul %374, %391, %cst_326 {dimension_numbers = #tpu.dot_dimension_numbers<[1], [0], [0], [1], [0, 0, 1, 1], [], []>} : vector<20x8xf32>, vector<8x2xf32>, vector<20x2xf32> -> vector<20x2xf32>
    %395 = vector.broadcast %393 : vector<1x2xf32> to vector<20x2xf32>
    %396 = arith.addf %394, %395 : vector<20x2xf32>
    %397 = vector.extract_strided_slice %382 {offsets = [0, 0], sizes = [2, 20], strides = [1, 1]} : vector<8x20xf32> to vector<2x20xf32>
    %cst_327 = arith.constant dense<0.000000e+00> : vector<20x20xf32>
    %398 = tpu.matmul %389, %397, %cst_327 {dimension_numbers = #tpu.dot_dimension_numbers<[1], [0], [0], [1], [0, 0, 1, 1], [], []>} : vector<20x2xf32>, vector<2x20xf32>, vector<20x20xf32> -> vector<20x20xf32>
    %cst_328 = arith.constant -1.000000e+30 : f32
    %399 = vector.broadcast %cst_328 : f32 to vector<20x20xf32>
    %400 = arith.select %7, %398, %399 : vector<20x20xi1>, vector<20x20xf32>
    %cst_329 = arith.constant dense<0xFF800000> : vector<20xf32>
    %401 = vector.multi_reduction <maximumf>, %400, %cst_329 [1] : vector<20x20xf32> to vector<20xf32>
    %402 = vector.shape_cast %401 : vector<20xf32> to vector<20x1xf32>
    %403 = vector.broadcast %402 : vector<20x1xf32> to vector<20x20xf32>
    %404 = arith.subf %400, %403 : vector<20x20xf32>
    %405 = math.exp %404 : vector<20x20xf32>
    %cst_330 = arith.constant dense<0.000000e+00> : vector<20xf32>
    %406 = vector.multi_reduction <add>, %405, %cst_330 [1] : vector<20x20xf32> to vector<20xf32>
    %407 = vector.shape_cast %406 : vector<20xf32> to vector<20x1xf32>
    %408 = tpu.reciprocal %407 {approx = true} : vector<20x1xf32> -> vector<20x1xf32>
    %409 = vector.broadcast %408 : vector<20x1xf32> to vector<20x20xf32>
    %410 = arith.mulf %405, %409 : vector<20x20xf32>
    %cst_331 = arith.constant dense<0.000000e+00> : vector<20x2xf32>
    %411 = tpu.matmul %410, %396, %cst_331 {dimension_numbers = #tpu.dot_dimension_numbers<[1], [0], [0], [1], [0, 0, 1, 1], [], []>} : vector<20x20xf32>, vector<20x2xf32>, vector<20x2xf32> -> vector<20x2xf32>
    %c0_332 = arith.constant 0 : index
    %c1_333 = arith.constant 1 : index
    %c0_334 = arith.constant 0 : index
    %c0_335 = arith.constant 0 : index
    %412 = vector.load %arg6[%c0_332, %c1_333, %c0_334, %c0_335] : memref<5x4x8x2xf32, #tpu.memory_space<vmem>>, vector<1x1x8x2xf32>
    %413 = vector.shape_cast %412 : vector<1x1x8x2xf32> to vector<8x2xf32>
    %c0_336 = arith.constant 0 : index
    %c1_337 = arith.constant 1 : index
    %c0_338 = arith.constant 0 : index
    %c0_339 = arith.constant 0 : index
    %414 = vector.load %arg7[%c0_336, %c1_337, %c0_338, %c0_339] : memref<5x4x1x2xf32, #tpu.memory_space<vmem>>, vector<1x1x1x2xf32>
    %415 = vector.shape_cast %414 : vector<1x1x1x2xf32> to vector<1x2xf32>
    %cst_340 = arith.constant dense<0.000000e+00> : vector<20x2xf32>
    %416 = tpu.matmul %374, %413, %cst_340 {dimension_numbers = #tpu.dot_dimension_numbers<[1], [0], [0], [1], [0, 0, 1, 1], [], []>} : vector<20x8xf32>, vector<8x2xf32>, vector<20x2xf32> -> vector<20x2xf32>
    %417 = vector.broadcast %415 : vector<1x2xf32> to vector<20x2xf32>
    %418 = arith.addf %416, %417 : vector<20x2xf32>
    %c0_341 = arith.constant 0 : index
    %c1_342 = arith.constant 1 : index
    %c0_343 = arith.constant 0 : index
    %c0_344 = arith.constant 0 : index
    %419 = vector.load %arg10[%c0_341, %c1_342, %c0_343, %c0_344] : memref<5x4x8x2xf32, #tpu.memory_space<vmem>>, vector<1x1x8x2xf32>
    %420 = vector.shape_cast %419 : vector<1x1x8x2xf32> to vector<8x2xf32>
    %c0_345 = arith.constant 0 : index
    %c1_346 = arith.constant 1 : index
    %c0_347 = arith.constant 0 : index
    %c0_348 = arith.constant 0 : index
    %421 = vector.load %arg11[%c0_345, %c1_346, %c0_347, %c0_348] : memref<5x4x1x2xf32, #tpu.memory_space<vmem>>, vector<1x1x1x2xf32>
    %422 = vector.shape_cast %421 : vector<1x1x1x2xf32> to vector<1x2xf32>
    %cst_349 = arith.constant dense<0.000000e+00> : vector<20x2xf32>
    %423 = tpu.matmul %374, %420, %cst_349 {dimension_numbers = #tpu.dot_dimension_numbers<[1], [0], [0], [1], [0, 0, 1, 1], [], []>} : vector<20x8xf32>, vector<8x2xf32>, vector<20x2xf32> -> vector<20x2xf32>
    %424 = vector.broadcast %422 : vector<1x2xf32> to vector<20x2xf32>
    %425 = arith.addf %423, %424 : vector<20x2xf32>
    %426 = vector.extract_strided_slice %382 {offsets = [2, 0], sizes = [2, 20], strides = [1, 1]} : vector<8x20xf32> to vector<2x20xf32>
    %cst_350 = arith.constant dense<0.000000e+00> : vector<20x20xf32>
    %427 = tpu.matmul %418, %426, %cst_350 {dimension_numbers = #tpu.dot_dimension_numbers<[1], [0], [0], [1], [0, 0, 1, 1], [], []>} : vector<20x2xf32>, vector<2x20xf32>, vector<20x20xf32> -> vector<20x20xf32>
    %cst_351 = arith.constant -1.000000e+30 : f32
    %428 = vector.broadcast %cst_351 : f32 to vector<20x20xf32>
    %429 = arith.select %7, %427, %428 : vector<20x20xi1>, vector<20x20xf32>
    %cst_352 = arith.constant dense<0xFF800000> : vector<20xf32>
    %430 = vector.multi_reduction <maximumf>, %429, %cst_352 [1] : vector<20x20xf32> to vector<20xf32>
    %431 = vector.shape_cast %430 : vector<20xf32> to vector<20x1xf32>
    %432 = vector.broadcast %431 : vector<20x1xf32> to vector<20x20xf32>
    %433 = arith.subf %429, %432 : vector<20x20xf32>
    %434 = math.exp %433 : vector<20x20xf32>
    %cst_353 = arith.constant dense<0.000000e+00> : vector<20xf32>
    %435 = vector.multi_reduction <add>, %434, %cst_353 [1] : vector<20x20xf32> to vector<20xf32>
    %436 = vector.shape_cast %435 : vector<20xf32> to vector<20x1xf32>
    %437 = tpu.reciprocal %436 {approx = true} : vector<20x1xf32> -> vector<20x1xf32>
    %438 = vector.broadcast %437 : vector<20x1xf32> to vector<20x20xf32>
    %439 = arith.mulf %434, %438 : vector<20x20xf32>
    %cst_354 = arith.constant dense<0.000000e+00> : vector<20x2xf32>
    %440 = tpu.matmul %439, %425, %cst_354 {dimension_numbers = #tpu.dot_dimension_numbers<[1], [0], [0], [1], [0, 0, 1, 1], [], []>} : vector<20x20xf32>, vector<20x2xf32>, vector<20x2xf32> -> vector<20x2xf32>
    %c0_355 = arith.constant 0 : index
    %c2_356 = arith.constant 2 : index
    %c0_357 = arith.constant 0 : index
    %c0_358 = arith.constant 0 : index
    %441 = vector.load %arg6[%c0_355, %c2_356, %c0_357, %c0_358] : memref<5x4x8x2xf32, #tpu.memory_space<vmem>>, vector<1x1x8x2xf32>
    %442 = vector.shape_cast %441 : vector<1x1x8x2xf32> to vector<8x2xf32>
    %c0_359 = arith.constant 0 : index
    %c2_360 = arith.constant 2 : index
    %c0_361 = arith.constant 0 : index
    %c0_362 = arith.constant 0 : index
    %443 = vector.load %arg7[%c0_359, %c2_360, %c0_361, %c0_362] : memref<5x4x1x2xf32, #tpu.memory_space<vmem>>, vector<1x1x1x2xf32>
    %444 = vector.shape_cast %443 : vector<1x1x1x2xf32> to vector<1x2xf32>
    %cst_363 = arith.constant dense<0.000000e+00> : vector<20x2xf32>
    %445 = tpu.matmul %374, %442, %cst_363 {dimension_numbers = #tpu.dot_dimension_numbers<[1], [0], [0], [1], [0, 0, 1, 1], [], []>} : vector<20x8xf32>, vector<8x2xf32>, vector<20x2xf32> -> vector<20x2xf32>
    %446 = vector.broadcast %444 : vector<1x2xf32> to vector<20x2xf32>
    %447 = arith.addf %445, %446 : vector<20x2xf32>
    %c0_364 = arith.constant 0 : index
    %c2_365 = arith.constant 2 : index
    %c0_366 = arith.constant 0 : index
    %c0_367 = arith.constant 0 : index
    %448 = vector.load %arg10[%c0_364, %c2_365, %c0_366, %c0_367] : memref<5x4x8x2xf32, #tpu.memory_space<vmem>>, vector<1x1x8x2xf32>
    %449 = vector.shape_cast %448 : vector<1x1x8x2xf32> to vector<8x2xf32>
    %c0_368 = arith.constant 0 : index
    %c2_369 = arith.constant 2 : index
    %c0_370 = arith.constant 0 : index
    %c0_371 = arith.constant 0 : index
    %450 = vector.load %arg11[%c0_368, %c2_369, %c0_370, %c0_371] : memref<5x4x1x2xf32, #tpu.memory_space<vmem>>, vector<1x1x1x2xf32>
    %451 = vector.shape_cast %450 : vector<1x1x1x2xf32> to vector<1x2xf32>
    %cst_372 = arith.constant dense<0.000000e+00> : vector<20x2xf32>
    %452 = tpu.matmul %374, %449, %cst_372 {dimension_numbers = #tpu.dot_dimension_numbers<[1], [0], [0], [1], [0, 0, 1, 1], [], []>} : vector<20x8xf32>, vector<8x2xf32>, vector<20x2xf32> -> vector<20x2xf32>
    %453 = vector.broadcast %451 : vector<1x2xf32> to vector<20x2xf32>
    %454 = arith.addf %452, %453 : vector<20x2xf32>
    %455 = vector.extract_strided_slice %382 {offsets = [4, 0], sizes = [2, 20], strides = [1, 1]} : vector<8x20xf32> to vector<2x20xf32>
    %cst_373 = arith.constant dense<0.000000e+00> : vector<20x20xf32>
    %456 = tpu.matmul %447, %455, %cst_373 {dimension_numbers = #tpu.dot_dimension_numbers<[1], [0], [0], [1], [0, 0, 1, 1], [], []>} : vector<20x2xf32>, vector<2x20xf32>, vector<20x20xf32> -> vector<20x20xf32>
    %cst_374 = arith.constant -1.000000e+30 : f32
    %457 = vector.broadcast %cst_374 : f32 to vector<20x20xf32>
    %458 = arith.select %7, %456, %457 : vector<20x20xi1>, vector<20x20xf32>
    %cst_375 = arith.constant dense<0xFF800000> : vector<20xf32>
    %459 = vector.multi_reduction <maximumf>, %458, %cst_375 [1] : vector<20x20xf32> to vector<20xf32>
    %460 = vector.shape_cast %459 : vector<20xf32> to vector<20x1xf32>
    %461 = vector.broadcast %460 : vector<20x1xf32> to vector<20x20xf32>
    %462 = arith.subf %458, %461 : vector<20x20xf32>
    %463 = math.exp %462 : vector<20x20xf32>
    %cst_376 = arith.constant dense<0.000000e+00> : vector<20xf32>
    %464 = vector.multi_reduction <add>, %463, %cst_376 [1] : vector<20x20xf32> to vector<20xf32>
    %465 = vector.shape_cast %464 : vector<20xf32> to vector<20x1xf32>
    %466 = tpu.reciprocal %465 {approx = true} : vector<20x1xf32> -> vector<20x1xf32>
    %467 = vector.broadcast %466 : vector<20x1xf32> to vector<20x20xf32>
    %468 = arith.mulf %463, %467 : vector<20x20xf32>
    %cst_377 = arith.constant dense<0.000000e+00> : vector<20x2xf32>
    %469 = tpu.matmul %468, %454, %cst_377 {dimension_numbers = #tpu.dot_dimension_numbers<[1], [0], [0], [1], [0, 0, 1, 1], [], []>} : vector<20x20xf32>, vector<20x2xf32>, vector<20x2xf32> -> vector<20x2xf32>
    %c0_378 = arith.constant 0 : index
    %c3_379 = arith.constant 3 : index
    %c0_380 = arith.constant 0 : index
    %c0_381 = arith.constant 0 : index
    %470 = vector.load %arg6[%c0_378, %c3_379, %c0_380, %c0_381] : memref<5x4x8x2xf32, #tpu.memory_space<vmem>>, vector<1x1x8x2xf32>
    %471 = vector.shape_cast %470 : vector<1x1x8x2xf32> to vector<8x2xf32>
    %c0_382 = arith.constant 0 : index
    %c3_383 = arith.constant 3 : index
    %c0_384 = arith.constant 0 : index
    %c0_385 = arith.constant 0 : index
    %472 = vector.load %arg7[%c0_382, %c3_383, %c0_384, %c0_385] : memref<5x4x1x2xf32, #tpu.memory_space<vmem>>, vector<1x1x1x2xf32>
    %473 = vector.shape_cast %472 : vector<1x1x1x2xf32> to vector<1x2xf32>
    %cst_386 = arith.constant dense<0.000000e+00> : vector<20x2xf32>
    %474 = tpu.matmul %374, %471, %cst_386 {dimension_numbers = #tpu.dot_dimension_numbers<[1], [0], [0], [1], [0, 0, 1, 1], [], []>} : vector<20x8xf32>, vector<8x2xf32>, vector<20x2xf32> -> vector<20x2xf32>
    %475 = vector.broadcast %473 : vector<1x2xf32> to vector<20x2xf32>
    %476 = arith.addf %474, %475 : vector<20x2xf32>
    %c0_387 = arith.constant 0 : index
    %c3_388 = arith.constant 3 : index
    %c0_389 = arith.constant 0 : index
    %c0_390 = arith.constant 0 : index
    %477 = vector.load %arg10[%c0_387, %c3_388, %c0_389, %c0_390] : memref<5x4x8x2xf32, #tpu.memory_space<vmem>>, vector<1x1x8x2xf32>
    %478 = vector.shape_cast %477 : vector<1x1x8x2xf32> to vector<8x2xf32>
    %c0_391 = arith.constant 0 : index
    %c3_392 = arith.constant 3 : index
    %c0_393 = arith.constant 0 : index
    %c0_394 = arith.constant 0 : index
    %479 = vector.load %arg11[%c0_391, %c3_392, %c0_393, %c0_394] : memref<5x4x1x2xf32, #tpu.memory_space<vmem>>, vector<1x1x1x2xf32>
    %480 = vector.shape_cast %479 : vector<1x1x1x2xf32> to vector<1x2xf32>
    %cst_395 = arith.constant dense<0.000000e+00> : vector<20x2xf32>
    %481 = tpu.matmul %374, %478, %cst_395 {dimension_numbers = #tpu.dot_dimension_numbers<[1], [0], [0], [1], [0, 0, 1, 1], [], []>} : vector<20x8xf32>, vector<8x2xf32>, vector<20x2xf32> -> vector<20x2xf32>
    %482 = vector.broadcast %480 : vector<1x2xf32> to vector<20x2xf32>
    %483 = arith.addf %481, %482 : vector<20x2xf32>
    %484 = vector.extract_strided_slice %382 {offsets = [6, 0], sizes = [2, 20], strides = [1, 1]} : vector<8x20xf32> to vector<2x20xf32>
    %cst_396 = arith.constant dense<0.000000e+00> : vector<20x20xf32>
    %485 = tpu.matmul %476, %484, %cst_396 {dimension_numbers = #tpu.dot_dimension_numbers<[1], [0], [0], [1], [0, 0, 1, 1], [], []>} : vector<20x2xf32>, vector<2x20xf32>, vector<20x20xf32> -> vector<20x20xf32>
    %cst_397 = arith.constant -1.000000e+30 : f32
    %486 = vector.broadcast %cst_397 : f32 to vector<20x20xf32>
    %487 = arith.select %7, %485, %486 : vector<20x20xi1>, vector<20x20xf32>
    %cst_398 = arith.constant dense<0xFF800000> : vector<20xf32>
    %488 = vector.multi_reduction <maximumf>, %487, %cst_398 [1] : vector<20x20xf32> to vector<20xf32>
    %489 = vector.shape_cast %488 : vector<20xf32> to vector<20x1xf32>
    %490 = vector.broadcast %489 : vector<20x1xf32> to vector<20x20xf32>
    %491 = arith.subf %487, %490 : vector<20x20xf32>
    %492 = math.exp %491 : vector<20x20xf32>
    %cst_399 = arith.constant dense<0.000000e+00> : vector<20xf32>
    %493 = vector.multi_reduction <add>, %492, %cst_399 [1] : vector<20x20xf32> to vector<20xf32>
    %494 = vector.shape_cast %493 : vector<20xf32> to vector<20x1xf32>
    %495 = tpu.reciprocal %494 {approx = true} : vector<20x1xf32> -> vector<20x1xf32>
    %496 = vector.broadcast %495 : vector<20x1xf32> to vector<20x20xf32>
    %497 = arith.mulf %492, %496 : vector<20x20xf32>
    %cst_400 = arith.constant dense<0.000000e+00> : vector<20x2xf32>
    %498 = tpu.matmul %497, %483, %cst_400 {dimension_numbers = #tpu.dot_dimension_numbers<[1], [0], [0], [1], [0, 0, 1, 1], [], []>} : vector<20x20xf32>, vector<20x2xf32>, vector<20x2xf32> -> vector<20x2xf32>
    %499 = tpu.concatenate %411, %440, %469, %498 in 1 : vector<20x2xf32>, vector<20x2xf32>, vector<20x2xf32>, vector<20x2xf32> -> vector<20x8xf32>
    %c0_401 = arith.constant 0 : index
    %c0_402 = arith.constant 0 : index
    %c0_403 = arith.constant 0 : index
    %500 = vector.load %arg12[%c0_401, %c0_402, %c0_403] : memref<5x8x8xf32, #tpu.memory_space<vmem>>, vector<1x8x8xf32>
    %501 = vector.shape_cast %500 : vector<1x8x8xf32> to vector<8x8xf32>
    %c0_404 = arith.constant 0 : index
    %c0_405 = arith.constant 0 : index
    %c0_406 = arith.constant 0 : index
    %502 = vector.load %arg13[%c0_404, %c0_405, %c0_406] : memref<5x1x8xf32, #tpu.memory_space<vmem>>, vector<1x1x8xf32>
    %503 = vector.shape_cast %502 : vector<1x1x8xf32> to vector<1x8xf32>
    %cst_407 = arith.constant dense<0.000000e+00> : vector<20x8xf32>
    %504 = tpu.matmul %499, %501, %cst_407 {dimension_numbers = #tpu.dot_dimension_numbers<[1], [0], [0], [1], [0, 0, 1, 1], [], []>} : vector<20x8xf32>, vector<8x8xf32>, vector<20x8xf32> -> vector<20x8xf32>
    %505 = vector.broadcast %503 : vector<1x8xf32> to vector<20x8xf32>
    %506 = arith.addf %504, %505 : vector<20x8xf32>
    %507 = arith.addf %374, %506 : vector<20x8xf32>
    %c0_408 = arith.constant 0 : index
    %c0_409 = arith.constant 0 : index
    %c0_410 = arith.constant 0 : index
    %508 = vector.load %arg14[%c0_408, %c0_409, %c0_410] : memref<3x8x16xf32, #tpu.memory_space<vmem>>, vector<1x8x16xf32>
    %509 = vector.shape_cast %508 : vector<1x8x16xf32> to vector<8x16xf32>
    %c0_411 = arith.constant 0 : index
    %c0_412 = arith.constant 0 : index
    %c0_413 = arith.constant 0 : index
    %510 = vector.load %arg15[%c0_411, %c0_412, %c0_413] : memref<3x1x16xf32, #tpu.memory_space<vmem>>, vector<1x1x16xf32>
    %511 = vector.shape_cast %510 : vector<1x1x16xf32> to vector<1x16xf32>
    %cst_414 = arith.constant dense<0.000000e+00> : vector<20x16xf32>
    %512 = tpu.matmul %507, %509, %cst_414 {dimension_numbers = #tpu.dot_dimension_numbers<[1], [0], [0], [1], [0, 0, 1, 1], [], []>} : vector<20x8xf32>, vector<8x16xf32>, vector<20x16xf32> -> vector<20x16xf32>
    %513 = vector.broadcast %511 : vector<1x16xf32> to vector<20x16xf32>
    %514 = arith.addf %512, %513 : vector<20x16xf32>
    %c0_415 = arith.constant 0 : index
    %c0_416 = arith.constant 0 : index
    %c0_417 = arith.constant 0 : index
    %515 = vector.load %arg16[%c0_415, %c0_416, %c0_417] : memref<3x16x8xf32, #tpu.memory_space<vmem>>, vector<1x16x8xf32>
    %516 = vector.shape_cast %515 : vector<1x16x8xf32> to vector<16x8xf32>
    %c0_418 = arith.constant 0 : index
    %c0_419 = arith.constant 0 : index
    %c0_420 = arith.constant 0 : index
    %517 = vector.load %arg17[%c0_418, %c0_419, %c0_420] : memref<3x1x8xf32, #tpu.memory_space<vmem>>, vector<1x1x8xf32>
    %518 = vector.shape_cast %517 : vector<1x1x8xf32> to vector<1x8xf32>
    %cst_421 = arith.constant dense<0.000000e+00> : vector<20x8xf32>
    %519 = tpu.matmul %514, %516, %cst_421 {dimension_numbers = #tpu.dot_dimension_numbers<[1], [0], [0], [1], [0, 0, 1, 1], [], []>} : vector<20x16xf32>, vector<16x8xf32>, vector<20x8xf32> -> vector<20x8xf32>
    %520 = vector.broadcast %518 : vector<1x8xf32> to vector<20x8xf32>
    %521 = arith.addf %519, %520 : vector<20x8xf32>
    %522 = arith.addf %507, %521 : vector<20x8xf32>
    %c3_422 = arith.constant 3 : index
    %c0_423 = arith.constant 0 : index
    %c0_424 = arith.constant 0 : index
    %c0_425 = arith.constant 0 : index
    %523 = vector.load %arg10[%c3_422, %c0_423, %c0_424, %c0_425] : memref<5x4x8x2xf32, #tpu.memory_space<vmem>>, vector<1x1x8x2xf32>
    %524 = vector.shape_cast %523 : vector<1x1x8x2xf32> to vector<8x2xf32>
    %c3_426 = arith.constant 3 : index
    %c0_427 = arith.constant 0 : index
    %c0_428 = arith.constant 0 : index
    %c0_429 = arith.constant 0 : index
    %525 = vector.load %arg11[%c3_426, %c0_427, %c0_428, %c0_429] : memref<5x4x1x2xf32, #tpu.memory_space<vmem>>, vector<1x1x1x2xf32>
    %526 = vector.shape_cast %525 : vector<1x1x1x2xf32> to vector<1x2xf32>
    %cst_430 = arith.constant dense<0.000000e+00> : vector<2x2xf32>
    %527 = tpu.matmul %13, %524, %cst_430 {dimension_numbers = #tpu.dot_dimension_numbers<[1], [0], [0], [1], [0, 0, 1, 1], [], []>} : vector<2x8xf32>, vector<8x2xf32>, vector<2x2xf32> -> vector<2x2xf32>
    %528 = vector.broadcast %526 : vector<1x2xf32> to vector<2x2xf32>
    %529 = arith.addf %527, %528 : vector<2x2xf32>
    %c3_431 = arith.constant 3 : index
    %c1_432 = arith.constant 1 : index
    %c0_433 = arith.constant 0 : index
    %c0_434 = arith.constant 0 : index
    %530 = vector.load %arg10[%c3_431, %c1_432, %c0_433, %c0_434] : memref<5x4x8x2xf32, #tpu.memory_space<vmem>>, vector<1x1x8x2xf32>
    %531 = vector.shape_cast %530 : vector<1x1x8x2xf32> to vector<8x2xf32>
    %c3_435 = arith.constant 3 : index
    %c1_436 = arith.constant 1 : index
    %c0_437 = arith.constant 0 : index
    %c0_438 = arith.constant 0 : index
    %532 = vector.load %arg11[%c3_435, %c1_436, %c0_437, %c0_438] : memref<5x4x1x2xf32, #tpu.memory_space<vmem>>, vector<1x1x1x2xf32>
    %533 = vector.shape_cast %532 : vector<1x1x1x2xf32> to vector<1x2xf32>
    %cst_439 = arith.constant dense<0.000000e+00> : vector<2x2xf32>
    %534 = tpu.matmul %13, %531, %cst_439 {dimension_numbers = #tpu.dot_dimension_numbers<[1], [0], [0], [1], [0, 0, 1, 1], [], []>} : vector<2x8xf32>, vector<8x2xf32>, vector<2x2xf32> -> vector<2x2xf32>
    %535 = vector.broadcast %533 : vector<1x2xf32> to vector<2x2xf32>
    %536 = arith.addf %534, %535 : vector<2x2xf32>
    %c3_440 = arith.constant 3 : index
    %c2_441 = arith.constant 2 : index
    %c0_442 = arith.constant 0 : index
    %c0_443 = arith.constant 0 : index
    %537 = vector.load %arg10[%c3_440, %c2_441, %c0_442, %c0_443] : memref<5x4x8x2xf32, #tpu.memory_space<vmem>>, vector<1x1x8x2xf32>
    %538 = vector.shape_cast %537 : vector<1x1x8x2xf32> to vector<8x2xf32>
    %c3_444 = arith.constant 3 : index
    %c2_445 = arith.constant 2 : index
    %c0_446 = arith.constant 0 : index
    %c0_447 = arith.constant 0 : index
    %539 = vector.load %arg11[%c3_444, %c2_445, %c0_446, %c0_447] : memref<5x4x1x2xf32, #tpu.memory_space<vmem>>, vector<1x1x1x2xf32>
    %540 = vector.shape_cast %539 : vector<1x1x1x2xf32> to vector<1x2xf32>
    %cst_448 = arith.constant dense<0.000000e+00> : vector<2x2xf32>
    %541 = tpu.matmul %13, %538, %cst_448 {dimension_numbers = #tpu.dot_dimension_numbers<[1], [0], [0], [1], [0, 0, 1, 1], [], []>} : vector<2x8xf32>, vector<8x2xf32>, vector<2x2xf32> -> vector<2x2xf32>
    %542 = vector.broadcast %540 : vector<1x2xf32> to vector<2x2xf32>
    %543 = arith.addf %541, %542 : vector<2x2xf32>
    %c3_449 = arith.constant 3 : index
    %c3_450 = arith.constant 3 : index
    %c0_451 = arith.constant 0 : index
    %c0_452 = arith.constant 0 : index
    %544 = vector.load %arg10[%c3_449, %c3_450, %c0_451, %c0_452] : memref<5x4x8x2xf32, #tpu.memory_space<vmem>>, vector<1x1x8x2xf32>
    %545 = vector.shape_cast %544 : vector<1x1x8x2xf32> to vector<8x2xf32>
    %c3_453 = arith.constant 3 : index
    %c3_454 = arith.constant 3 : index
    %c0_455 = arith.constant 0 : index
    %c0_456 = arith.constant 0 : index
    %546 = vector.load %arg11[%c3_453, %c3_454, %c0_455, %c0_456] : memref<5x4x1x2xf32, #tpu.memory_space<vmem>>, vector<1x1x1x2xf32>
    %547 = vector.shape_cast %546 : vector<1x1x1x2xf32> to vector<1x2xf32>
    %cst_457 = arith.constant dense<0.000000e+00> : vector<2x2xf32>
    %548 = tpu.matmul %13, %545, %cst_457 {dimension_numbers = #tpu.dot_dimension_numbers<[1], [0], [0], [1], [0, 0, 1, 1], [], []>} : vector<2x8xf32>, vector<8x2xf32>, vector<2x2xf32> -> vector<2x2xf32>
    %549 = vector.broadcast %547 : vector<1x2xf32> to vector<2x2xf32>
    %550 = arith.addf %548, %549 : vector<2x2xf32>
    %551 = tpu.concatenate %529, %536, %543, %550 in 1 : vector<2x2xf32>, vector<2x2xf32>, vector<2x2xf32>, vector<2x2xf32> -> vector<2x8xf32>
    %c3_458 = arith.constant 3 : index
    %c0_459 = arith.constant 0 : index
    %c0_460 = arith.constant 0 : index
    %552 = vector.load %arg12[%c3_458, %c0_459, %c0_460] : memref<5x8x8xf32, #tpu.memory_space<vmem>>, vector<1x8x8xf32>
    %553 = vector.shape_cast %552 : vector<1x8x8xf32> to vector<8x8xf32>
    %c3_461 = arith.constant 3 : index
    %c0_462 = arith.constant 0 : index
    %c0_463 = arith.constant 0 : index
    %554 = vector.load %arg13[%c3_461, %c0_462, %c0_463] : memref<5x1x8xf32, #tpu.memory_space<vmem>>, vector<1x1x8xf32>
    %555 = vector.shape_cast %554 : vector<1x1x8xf32> to vector<1x8xf32>
    %cst_464 = arith.constant dense<0.000000e+00> : vector<2x8xf32>
    %556 = tpu.matmul %551, %553, %cst_464 {dimension_numbers = #tpu.dot_dimension_numbers<[1], [0], [0], [1], [0, 0, 1, 1], [], []>} : vector<2x8xf32>, vector<8x8xf32>, vector<2x8xf32> -> vector<2x8xf32>
    %557 = vector.broadcast %555 : vector<1x8xf32> to vector<2x8xf32>
    %558 = arith.addf %556, %557 : vector<2x8xf32>
    %559 = arith.addf %13, %558 : vector<2x8xf32>
    %c4 = arith.constant 4 : index
    %c0_465 = arith.constant 0 : index
    %c0_466 = arith.constant 0 : index
    %560 = vector.load %arg8[%c4, %c0_465, %c0_466] : memref<5x8x8xf32, #tpu.memory_space<vmem>>, vector<1x8x8xf32>
    %561 = vector.shape_cast %560 : vector<1x8x8xf32> to vector<8x8xf32>
    %c4_467 = arith.constant 4 : index
    %c0_468 = arith.constant 0 : index
    %c0_469 = arith.constant 0 : index
    %562 = vector.load %arg9[%c4_467, %c0_468, %c0_469] : memref<5x1x8xf32, #tpu.memory_space<vmem>>, vector<1x1x8xf32>
    %563 = vector.shape_cast %562 : vector<1x1x8xf32> to vector<1x8xf32>
    %cst_470 = arith.constant dense<0.000000e+00> : vector<20x8xf32>
    %564 = tpu.matmul %522, %561, %cst_470 {dimension_numbers = #tpu.dot_dimension_numbers<[1], [0], [0], [1], [0, 0, 1, 1], [], []>} : vector<20x8xf32>, vector<8x8xf32>, vector<20x8xf32> -> vector<20x8xf32>
    %565 = vector.broadcast %563 : vector<1x8xf32> to vector<20x8xf32>
    %566 = arith.addf %564, %565 : vector<20x8xf32>
    %567 = tpu.transpose %566, [1, 0] : vector<20x8xf32> -> vector<8x20xf32>
    %c4_471 = arith.constant 4 : index
    %c0_472 = arith.constant 0 : index
    %c0_473 = arith.constant 0 : index
    %c0_474 = arith.constant 0 : index
    %568 = vector.load %arg6[%c4_471, %c0_472, %c0_473, %c0_474] : memref<5x4x8x2xf32, #tpu.memory_space<vmem>>, vector<1x1x8x2xf32>
    %569 = vector.shape_cast %568 : vector<1x1x8x2xf32> to vector<8x2xf32>
    %c4_475 = arith.constant 4 : index
    %c0_476 = arith.constant 0 : index
    %c0_477 = arith.constant 0 : index
    %c0_478 = arith.constant 0 : index
    %570 = vector.load %arg7[%c4_475, %c0_476, %c0_477, %c0_478] : memref<5x4x1x2xf32, #tpu.memory_space<vmem>>, vector<1x1x1x2xf32>
    %571 = vector.shape_cast %570 : vector<1x1x1x2xf32> to vector<1x2xf32>
    %cst_479 = arith.constant dense<0.000000e+00> : vector<2x2xf32>
    %572 = tpu.matmul %559, %569, %cst_479 {dimension_numbers = #tpu.dot_dimension_numbers<[1], [0], [0], [1], [0, 0, 1, 1], [], []>} : vector<2x8xf32>, vector<8x2xf32>, vector<2x2xf32> -> vector<2x2xf32>
    %573 = vector.broadcast %571 : vector<1x2xf32> to vector<2x2xf32>
    %574 = arith.addf %572, %573 : vector<2x2xf32>
    %c4_480 = arith.constant 4 : index
    %c0_481 = arith.constant 0 : index
    %c0_482 = arith.constant 0 : index
    %c0_483 = arith.constant 0 : index
    %575 = vector.load %arg10[%c4_480, %c0_481, %c0_482, %c0_483] : memref<5x4x8x2xf32, #tpu.memory_space<vmem>>, vector<1x1x8x2xf32>
    %576 = vector.shape_cast %575 : vector<1x1x8x2xf32> to vector<8x2xf32>
    %c4_484 = arith.constant 4 : index
    %c0_485 = arith.constant 0 : index
    %c0_486 = arith.constant 0 : index
    %c0_487 = arith.constant 0 : index
    %577 = vector.load %arg11[%c4_484, %c0_485, %c0_486, %c0_487] : memref<5x4x1x2xf32, #tpu.memory_space<vmem>>, vector<1x1x1x2xf32>
    %578 = vector.shape_cast %577 : vector<1x1x1x2xf32> to vector<1x2xf32>
    %cst_488 = arith.constant dense<0.000000e+00> : vector<20x2xf32>
    %579 = tpu.matmul %522, %576, %cst_488 {dimension_numbers = #tpu.dot_dimension_numbers<[1], [0], [0], [1], [0, 0, 1, 1], [], []>} : vector<20x8xf32>, vector<8x2xf32>, vector<20x2xf32> -> vector<20x2xf32>
    %580 = vector.broadcast %578 : vector<1x2xf32> to vector<20x2xf32>
    %581 = arith.addf %579, %580 : vector<20x2xf32>
    %582 = vector.extract_strided_slice %567 {offsets = [0, 0], sizes = [2, 20], strides = [1, 1]} : vector<8x20xf32> to vector<2x20xf32>
    %cst_489 = arith.constant dense<0.000000e+00> : vector<2x20xf32>
    %583 = tpu.matmul %574, %582, %cst_489 {dimension_numbers = #tpu.dot_dimension_numbers<[1], [0], [0], [1], [0, 0, 1, 1], [], []>} : vector<2x2xf32>, vector<2x20xf32>, vector<2x20xf32> -> vector<2x20xf32>
    %cst_490 = arith.constant -1.000000e+30 : f32
    %584 = vector.broadcast %cst_490 : f32 to vector<2x20xf32>
    %585 = arith.select %10, %583, %584 : vector<2x20xi1>, vector<2x20xf32>
    %cst_491 = arith.constant dense<0xFF800000> : vector<2xf32>
    %586 = vector.multi_reduction <maximumf>, %585, %cst_491 [1] : vector<2x20xf32> to vector<2xf32>
    %587 = vector.shape_cast %586 : vector<2xf32> to vector<2x1xf32>
    %588 = vector.broadcast %587 : vector<2x1xf32> to vector<2x20xf32>
    %589 = arith.subf %585, %588 : vector<2x20xf32>
    %590 = math.exp %589 : vector<2x20xf32>
    %cst_492 = arith.constant dense<0.000000e+00> : vector<2xf32>
    %591 = vector.multi_reduction <add>, %590, %cst_492 [1] : vector<2x20xf32> to vector<2xf32>
    %592 = vector.shape_cast %591 : vector<2xf32> to vector<2x1xf32>
    %593 = tpu.reciprocal %592 {approx = true} : vector<2x1xf32> -> vector<2x1xf32>
    %594 = vector.broadcast %593 : vector<2x1xf32> to vector<2x20xf32>
    %595 = arith.mulf %590, %594 : vector<2x20xf32>
    %cst_493 = arith.constant dense<0.000000e+00> : vector<2x2xf32>
    %596 = tpu.matmul %595, %581, %cst_493 {dimension_numbers = #tpu.dot_dimension_numbers<[1], [0], [0], [1], [0, 0, 1, 1], [], []>} : vector<2x20xf32>, vector<20x2xf32>, vector<2x2xf32> -> vector<2x2xf32>
    %c4_494 = arith.constant 4 : index
    %c1_495 = arith.constant 1 : index
    %c0_496 = arith.constant 0 : index
    %c0_497 = arith.constant 0 : index
    %597 = vector.load %arg6[%c4_494, %c1_495, %c0_496, %c0_497] : memref<5x4x8x2xf32, #tpu.memory_space<vmem>>, vector<1x1x8x2xf32>
    %598 = vector.shape_cast %597 : vector<1x1x8x2xf32> to vector<8x2xf32>
    %c4_498 = arith.constant 4 : index
    %c1_499 = arith.constant 1 : index
    %c0_500 = arith.constant 0 : index
    %c0_501 = arith.constant 0 : index
    %599 = vector.load %arg7[%c4_498, %c1_499, %c0_500, %c0_501] : memref<5x4x1x2xf32, #tpu.memory_space<vmem>>, vector<1x1x1x2xf32>
    %600 = vector.shape_cast %599 : vector<1x1x1x2xf32> to vector<1x2xf32>
    %cst_502 = arith.constant dense<0.000000e+00> : vector<2x2xf32>
    %601 = tpu.matmul %559, %598, %cst_502 {dimension_numbers = #tpu.dot_dimension_numbers<[1], [0], [0], [1], [0, 0, 1, 1], [], []>} : vector<2x8xf32>, vector<8x2xf32>, vector<2x2xf32> -> vector<2x2xf32>
    %602 = vector.broadcast %600 : vector<1x2xf32> to vector<2x2xf32>
    %603 = arith.addf %601, %602 : vector<2x2xf32>
    %c4_503 = arith.constant 4 : index
    %c1_504 = arith.constant 1 : index
    %c0_505 = arith.constant 0 : index
    %c0_506 = arith.constant 0 : index
    %604 = vector.load %arg10[%c4_503, %c1_504, %c0_505, %c0_506] : memref<5x4x8x2xf32, #tpu.memory_space<vmem>>, vector<1x1x8x2xf32>
    %605 = vector.shape_cast %604 : vector<1x1x8x2xf32> to vector<8x2xf32>
    %c4_507 = arith.constant 4 : index
    %c1_508 = arith.constant 1 : index
    %c0_509 = arith.constant 0 : index
    %c0_510 = arith.constant 0 : index
    %606 = vector.load %arg11[%c4_507, %c1_508, %c0_509, %c0_510] : memref<5x4x1x2xf32, #tpu.memory_space<vmem>>, vector<1x1x1x2xf32>
    %607 = vector.shape_cast %606 : vector<1x1x1x2xf32> to vector<1x2xf32>
    %cst_511 = arith.constant dense<0.000000e+00> : vector<20x2xf32>
    %608 = tpu.matmul %522, %605, %cst_511 {dimension_numbers = #tpu.dot_dimension_numbers<[1], [0], [0], [1], [0, 0, 1, 1], [], []>} : vector<20x8xf32>, vector<8x2xf32>, vector<20x2xf32> -> vector<20x2xf32>
    %609 = vector.broadcast %607 : vector<1x2xf32> to vector<20x2xf32>
    %610 = arith.addf %608, %609 : vector<20x2xf32>
    %611 = vector.extract_strided_slice %567 {offsets = [2, 0], sizes = [2, 20], strides = [1, 1]} : vector<8x20xf32> to vector<2x20xf32>
    %cst_512 = arith.constant dense<0.000000e+00> : vector<2x20xf32>
    %612 = tpu.matmul %603, %611, %cst_512 {dimension_numbers = #tpu.dot_dimension_numbers<[1], [0], [0], [1], [0, 0, 1, 1], [], []>} : vector<2x2xf32>, vector<2x20xf32>, vector<2x20xf32> -> vector<2x20xf32>
    %cst_513 = arith.constant -1.000000e+30 : f32
    %613 = vector.broadcast %cst_513 : f32 to vector<2x20xf32>
    %614 = arith.select %10, %612, %613 : vector<2x20xi1>, vector<2x20xf32>
    %cst_514 = arith.constant dense<0xFF800000> : vector<2xf32>
    %615 = vector.multi_reduction <maximumf>, %614, %cst_514 [1] : vector<2x20xf32> to vector<2xf32>
    %616 = vector.shape_cast %615 : vector<2xf32> to vector<2x1xf32>
    %617 = vector.broadcast %616 : vector<2x1xf32> to vector<2x20xf32>
    %618 = arith.subf %614, %617 : vector<2x20xf32>
    %619 = math.exp %618 : vector<2x20xf32>
    %cst_515 = arith.constant dense<0.000000e+00> : vector<2xf32>
    %620 = vector.multi_reduction <add>, %619, %cst_515 [1] : vector<2x20xf32> to vector<2xf32>
    %621 = vector.shape_cast %620 : vector<2xf32> to vector<2x1xf32>
    %622 = tpu.reciprocal %621 {approx = true} : vector<2x1xf32> -> vector<2x1xf32>
    %623 = vector.broadcast %622 : vector<2x1xf32> to vector<2x20xf32>
    %624 = arith.mulf %619, %623 : vector<2x20xf32>
    %cst_516 = arith.constant dense<0.000000e+00> : vector<2x2xf32>
    %625 = tpu.matmul %624, %610, %cst_516 {dimension_numbers = #tpu.dot_dimension_numbers<[1], [0], [0], [1], [0, 0, 1, 1], [], []>} : vector<2x20xf32>, vector<20x2xf32>, vector<2x2xf32> -> vector<2x2xf32>
    %c4_517 = arith.constant 4 : index
    %c2_518 = arith.constant 2 : index
    %c0_519 = arith.constant 0 : index
    %c0_520 = arith.constant 0 : index
    %626 = vector.load %arg6[%c4_517, %c2_518, %c0_519, %c0_520] : memref<5x4x8x2xf32, #tpu.memory_space<vmem>>, vector<1x1x8x2xf32>
    %627 = vector.shape_cast %626 : vector<1x1x8x2xf32> to vector<8x2xf32>
    %c4_521 = arith.constant 4 : index
    %c2_522 = arith.constant 2 : index
    %c0_523 = arith.constant 0 : index
    %c0_524 = arith.constant 0 : index
    %628 = vector.load %arg7[%c4_521, %c2_522, %c0_523, %c0_524] : memref<5x4x1x2xf32, #tpu.memory_space<vmem>>, vector<1x1x1x2xf32>
    %629 = vector.shape_cast %628 : vector<1x1x1x2xf32> to vector<1x2xf32>
    %cst_525 = arith.constant dense<0.000000e+00> : vector<2x2xf32>
    %630 = tpu.matmul %559, %627, %cst_525 {dimension_numbers = #tpu.dot_dimension_numbers<[1], [0], [0], [1], [0, 0, 1, 1], [], []>} : vector<2x8xf32>, vector<8x2xf32>, vector<2x2xf32> -> vector<2x2xf32>
    %631 = vector.broadcast %629 : vector<1x2xf32> to vector<2x2xf32>
    %632 = arith.addf %630, %631 : vector<2x2xf32>
    %c4_526 = arith.constant 4 : index
    %c2_527 = arith.constant 2 : index
    %c0_528 = arith.constant 0 : index
    %c0_529 = arith.constant 0 : index
    %633 = vector.load %arg10[%c4_526, %c2_527, %c0_528, %c0_529] : memref<5x4x8x2xf32, #tpu.memory_space<vmem>>, vector<1x1x8x2xf32>
    %634 = vector.shape_cast %633 : vector<1x1x8x2xf32> to vector<8x2xf32>
    %c4_530 = arith.constant 4 : index
    %c2_531 = arith.constant 2 : index
    %c0_532 = arith.constant 0 : index
    %c0_533 = arith.constant 0 : index
    %635 = vector.load %arg11[%c4_530, %c2_531, %c0_532, %c0_533] : memref<5x4x1x2xf32, #tpu.memory_space<vmem>>, vector<1x1x1x2xf32>
    %636 = vector.shape_cast %635 : vector<1x1x1x2xf32> to vector<1x2xf32>
    %cst_534 = arith.constant dense<0.000000e+00> : vector<20x2xf32>
    %637 = tpu.matmul %522, %634, %cst_534 {dimension_numbers = #tpu.dot_dimension_numbers<[1], [0], [0], [1], [0, 0, 1, 1], [], []>} : vector<20x8xf32>, vector<8x2xf32>, vector<20x2xf32> -> vector<20x2xf32>
    %638 = vector.broadcast %636 : vector<1x2xf32> to vector<20x2xf32>
    %639 = arith.addf %637, %638 : vector<20x2xf32>
    %640 = vector.extract_strided_slice %567 {offsets = [4, 0], sizes = [2, 20], strides = [1, 1]} : vector<8x20xf32> to vector<2x20xf32>
    %cst_535 = arith.constant dense<0.000000e+00> : vector<2x20xf32>
    %641 = tpu.matmul %632, %640, %cst_535 {dimension_numbers = #tpu.dot_dimension_numbers<[1], [0], [0], [1], [0, 0, 1, 1], [], []>} : vector<2x2xf32>, vector<2x20xf32>, vector<2x20xf32> -> vector<2x20xf32>
    %cst_536 = arith.constant -1.000000e+30 : f32
    %642 = vector.broadcast %cst_536 : f32 to vector<2x20xf32>
    %643 = arith.select %10, %641, %642 : vector<2x20xi1>, vector<2x20xf32>
    %cst_537 = arith.constant dense<0xFF800000> : vector<2xf32>
    %644 = vector.multi_reduction <maximumf>, %643, %cst_537 [1] : vector<2x20xf32> to vector<2xf32>
    %645 = vector.shape_cast %644 : vector<2xf32> to vector<2x1xf32>
    %646 = vector.broadcast %645 : vector<2x1xf32> to vector<2x20xf32>
    %647 = arith.subf %643, %646 : vector<2x20xf32>
    %648 = math.exp %647 : vector<2x20xf32>
    %cst_538 = arith.constant dense<0.000000e+00> : vector<2xf32>
    %649 = vector.multi_reduction <add>, %648, %cst_538 [1] : vector<2x20xf32> to vector<2xf32>
    %650 = vector.shape_cast %649 : vector<2xf32> to vector<2x1xf32>
    %651 = tpu.reciprocal %650 {approx = true} : vector<2x1xf32> -> vector<2x1xf32>
    %652 = vector.broadcast %651 : vector<2x1xf32> to vector<2x20xf32>
    %653 = arith.mulf %648, %652 : vector<2x20xf32>
    %cst_539 = arith.constant dense<0.000000e+00> : vector<2x2xf32>
    %654 = tpu.matmul %653, %639, %cst_539 {dimension_numbers = #tpu.dot_dimension_numbers<[1], [0], [0], [1], [0, 0, 1, 1], [], []>} : vector<2x20xf32>, vector<20x2xf32>, vector<2x2xf32> -> vector<2x2xf32>
    %c4_540 = arith.constant 4 : index
    %c3_541 = arith.constant 3 : index
    %c0_542 = arith.constant 0 : index
    %c0_543 = arith.constant 0 : index
    %655 = vector.load %arg6[%c4_540, %c3_541, %c0_542, %c0_543] : memref<5x4x8x2xf32, #tpu.memory_space<vmem>>, vector<1x1x8x2xf32>
    %656 = vector.shape_cast %655 : vector<1x1x8x2xf32> to vector<8x2xf32>
    %c4_544 = arith.constant 4 : index
    %c3_545 = arith.constant 3 : index
    %c0_546 = arith.constant 0 : index
    %c0_547 = arith.constant 0 : index
    %657 = vector.load %arg7[%c4_544, %c3_545, %c0_546, %c0_547] : memref<5x4x1x2xf32, #tpu.memory_space<vmem>>, vector<1x1x1x2xf32>
    %658 = vector.shape_cast %657 : vector<1x1x1x2xf32> to vector<1x2xf32>
    %cst_548 = arith.constant dense<0.000000e+00> : vector<2x2xf32>
    %659 = tpu.matmul %559, %656, %cst_548 {dimension_numbers = #tpu.dot_dimension_numbers<[1], [0], [0], [1], [0, 0, 1, 1], [], []>} : vector<2x8xf32>, vector<8x2xf32>, vector<2x2xf32> -> vector<2x2xf32>
    %660 = vector.broadcast %658 : vector<1x2xf32> to vector<2x2xf32>
    %661 = arith.addf %659, %660 : vector<2x2xf32>
    %c4_549 = arith.constant 4 : index
    %c3_550 = arith.constant 3 : index
    %c0_551 = arith.constant 0 : index
    %c0_552 = arith.constant 0 : index
    %662 = vector.load %arg10[%c4_549, %c3_550, %c0_551, %c0_552] : memref<5x4x8x2xf32, #tpu.memory_space<vmem>>, vector<1x1x8x2xf32>
    %663 = vector.shape_cast %662 : vector<1x1x8x2xf32> to vector<8x2xf32>
    %c4_553 = arith.constant 4 : index
    %c3_554 = arith.constant 3 : index
    %c0_555 = arith.constant 0 : index
    %c0_556 = arith.constant 0 : index
    %664 = vector.load %arg11[%c4_553, %c3_554, %c0_555, %c0_556] : memref<5x4x1x2xf32, #tpu.memory_space<vmem>>, vector<1x1x1x2xf32>
    %665 = vector.shape_cast %664 : vector<1x1x1x2xf32> to vector<1x2xf32>
    %cst_557 = arith.constant dense<0.000000e+00> : vector<20x2xf32>
    %666 = tpu.matmul %522, %663, %cst_557 {dimension_numbers = #tpu.dot_dimension_numbers<[1], [0], [0], [1], [0, 0, 1, 1], [], []>} : vector<20x8xf32>, vector<8x2xf32>, vector<20x2xf32> -> vector<20x2xf32>
    %667 = vector.broadcast %665 : vector<1x2xf32> to vector<20x2xf32>
    %668 = arith.addf %666, %667 : vector<20x2xf32>
    %669 = vector.extract_strided_slice %567 {offsets = [6, 0], sizes = [2, 20], strides = [1, 1]} : vector<8x20xf32> to vector<2x20xf32>
    %cst_558 = arith.constant dense<0.000000e+00> : vector<2x20xf32>
    %670 = tpu.matmul %661, %669, %cst_558 {dimension_numbers = #tpu.dot_dimension_numbers<[1], [0], [0], [1], [0, 0, 1, 1], [], []>} : vector<2x2xf32>, vector<2x20xf32>, vector<2x20xf32> -> vector<2x20xf32>
    %cst_559 = arith.constant -1.000000e+30 : f32
    %671 = vector.broadcast %cst_559 : f32 to vector<2x20xf32>
    %672 = arith.select %10, %670, %671 : vector<2x20xi1>, vector<2x20xf32>
    %cst_560 = arith.constant dense<0xFF800000> : vector<2xf32>
    %673 = vector.multi_reduction <maximumf>, %672, %cst_560 [1] : vector<2x20xf32> to vector<2xf32>
    %674 = vector.shape_cast %673 : vector<2xf32> to vector<2x1xf32>
    %675 = vector.broadcast %674 : vector<2x1xf32> to vector<2x20xf32>
    %676 = arith.subf %672, %675 : vector<2x20xf32>
    %677 = math.exp %676 : vector<2x20xf32>
    %cst_561 = arith.constant dense<0.000000e+00> : vector<2xf32>
    %678 = vector.multi_reduction <add>, %677, %cst_561 [1] : vector<2x20xf32> to vector<2xf32>
    %679 = vector.shape_cast %678 : vector<2xf32> to vector<2x1xf32>
    %680 = tpu.reciprocal %679 {approx = true} : vector<2x1xf32> -> vector<2x1xf32>
    %681 = vector.broadcast %680 : vector<2x1xf32> to vector<2x20xf32>
    %682 = arith.mulf %677, %681 : vector<2x20xf32>
    %cst_562 = arith.constant dense<0.000000e+00> : vector<2x2xf32>
    %683 = tpu.matmul %682, %668, %cst_562 {dimension_numbers = #tpu.dot_dimension_numbers<[1], [0], [0], [1], [0, 0, 1, 1], [], []>} : vector<2x20xf32>, vector<20x2xf32>, vector<2x2xf32> -> vector<2x2xf32>
    %684 = tpu.concatenate %596, %625, %654, %683 in 1 : vector<2x2xf32>, vector<2x2xf32>, vector<2x2xf32>, vector<2x2xf32> -> vector<2x8xf32>
    %c4_563 = arith.constant 4 : index
    %c0_564 = arith.constant 0 : index
    %c0_565 = arith.constant 0 : index
    %685 = vector.load %arg12[%c4_563, %c0_564, %c0_565] : memref<5x8x8xf32, #tpu.memory_space<vmem>>, vector<1x8x8xf32>
    %686 = vector.shape_cast %685 : vector<1x8x8xf32> to vector<8x8xf32>
    %c4_566 = arith.constant 4 : index
    %c0_567 = arith.constant 0 : index
    %c0_568 = arith.constant 0 : index
    %687 = vector.load %arg13[%c4_566, %c0_567, %c0_568] : memref<5x1x8xf32, #tpu.memory_space<vmem>>, vector<1x1x8xf32>
    %688 = vector.shape_cast %687 : vector<1x1x8xf32> to vector<1x8xf32>
    %cst_569 = arith.constant dense<0.000000e+00> : vector<2x8xf32>
    %689 = tpu.matmul %684, %686, %cst_569 {dimension_numbers = #tpu.dot_dimension_numbers<[1], [0], [0], [1], [0, 0, 1, 1], [], []>} : vector<2x8xf32>, vector<8x8xf32>, vector<2x8xf32> -> vector<2x8xf32>
    %690 = vector.broadcast %688 : vector<1x8xf32> to vector<2x8xf32>
    %691 = arith.addf %689, %690 : vector<2x8xf32>
    %692 = arith.addf %559, %691 : vector<2x8xf32>
    %c2_570 = arith.constant 2 : index
    %c0_571 = arith.constant 0 : index
    %c0_572 = arith.constant 0 : index
    %693 = vector.load %arg14[%c2_570, %c0_571, %c0_572] : memref<3x8x16xf32, #tpu.memory_space<vmem>>, vector<1x8x16xf32>
    %694 = vector.shape_cast %693 : vector<1x8x16xf32> to vector<8x16xf32>
    %c2_573 = arith.constant 2 : index
    %c0_574 = arith.constant 0 : index
    %c0_575 = arith.constant 0 : index
    %695 = vector.load %arg15[%c2_573, %c0_574, %c0_575] : memref<3x1x16xf32, #tpu.memory_space<vmem>>, vector<1x1x16xf32>
    %696 = vector.shape_cast %695 : vector<1x1x16xf32> to vector<1x16xf32>
    %cst_576 = arith.constant dense<0.000000e+00> : vector<2x16xf32>
    %697 = tpu.matmul %692, %694, %cst_576 {dimension_numbers = #tpu.dot_dimension_numbers<[1], [0], [0], [1], [0, 0, 1, 1], [], []>} : vector<2x8xf32>, vector<8x16xf32>, vector<2x16xf32> -> vector<2x16xf32>
    %698 = vector.broadcast %696 : vector<1x16xf32> to vector<2x16xf32>
    %699 = arith.addf %697, %698 : vector<2x16xf32>
    %c2_577 = arith.constant 2 : index
    %c0_578 = arith.constant 0 : index
    %c0_579 = arith.constant 0 : index
    %700 = vector.load %arg16[%c2_577, %c0_578, %c0_579] : memref<3x16x8xf32, #tpu.memory_space<vmem>>, vector<1x16x8xf32>
    %701 = vector.shape_cast %700 : vector<1x16x8xf32> to vector<16x8xf32>
    %c2_580 = arith.constant 2 : index
    %c0_581 = arith.constant 0 : index
    %c0_582 = arith.constant 0 : index
    %702 = vector.load %arg17[%c2_580, %c0_581, %c0_582] : memref<3x1x8xf32, #tpu.memory_space<vmem>>, vector<1x1x8xf32>
    %703 = vector.shape_cast %702 : vector<1x1x8xf32> to vector<1x8xf32>
    %cst_583 = arith.constant dense<0.000000e+00> : vector<2x8xf32>
    %704 = tpu.matmul %699, %701, %cst_583 {dimension_numbers = #tpu.dot_dimension_numbers<[1], [0], [0], [1], [0, 0, 1, 1], [], []>} : vector<2x16xf32>, vector<16x8xf32>, vector<2x8xf32> -> vector<2x8xf32>
    %705 = vector.broadcast %703 : vector<1x8xf32> to vector<2x8xf32>
    %706 = arith.addf %704, %705 : vector<2x8xf32>
    %707 = arith.addf %692, %706 : vector<2x8xf32>
    %c0_584 = arith.constant 0 : index
    %c0_585 = arith.constant 0 : index
    %708 = vector.load %arg18[%c0_584, %c0_585] : memref<8x4xf32, #tpu.memory_space<vmem>>, vector<8x4xf32>
    %c0_586 = arith.constant 0 : index
    %c0_587 = arith.constant 0 : index
    %709 = vector.load %arg19[%c0_586, %c0_587] : memref<1x4xf32, #tpu.memory_space<vmem>>, vector<1x4xf32>
    %cst_588 = arith.constant dense<0.000000e+00> : vector<2x4xf32>
    %710 = tpu.matmul %707, %708, %cst_588 {dimension_numbers = #tpu.dot_dimension_numbers<[1], [0], [0], [1], [0, 0, 1, 1], [], []>} : vector<2x8xf32>, vector<8x4xf32>, vector<2x4xf32> -> vector<2x4xf32>
    %711 = vector.broadcast %709 : vector<1x4xf32> to vector<2x4xf32>
    %712 = arith.addf %710, %711 : vector<2x4xf32>
    %cst_589 = arith.constant 0.000000e+00 : f32
    %713 = vector.broadcast %cst_589 : f32 to vector<2x4xf32>
    %714 = arith.subf %713, %712 : vector<2x4xf32>
    %715 = math.exp %714 : vector<2x4xf32>
    %cst_590 = arith.constant 1.000000e+00 : f32
    %716 = vector.broadcast %cst_590 : f32 to vector<2x4xf32>
    %717 = arith.addf %716, %715 : vector<2x4xf32>
    %cst_591 = arith.constant 1.000000e+00 : f32
    %718 = vector.broadcast %cst_591 : f32 to vector<2x4xf32>
    %719 = arith.divf %718, %717 : vector<2x4xf32>
    %c0_592 = arith.constant 0 : index
    %c0_593 = arith.constant 0 : index
    %720 = vector.load %arg21[%c0_592, %c0_593] : memref<2x4xf32, #tpu.memory_space<vmem>>, vector<2x4xf32>
    tpu.vector_store %arg21[%c0_592, %c0_593], %719 {strides = array<i32>} : memref<2x4xf32, #tpu.memory_space<vmem>>, vector<2x4xf32>,
    return
  }
  func.func @transform_0(%arg0: i32) -> (i32, i32) {
    %c0_i32 = arith.constant 0 : i32
    %c0_i32_0 = arith.constant 0 : i32
    return %arg0, %c0_i32 : i32, i32
  }
  func.func @transform_1(%arg0: i32) -> (i32, i32) {
    %c0_i32 = arith.constant 0 : i32
    %c0_i32_0 = arith.constant 0 : i32
    return %arg0, %c0_i32 : i32, i32
  }
  func.func @transform_2(%arg0: i32) -> (i32, i32) {
    %c0_i32 = arith.constant 0 : i32
    %c0_i32_0 = arith.constant 0 : i32
    %c0_i32_1 = arith.constant 0 : i32
    return %c0_i32, %c0_i32_0 : i32, i32
  }
  func.func @transform_3(%arg0: i32) -> (i32, i32) {
    %c0_i32 = arith.constant 0 : i32
    %c0_i32_0 = arith.constant 0 : i32
    %c0_i32_1 = arith.constant 0 : i32
    return %c0_i32, %c0_i32_0 : i32, i32
  }
  func.func @transform_4(%arg0: i32) -> (i32, i32) {
    %c0_i32 = arith.constant 0 : i32
    %c0_i32_0 = arith.constant 0 : i32
    %c0_i32_1 = arith.constant 0 : i32
    return %c0_i32, %c0_i32_0 : i32, i32
  }
  func.func @transform_5(%arg0: i32) -> (i32, i32, i32, i32) {
    %c0_i32 = arith.constant 0 : i32
    %c0_i32_0 = arith.constant 0 : i32
    %c0_i32_1 = arith.constant 0 : i32
    %c0_i32_2 = arith.constant 0 : i32
    %c0_i32_3 = arith.constant 0 : i32
    return %c0_i32, %c0_i32_0, %c0_i32_1, %c0_i32_2 : i32, i32, i32, i32
  }
  func.func @transform_6(%arg0: i32) -> (i32, i32, i32, i32) {
    %c0_i32 = arith.constant 0 : i32
    %c0_i32_0 = arith.constant 0 : i32
    %c0_i32_1 = arith.constant 0 : i32
    %c0_i32_2 = arith.constant 0 : i32
    %c0_i32_3 = arith.constant 0 : i32
    return %c0_i32, %c0_i32_0, %c0_i32_1, %c0_i32_2 : i32, i32, i32, i32
  }
  func.func @transform_7(%arg0: i32) -> (i32, i32, i32) {
    %c0_i32 = arith.constant 0 : i32
    %c0_i32_0 = arith.constant 0 : i32
    %c0_i32_1 = arith.constant 0 : i32
    %c0_i32_2 = arith.constant 0 : i32
    return %c0_i32, %c0_i32_0, %c0_i32_1 : i32, i32, i32
  }
  func.func @transform_8(%arg0: i32) -> (i32, i32, i32) {
    %c0_i32 = arith.constant 0 : i32
    %c0_i32_0 = arith.constant 0 : i32
    %c0_i32_1 = arith.constant 0 : i32
    %c0_i32_2 = arith.constant 0 : i32
    return %c0_i32, %c0_i32_0, %c0_i32_1 : i32, i32, i32
  }
  func.func @transform_9(%arg0: i32) -> (i32, i32, i32, i32) {
    %c0_i32 = arith.constant 0 : i32
    %c0_i32_0 = arith.constant 0 : i32
    %c0_i32_1 = arith.constant 0 : i32
    %c0_i32_2 = arith.constant 0 : i32
    %c0_i32_3 = arith.constant 0 : i32
    return %c0_i32, %c0_i32_0, %c0_i32_1, %c0_i32_2 : i32, i32, i32, i32
  }
  func.func @transform_10(%arg0: i32) -> (i32, i32, i32, i32) {
    %c0_i32 = arith.constant 0 : i32
    %c0_i32_0 = arith.constant 0 : i32
    %c0_i32_1 = arith.constant 0 : i32
    %c0_i32_2 = arith.constant 0 : i32
    %c0_i32_3 = arith.constant 0 : i32
    return %c0_i32, %c0_i32_0, %c0_i32_1, %c0_i32_2 : i32, i32, i32, i32
  }
  func.func @transform_11(%arg0: i32) -> (i32, i32, i32) {
    %c0_i32 = arith.constant 0 : i32
    %c0_i32_0 = arith.constant 0 : i32
    %c0_i32_1 = arith.constant 0 : i32
    %c0_i32_2 = arith.constant 0 : i32
    return %c0_i32, %c0_i32_0, %c0_i32_1 : i32, i32, i32
  }
  func.func @transform_12(%arg0: i32) -> (i32, i32, i32) {
    %c0_i32 = arith.constant 0 : i32
    %c0_i32_0 = arith.constant 0 : i32
    %c0_i32_1 = arith.constant 0 : i32
    %c0_i32_2 = arith.constant 0 : i32
    return %c0_i32, %c0_i32_0, %c0_i32_1 : i32, i32, i32
  }
  func.func @transform_13(%arg0: i32) -> (i32, i32, i32) {
    %c0_i32 = arith.constant 0 : i32
    %c0_i32_0 = arith.constant 0 : i32
    %c0_i32_1 = arith.constant 0 : i32
    %c0_i32_2 = arith.constant 0 : i32
    return %c0_i32, %c0_i32_0, %c0_i32_1 : i32, i32, i32
  }
  func.func @transform_14(%arg0: i32) -> (i32, i32, i32) {
    %c0_i32 = arith.constant 0 : i32
    %c0_i32_0 = arith.constant 0 : i32
    %c0_i32_1 = arith.constant 0 : i32
    %c0_i32_2 = arith.constant 0 : i32
    return %c0_i32, %c0_i32_0, %c0_i32_1 : i32, i32, i32
  }
  func.func @transform_15(%arg0: i32) -> (i32, i32, i32) {
    %c0_i32 = arith.constant 0 : i32
    %c0_i32_0 = arith.constant 0 : i32
    %c0_i32_1 = arith.constant 0 : i32
    %c0_i32_2 = arith.constant 0 : i32
    return %c0_i32, %c0_i32_0, %c0_i32_1 : i32, i32, i32
  }
  func.func @transform_16(%arg0: i32) -> (i32, i32, i32) {
    %c0_i32 = arith.constant 0 : i32
    %c0_i32_0 = arith.constant 0 : i32
    %c0_i32_1 = arith.constant 0 : i32
    %c0_i32_2 = arith.constant 0 : i32
    return %c0_i32, %c0_i32_0, %c0_i32_1 : i32, i32, i32
  }
  func.func @transform_17(%arg0: i32) -> (i32, i32) {
    %c0_i32 = arith.constant 0 : i32
    %c0_i32_0 = arith.constant 0 : i32
    %c0_i32_1 = arith.constant 0 : i32
    return %c0_i32, %c0_i32_0 : i32, i32
  }
  func.func @transform_18(%arg0: i32) -> (i32, i32) {
    %c0_i32 = arith.constant 0 : i32
    %c0_i32_0 = arith.constant 0 : i32
    %c0_i32_1 = arith.constant 0 : i32
    return %c0_i32, %c0_i32_0 : i32, i32
  }
  func.func @transform_19(%arg0: i32) -> (i32, i32) {
    %c0_i32 = arith.constant 0 : i32
    %c0_i32_0 = arith.constant 0 : i32
    return %arg0, %c0_i32 : i32, i32
  }
  func.func @transform_20(%arg0: i32) -> (i32, i32) {
    %c0_i32 = arith.constant 0 : i32
    %c0_i32_0 = arith.constant 0 : i32
    return %arg0, %c0_i32 : i32, i32
  }
}

</mosaic_0001>

<bundles_post_ra>
// kernel: tile.9
= control target key start
LH: loop header
LB: loop body
LE: loop exit
PB: predicated region body
PF: predicated region fallthrough
CT: control target
= control target key end

     0   :  { %vm42_vm0 = vcmask 1047556   ;;  %vm44_vm1 = vcmask 80896   ;;  %vm54_vm2 = vcmask 162896   ;;  %s111_s0 = inlined_call_operand.vmem [shape: f32[2,10,8], index: 0, kind: input, shape index: {}]   ;;  %s112_s1 = inlined_call_operand.vmem [shape: f32[20,8], index: 1, kind: output, shape index: {}]  }
   0x1   :  { %v62_v0 = vld [vmem:[%s111_s0 + $0xe] sm:$0x3]  ;;  %v63_v1 = vld [vmem:[%s111_s0 + $0xc] sm:$0x3]  ;;  %v64_v2 = vld [vmem:[%s111_s0 + $0xa] sm:$0x3] }
   0x2   :  { %8 = vst [vmem:[#allocation0 + $0x38] sm:$0x3] %v62_v0  ;;  %13 = vst [vmem:[#allocation0 + $0x30] sm:$0x3] %v63_v1  ;;  %v65_v3 = vld [vmem:[%s111_s0 + $0x8] sm:$0x3] }
   0x3   :  { %18 = vst [vmem:[#allocation0 + $0x28] sm:$0x3] %v64_v2  ;;  %v66_v4 = vld [vmem:[%s111_s0 + $0x6] sm:$0x3]  ;;  %v67_v5 = vld [vmem:[%s111_s0 + $0x4] sm:$0x3] }
   0x4   :  { %23 = vst [vmem:[#allocation0 + $0x20] sm:$0x3] %v65_v3  ;;  %28 = vst [vmem:[#allocation0 + $0x18] sm:$0x3] %v66_v4  ;;  %v68_v6 = vld [vmem:[%s111_s0 + $0x2] sm:$0x3] }
   0x5   :  { %33 = vst [vmem:[#allocation0 + $0x10] sm:$0x3] %v67_v5  ;;  %v38_v7 = vld [vmem:[%s111_s0] sm:$0x3]  ;;  %37 = vst [vmem:[#allocation0 + $0x8] sm:$0x3] %v68_v6 }
   0x6   :  { %39 = vst [vmem:[#allocation0] sm:$0x3] %v38_v7  ;;  %s70_s0 = smov 10  }
   0xb   :  { %v41_v8 = vld [vmem:[#allocation0] ss:$8 sm:$0xf0]   ;;  %v49_v9 = vld [vmem:[#allocation0 + $0x1] ss:$8 sm:$0xf0]  }
   0xd   :  { %v40_v10 = vld [vmem:[#allocation0] ss:$8 sm:$0xf]   ;;  %v47_v11 = vld [vmem:[#allocation0 + $0x1] ss:$8 sm:$0xf]  }
   0xe   :  { %v43_v12 = vsel %vm42_vm0, %v41_v8, %v40_v10  ;;  %v51_v13 = vsel %vm42_vm0, %v49_v9, %v47_v11 }
   0xf   :  { %52 = vrot.lane.b32.xlu0 %v51_v13, %s70_s0  ;;  %45 = vst.msk [vmem:[%s112_s1] sm:$0xff] %vm44_vm1, %v43_v12  }
  0x81   :  { %v53_v14 = vpop.permute.xlu0 %52  }
  0x82   :  { %55 = vst.msk [vmem:[%s112_s1] sm:$0xff] %vm54_vm2, %v53_v14  }

// kernel: tranad_forward.1
= control target key start
LH: loop header
LB: loop body
LE: loop exit
PB: predicated region body
PF: predicated region fallthrough
CT: control target
= control target key end

     0   :  { %s12923_s0 = inlined_call_operand.vmem [shape: f32[20,4], index: 0, kind: input, shape index: {}]   ;;  %s12924_s1 = inlined_call_operand.vmem [shape: f32[2,4], index: 1, kind: input, shape index: {}]   ;;  %s12925_s2 = inlined_call_operand.vmem [shape: f32[20,8], index: 2, kind: input, shape index: {}]   ;;  %s12926_s3 = inlined_call_operand.vmem [shape: s32[20,1], index: 3, kind: input, shape index: {}]   ;;  %s12927_s4 = inlined_call_operand.vmem [shape: s32[1,20], index: 4, kind: input, shape index: {}]   ;;  %s12928_s5 = inlined_call_operand.vmem [shape: f32[5,4,8,2], index: 5, kind: input, shape index: {}]   ;;  %s12929_s6 = inlined_call_operand.vmem [shape: f32[5,4,1,2], index: 6, kind: input, shape index: {}]   ;;  %s12930_s7 = inlined_call_operand.vmem [shape: f32[5,8,8], index: 7, kind: input, shape index: {}]   ;;  %s12931_s8 = inlined_call_operand.vmem [shape: f32[5,1,8], index: 8, kind: input, shape index: {}]   ;;  %s12932_s9 = inlined_call_operand.vmem [shape: f32[5,4,8,2], index: 9, kind: input, shape index: {}]   ;;  %s12933_s10 = inlined_call_operand.vmem [shape: f32[5,4,1,2], index: 10, kind: input, shape index: {}]   ;;  %s12934_s11 = inlined_call_operand.vmem [shape: f32[5,8,8], index: 11, kind: input, shape index: {}]   ;;  %s12935_s12 = inlined_call_operand.vmem [shape: f32[5,1,8], index: 12, kind: input, shape index: {}]   ;;  %s12936_s13 = inlined_call_operand.vmem [shape: f32[3,8,16], index: 13, kind: input, shape index: {}]   ;;  %s12937_s14 = inlined_call_operand.vmem [shape: f32[3,1,16], index: 14, kind: input, shape index: {}]   ;;  %s12938_s15 = inlined_call_operand.vmem [shape: f32[3,16,8], index: 15, kind: input, shape index: {}]   ;;  %s12939_s16 = inlined_call_operand.vmem [shape: f32[3,1,8], index: 16, kind: input, shape index: {}]   ;;  %s12940_s17 = inlined_call_operand.vmem [shape: f32[8,4], index: 17, kind: input, shape index: {}]   ;;  %s12941_s18 = inlined_call_operand.vmem [shape: f32[1,4], index: 18, kind: input, shape index: {}]   ;;  %s12942_s19 = inlined_call_operand.hbm [shape: f32[2,4], index: 19, kind: output, shape index: {0}]   ;;  %s12943_s20 = inlined_call_operand.hbm [shape: f32[2,4], index: 20, kind: output, shape index: {1}]  }
   0x1   :  { %12958 = sst [smem:[#allocation8_spill]] %s12923_s0 }
   0x2   :  { %12959 = sst [smem:[#allocation9_spill]] %s12924_s1 }
   0x3   :  { %12960 = sst [smem:[#allocation10_spill]] %s12925_s2 }
   0x4   :  { %12961 = sst [smem:[#allocation11_spill]] %s12926_s3 }
   0x5   :  { %12962 = sst [smem:[#allocation12_spill]] %s12927_s4 }
   0x6   :  { %26 = vsyncpa [#allocation3], 0  ;;  %v111_v0 = vld [vmem:[%s12930_s7] sm:$0xff]  ;;  %s12963_s2 = sld [smem:[#allocation8_spill]]  ;;  %vm103_vm0 = vcmask 31744   ;;  %v10968_v2 = vmov 0.0  }
   0x7   :  { %9672 = vmatprep.subr.mxu0 %v10968_v2  ;;  %vm10969_vm1 = vmmov 0   ;;  %s12964_s26 = sld [smem:[#allocation10_spill]]  ;;  %vm119_vm2 = vcmask 64512   ;;  %9683 = vmatprep.subr.mxu1 %v10968_v2  ;;  %v209_v8 = vld [vmem:[%s12928_s5] sm:$0xff]  ;;  %s12965_s24 = sld [smem:[#allocation11_spill]]  ;;  %v10970_v16 = vmov 0  }
   0x8   :  { %9674 = vmatprep.mubr.msk.f32.mxu0 %vm10969_vm1, %v10968_v2  ;;  %9673 = vmatpush3.msra.mxu0 %v111_v0 }
   0x9   :  { %9684 = vmatpush3.msra.mxu1 %v209_v8  ;;  %9685 = vmatprep.mubr.msk.f32.mxu1 %vm10969_vm1, %v10968_v2 }
   0xa   :  { %10716 = vset.pattern.permute.xlu1 %v10970_v16  ;;  %10715 = vset.pattern.permute.xlu0 %v10970_v16 }
   0xc   :  { %v66_v1 = vld [vmem:[%s12963_s2] sm:$0xff]  ;;  %v67_v5 = vld [vmem:[%s12963_s2 + $0x8] sm:$0xff]  ;;  %v68_v6 = vld [vmem:[%s12963_s2 + $0x10] sm:$0xf] }
   0xd   :  { %v70_v3 = vld [vmem:[%s12964_s26] sm:$0xff]  ;;  %v11097_v4 = vmul.f32 2.0, %v66_v1  ;;  %v11105_v7 = vmul.f32 2.0, %v67_v5  ;;  %v71_v10 = vld [vmem:[%s12964_s26 + $0x8] sm:$0xff]  ;;  %v11116_v11 = vmul.f32 2.0, %v68_v6 }
   0xe   :  { %v75_v12 = vld [vmem:[%s12965_s24 + $0x10] sm:$0xf]  ;;  %v73_v13 = vld [vmem:[%s12965_s24] sm:$0xff] }
   0xf   :  { %v105_v9 = vsel %vm103_vm0, %v11097_v4, 0.0  ;;  %v106_v15 = vsel %vm103_vm0, %v11105_v7, 0.0 }
  0x10   :  { %v11126_v14 = vadd.f32 %v105_v9, %v70_v3 }
  0x11   :  { %27 = vsyncpa [#allocation5], 0  ;;  %84 = vperm.xlu1 %10716, %v75_v12   ;;  %78 = vperm.xlu0 %10715, %v73_v13   ;;  %v11132_v17 = vadd.f32 %v106_v15, %v71_v10  ;;  %v74_v18 = vld [vmem:[%s12965_s24 + $0x8] sm:$0xff]  ;;  %v72_v19 = vld [vmem:[%s12964_s26 + $0x10] sm:$0xf]  ;;  %v107_v20 = vsel %vm103_vm0, %v11116_v11, 0.0 }
  0x12   :  { %9675 = vmatmul.mubr.msk.f32.vlgmr.msra.gmra.mrb[0].mxu0 %vm119_vm2, %v11126_v14  ;;  %9686 = vmatmul.mubr.msk.f32.vlgmr.msra.gmra.mrb[0].mxu1 %vm119_vm2, %v11126_v14  ;;  %v11151_v21 = vadd.f32 %v107_v20, %v72_v19  ;;  %v10971_v22 = vmov 0.0|0.0   ;;  %v8899_v27 = vld [vmem:[%s12931_s8] ss:$0 sm:$0xff]  ;;  %vm385_vm3 = vcmask 15360   ;;  %s12952_s21 = smov 126   ;;  %v8921_v44 = vld [vmem:[%s12928_s5 + $0x8] sm:$0xff] }
  0x13   :  { %9677 = vmatprep.mubr.msk.f32.mxu0 %vm10969_vm1, %v10968_v2  ;;  %9688 = vmatprep.mubr.msk.f32.mxu1 %vm10969_vm1, %v10968_v2  ;;  %vm11173_vm4 = vmpackc.low %vm385_vm3, %vm385_vm3  ;;  %v8903_v42 = vld [vmem:[%s12929_s6] ss:$0 sm:$0xff]  ;;  %s12968_s4 = sld [smem:[#allocation12_spill]]  ;;  %vm487_vm6 = vcmask 162816   ;;  %vm12957_vm9 = vcmask 158720   ;;  %s12950_s24 = smov 124  }
  0x14   :  { %9694 = vmatprep.subr.mxu0 %v10968_v2  ;;  %10579 = vmatprep.subr.bf16.mxu1 %v10971_v22  ;;  %v297_v53 = vld [vmem:[%s12932_s9] sm:$0xff]  ;;  %vm531_vm10 = vcmask 1043456   ;;  %s12948_s0 = smov 122   ;;  %s10975_s22 = smov 2   ;;  %vm12956_vm11 = vcmask 48128   ;;  %vm12955_vm12 = vcmask 130048  }
  0x15   :  { %81 = vperm.xlu0 %10715, %v74_v18   ;;  %9695 = vmatpush3.msra.mxu0 %v297_v53  ;;  %v8923_v12 = vld [vmem:[%s12929_s6 + $0x1] ss:$0 sm:$0xff]  ;;  %v8943_v18 = vld [vmem:[%s12928_s5 + $0x10] sm:$0xff]  ;;  %s10976_s23 = smov 4   ;;  %s10977_s29 = smov 6   ;;  %vm12954_vm14 = vcmask 156672  }
  0x16   :  { %9678 = vmatmul.mubr.msk.f32.gmra.mrb[2].mxu0 %vm119_vm2, %v11132_v17  ;;  %9689 = vmatmul.mubr.msk.f32.gmra.mrb[2].mxu1 %vm119_vm2, %v11132_v17  ;;  %s12975_s27 = sld [smem:[#allocation9_spill]]  ;;  %v9163_v62 = vld [vmem:[%s12933_s10 + $0x2] ss:$0 sm:$0xff] }
  0x17   :  { %9680 = vmatprep.mubr.msk.f32.mxu0 %vm10969_vm1, %v10968_v2  ;;  %9691 = vmatprep.mubr.msk.f32.mxu1 %vm10969_vm1, %v10968_v2 }
  0x18   :  { %10583 = vmatprep.subr.bf16.mxu0 %v10971_v22 }
  0x19   :  { %v8898_v56 = vld [vmem:[%s12968_s4] ss:$0 sm:$0xff] }
  0x1a   :  { %9681 = vmatmul.mubr.msk.f32.gmra.mrb[4].mxu0 %vm119_vm2, %v11151_v21  ;;  %9692 = vmatmul.mubr.msk.f32.gmra.mrb[4].mxu1 %vm119_vm2, %v11151_v21 }
  0x1b   :  { %9711 = vmatprep.mubr.msk.f32.mxu1 %vm10969_vm1, %v10968_v2  ;;  %9696 = vmatprep.mubr.msk.f32.mxu0 %vm10969_vm1, %v10968_v2 }
  0x1e   :  { %9697 = vmatmul.mubr.msk.f32.vlgmr.msra.gmra.mrb[6].mxu0 %vm119_vm2, %v11126_v14 }
  0x1f   :  { %9699 = vmatprep.mubr.msk.f32.mxu0 %vm10969_vm1, %v10968_v2 }
  0x22   :  { %9700 = vmatmul.mubr.msk.f32.gmra.mrb[8].mxu0 %vm119_vm2, %v11132_v17 }
  0x23   :  { %9702 = vmatprep.mubr.msk.f32.mxu0 %vm10969_vm1, %v10968_v2 }
  0x26   :  { %9703 = vmatmul.mubr.msk.f32.gmra.mrb[10].mxu0 %vm119_vm2, %v11151_v21 }
  0x27   :  { %9726 = vmatprep.mubr.msk.f32.mxu0 %vm10969_vm1, %v10968_v2 }
  0x90   :  { %v11219_v47 = vpop.permute.xlu1 %84  ;;  %v11221_v48 = vpop.permute.xlu0 %78 }
  0x91   :  { %vm11250_vm5 = vcmp.eq.s32.totalorder %v11221_v48, %v8898_v56  ;;  %vm11265_vm8 = vcmp.eq.s32.totalorder %v11219_v47, %v8898_v56 }
  0x94   :  { %v11230_v54 = vpop.permute.xlu0 %81 }
  0x95   :  { %vm11258_vm7 = vcmp.eq.s32.totalorder %v11230_v54, %v8898_v56 }
  0xe5   :  { %v195_v23 = vpop.f32.mrb[0].mxu0  ;;  %v283_v24 = vpop.f32.mrb[0].mxu1 }
  0xe6   :  { %v9676_v25 = vpop.f32.mrb[1].mxu0  ;;  %v9687_v26 = vpop.f32.mrb[1].mxu1  ;;  %v196_v30 = vadd.f32 %v8899_v27, %v195_v23  ;;  %v284_v43 = vadd.f32 %v8903_v42, %v283_v24 }
  0xe9   :  { %v200_v28 = vpop.f32.mrb[2].mxu0  ;;  %v288_v29 = vpop.f32.mrb[2].mxu1 }
  0xea   :  { %v201_v31 = vadd.f32 %v8899_v27, %v200_v28  ;;  %v9679_v32 = vpop.f32.mrb[3].mxu0  ;;  %v9690_v33 = vpop.f32.mrb[3].mxu1  ;;  %v289_v45 = vadd.f32 %v8903_v42, %v288_v29 }
  0xec   :  { %v10580_v35 = vpack.c.bf16 %v201_v31, %v196_v30  ;;  %v11177_v36 = vpack.i.bf16 %v201_v31, %v196_v30 }
  0xed   :  { %v205_v37 = vpop.f32.mrb[4].mxu0  ;;  %v293_v38 = vpop.f32.mrb[4].mxu1 }
  0xee   :  { %10718 = vrot.lane.b32.xlu1 %v11177_v36, %s12952_s21  ;;  %10582 = vmatpush3.bf16.xpose.msk.msra.mxu1 %vm11173_vm4, %v10580_v35  ;;  %v11183_v39 = vadd.f32 %v8899_v27, %v205_v37  ;;  %v9682_v40 = vpop.f32.mrb[5].mxu0  ;;  %v9693_v41 = vpop.f32.mrb[5].mxu1  ;;  %v294_v46 = vadd.f32 %v8903_v42, %v293_v38 }
  0xef   :  { %9709 = vmatprep.subr.mxu1 %v10968_v2 }
  0xf0   :  { %799 = vrot.lane.b32.xlu0 %v11183_v39, %s12952_s21 }
  0xf6   :  { %9710 = vmatpush3.xpose.msk.msra.mxu1 %vm385_vm3, %v11183_v39 }
  0xf7   :  { %9735 = vmatprep.subr.mxu1 %v10968_v2 }
  0xf9   :  { %9712 = vmatmul.mubr.msk.f32.vlgmr.msra.gmra.mrb[6].mxu1 %vm385_vm3, %v284_v43 }
  0xfa   :  { %9714 = vmatprep.mubr.msk.f32.mxu1 %vm10969_vm1, %v10968_v2  ;;  %9736 = vmatpush3.msra.mxu1 %v8921_v44 }
  0xfb   :  { %10586 = vmatprep.subr.bf16.mxu1 %v10971_v22 }
  0xfd   :  { %9715 = vmatmul.mubr.msk.f32.gmra.mrb[8].mxu1 %vm385_vm3, %v289_v45  ;;  %v371_v45 = vpop.f32.mrb[6].mxu0 }
  0xfe   :  { %9717 = vmatprep.mubr.msk.f32.mxu1 %vm10969_vm1, %v10968_v2 }
 0x101   :  { %9718 = vmatmul.mubr.msk.f32.gmra.mrb[10].mxu1 %vm385_vm3, %v294_v46  ;;  %v9698_v46 = vpop.f32.mrb[7].mxu0 }
 0x102   :  { %9737 = vmatprep.mubr.msk.f32.mxu1 %vm10969_vm1, %v10968_v2 }
 0x105   :  { %9738 = vmatmul.mubr.msk.f32.vlgmr.msra.gmra.mrb[12].mxu1 %vm119_vm2, %v11126_v14 }
 0x106   :  { %9740 = vmatprep.mubr.msk.f32.mxu1 %vm10969_vm1, %v10968_v2 }
 0x109   :  { %9741 = vmatmul.mubr.msk.f32.gmra.mrb[14].mxu1 %vm119_vm2, %v11132_v17 }
 0x10a   :  { %9743 = vmatprep.mubr.msk.f32.mxu1 %vm10969_vm1, %v10968_v2 }
 0x10d   :  { %9744 = vmatmul.mubr.msk.f32.gmra.mrb[16].mxu1 %vm119_vm2, %v11151_v21 }
 0x10e   :  { %9763 = vmatprep.mubr.msk.f32.mxu1 %vm10969_vm1, %v10968_v2 }
 0x160   :  { %v10719_v49 = vpop.permute.xlu1 %10718 }
 0x161   :  { %v10721_v50 = vunpack.i.h.bf16 %v10719_v49  ;;  %v10720_v51 = vunpack.i.l.bf16 %v10719_v49  ;;  %v8907_v49 = vld [vmem:[%s12933_s10] ss:$0 sm:$0xff] }
 0x162   :  { %v800_v55 = vpop.permute.xlu0 %799 }
 0x163   :  { %v10587_v52 = vpack.c.bf16 %v10721_v50, %v10720_v51  ;;  %v376_v50 = vpop.f32.mrb[8].mxu0  ;;  %v372_v51 = vadd.f32 %v8907_v49, %v371_v45 }
 0x164   :  { %v9701_v53 = vpop.f32.mrb[9].mxu0 }
 0x165   :  { %10589 = vmatpush3.bf16.xpose.msk.msra.mxu1 %vm11173_vm4, %v10587_v52  ;;  %v377_v52 = vadd.f32 %v8907_v49, %v376_v50  ;;  %v381_v56 = vpop.f32.mrb[10].mxu0 }
 0x166   :  { %9761 = vmatprep.subr.mxu1 %v10968_v2 }
 0x16d   :  { %9762 = vmatpush3.xpose.msk.msra.mxu1 %vm385_vm3, %v800_v55  ;;  %v10584_v55 = vpack.c.bf16 %v377_v52, %v372_v51 }
 0x16e   :  { %9787 = vmatprep.subr.mxu1 %v10968_v2 }
 0x16f   :  { %10585 = vmatpush3.bf16.msra.mxu0 %v10584_v55 }
 0x170   :  { %9724 = vmatprep.subr.mxu0 %v10968_v2 }
 0x1cc   :  { %v470_v58 = vpop.f32.mrb[6].mxu1 }
 0x1cd   :  { %v484_v59 = vsel %vm11250_vm5, %v470_v58, -1e+30  ;;  %v9713_v60 = vpop.f32.mrb[7].mxu1  ;;  %v382_v58 = vadd.f32 %v8907_v49, %v381_v56 }
 0x1ce   :  { %v488_v61 = vsel %vm487_vm6, %v484_v59, -inf }
 0x1cf   :  { %489 = vmax.xlane.f32.xlu1 %v488_v61  ;;  %9725 = vmatpush3.msk.msra.mxu0 %vm531_vm10, %v382_v58 }
 0x1d0   :  { %v475_v63 = vpop.f32.mrb[8].mxu1  ;;  %9746 = vmatprep.subr.mxu0 %v10968_v2 }
 0x1d1   :  { %v485_v0 = vsel %vm11258_vm7, %v475_v63, -1e+30  ;;  %v9716_v1 = vpop.f32.mrb[9].mxu1 }
 0x1d2   :  { %v491_v5 = vsel %vm487_vm6, %v485_v0, -inf }
 0x1d3   :  { %492 = vmax.xlane.f32.xlu0 %v491_v5 }
 0x1d4   :  { %v480_v6 = vpop.f32.mrb[10].mxu1 }
 0x1d5   :  { %v486_v8 = vsel %vm11265_vm8, %v480_v6, -1e+30  ;;  %v9719_v9 = vpop.f32.mrb[11].mxu1 }
 0x1d6   :  { %v495_v10 = vsel %vm12957_vm9, %v486_v8, -inf }
 0x1d7   :  { %496 = vmax.xlane.f32.xlu0 %v495_v10 }
 0x1d8   :  { %v691_v13 = vpop.f32.mrb[12].mxu1 }
 0x1d9   :  { %v692_v15 = vadd.f32 %v8923_v12, %v691_v13  ;;  %v9739_v16 = vpop.f32.mrb[13].mxu1 }
 0x1db   :  { %9764 = vmatmul.mubr.msk.f32.vlgmr.msra.gmra.mrb[18].mxu1 %vm385_vm3, %v692_v15 }
 0x1dc   :  { %v696_v19 = vpop.f32.mrb[14].mxu1  ;;  %9766 = vmatprep.mubr.msk.f32.mxu1 %vm10969_vm1, %v10968_v2  ;;  %9788 = vmatpush3.msra.mxu1 %v8943_v18 }
 0x1dd   :  { %v697_v20 = vadd.f32 %v8923_v12, %v696_v19  ;;  %v9742_v23 = vpop.f32.mrb[15].mxu1  ;;  %10593 = vmatprep.subr.bf16.mxu1 %v10971_v22 }
 0x1df   :  { %9767 = vmatmul.mubr.msk.f32.gmra.mrb[20].mxu1 %vm385_vm3, %v697_v20 }
 0x1e0   :  { %v701_v24 = vpop.f32.mrb[16].mxu1  ;;  %9769 = vmatprep.mubr.msk.f32.mxu1 %vm10969_vm1, %v10968_v2 }
 0x1e1   :  { %v702_v25 = vadd.f32 %v8923_v12, %v701_v24  ;;  %v9745_v26 = vpop.f32.mrb[17].mxu1 }
 0x1e3   :  { %9770 = vmatmul.mubr.msk.f32.gmra.mrb[22].mxu1 %vm385_vm3, %v702_v25 }
 0x1e4   :  { %9789 = vmatprep.mubr.msk.f32.mxu1 %vm10969_vm1, %v10968_v2 }
 0x1e7   :  { %9790 = vmatmul.mubr.msk.f32.vlgmr.msra.gmra.mrb[24].mxu1 %vm119_vm2, %v11126_v14 }
 0x1e8   :  { %9792 = vmatprep.mubr.msk.f32.mxu1 %vm10969_vm1, %v10968_v2 }
 0x1eb   :  { %9793 = vmatmul.mubr.msk.f32.gmra.mrb[26].mxu1 %vm119_vm2, %v11132_v17 }
 0x1ec   :  { %9795 = vmatprep.mubr.msk.f32.mxu1 %vm10969_vm1, %v10968_v2 }
 0x1ef   :  { %9796 = vmatmul.mubr.msk.f32.gmra.mrb[28].mxu1 %vm119_vm2, %v11151_v21 }
 0x1f0   :  { %9815 = vmatprep.mubr.msk.f32.mxu1 %vm10969_vm1, %v10968_v2 }
 0x25c   :  { %v490_v27 = vpop.xlane.xlu1 %489 }
 0x25d   :  { %v498_v28 = vsub.f32 %v484_v59, %v490_v27  ;;  %v9704_v59 = vpop.f32.mrb[11].mxu0 }
 0x25f   :  { %v501_v29 = vmul.f32 1.442695, %v498_v28 }
 0x260   :  { %v493_v30 = vpop.xlane.xlu0 %492 }
 0x261   :  { %10777 = vpow2.f32 %v501_v29  ;;  %v499_v31 = vsub.f32 %v485_v0, %v493_v30 }
 0x263   :  { %v503_v32 = vmul.f32 1.442695, %v499_v31 }
 0x264   :  { %v497_v33 = vpop.xlane.xlu0 %496 }
 0x265   :  { %10779 = vpow2.f32 %v503_v32  ;;  %v500_v35 = vsub.f32 %v486_v8, %v497_v33  ;;  %v8927_v33 = vld [vmem:[%s12932_s9 + $0x8] sm:$0xff] }
 0x267   :  { %v505_v37 = vmul.f32 1.442695, %v500_v35 }
 0x269   :  { %10781 = vpow2.f32 %v505_v37 }
 0x26b   :  { %v10778_v38 = vpop.eup %10777 }
 0x26c   :  { %v507_v40 = vsel %vm487_vm6, %v10778_v38, 0.0 }
 0x26d   :  { %508 = vadd.xlane.f32.xlu1 %v507_v40 }
 0x26f   :  { %v11302_v41 = vpop.eup %10779 }
 0x270   :  { %v510_v42 = vsel %vm487_vm6, %v11302_v41, 0.0 }
 0x271   :  { %511 = vadd.xlane.f32.xlu0 %v510_v42 }
 0x273   :  { %v11306_v43 = vpop.eup %10781 }
 0x274   :  { %v513_v44 = vsel %vm12957_vm9, %v11306_v43, 0.0 }
 0x275   :  { %514 = vadd.xlane.f32.xlu1 %v513_v44 }
 0x286   :  { %1208 = vrot.lane.b32.xlu1 %v11183_v39, %s12950_s24 }
 0x287   :  { %10723 = vrot.lane.b32.xlu0 %v11177_v36, %s12950_s24  ;;  %s12976_s24 = smov 126  }
 0x2ae   :  { %v882_v60 = vpop.f32.mrb[18].mxu1 }
 0x2af   :  { %v11322_v61 = vsel %vm11250_vm5, %v882_v60, -1e+30  ;;  %v9765_v63 = vpop.f32.mrb[19].mxu1 }
 0x2b0   :  { %v899_v0 = vsel %vm487_vm6, %v11322_v61, -inf }
 0x2b1   :  { %900 = vmax.xlane.f32.xlu1 %v899_v0 }
 0x2b2   :  { %v887_v1 = vpop.f32.mrb[20].mxu1 }
 0x2b3   :  { %v11328_v5 = vsel %vm11258_vm7, %v887_v1, -1e+30  ;;  %v9768_v6 = vpop.f32.mrb[21].mxu1 }
 0x2b4   :  { %v902_v8 = vsel %vm487_vm6, %v11328_v5, -inf }
 0x2b5   :  { %903 = vmax.xlane.f32.xlu0 %v902_v8 }
 0x2b6   :  { %v892_v9 = vpop.f32.mrb[22].mxu1 }
 0x2b7   :  { %v11334_v10 = vsel %vm11265_vm8, %v892_v9, -1e+30  ;;  %v9771_v12 = vpop.f32.mrb[23].mxu1 }
 0x2b8   :  { %v905_v13 = vsel %vm12957_vm9, %v11334_v10, -inf }
 0x2b9   :  { %906 = vmax.xlane.f32.xlu0 %v905_v13 }
 0x2ba   :  { %v1100_v15 = vpop.f32.mrb[24].mxu1 }
 0x2bb   :  { %v9791_v16 = vpop.f32.mrb[25].mxu1 }
 0x2be   :  { %v1105_v18 = vpop.f32.mrb[26].mxu1 }
 0x2bf   :  { %v9794_v19 = vpop.f32.mrb[27].mxu1 }
 0x2c2   :  { %v1110_v20 = vpop.f32.mrb[28].mxu1 }
 0x2c3   :  { %v9797_v23 = vpop.f32.mrb[29].mxu1 }
 0x2fa   :  { %v509_v24 = vpop.xlane.xlu1 %508 }
 0x2fb   :  { %10783 = vrcp.f32 %v509_v24 }
 0x2fe   :  { %v512_v25 = vpop.xlane.xlu0 %511 }
 0x2ff   :  { %10785 = vrcp.f32 %v512_v25 }
 0x302   :  { %v515_v26 = vpop.xlane.xlu1 %514  ;;  %v10724_v27 = vpop.permute.xlu0 %10723 }
 0x303   :  { %10787 = vrcp.f32 %v515_v26  ;;  %v10726_v28 = vunpack.i.h.bf16 %v10724_v27  ;;  %v10725_v29 = vunpack.i.l.bf16 %v10724_v27  ;;  %v8929_v26 = vld [vmem:[%s12933_s10 + $0x1] ss:$0 sm:$0xff] }
 0x305   :  { %v10784_v30 = vpop.eup %10783  ;;  %v10594_v31 = vpack.c.bf16 %v10726_v28, %v10725_v29 }
 0x306   :  { %v519_v32 = vmul.f32 %v10784_v30, %v10778_v38  ;;  %v8945_v38 = vld [vmem:[%s12929_s6 + $0x2] ss:$0 sm:$0xff]  ;;  %v1209_v42 = vpop.permute.xlu1 %1208 }
 0x307   :  { %10596 = vmatpush3.bf16.xpose.msk.msra.mxu1 %vm11173_vm4, %v10594_v31  ;;  %v1101_v44 = vadd.f32 %v8945_v38, %v1100_v15  ;;  %v1106_v46 = vadd.f32 %v8945_v38, %v1105_v18 }
 0x308   :  { %9727 = vmatmul.mubr.msk.f32.vlgmr.msra.gmra.mrb[12].mxu0 %vm487_vm6, %v519_v32  ;;  %9813 = vmatprep.subr.mxu1 %v10968_v2 }
 0x309   :  { %v10786_v35 = vpop.eup %10785  ;;  %9729 = vmatprep.mubr.msk.f32.mxu0 %vm10969_vm1, %v10968_v2  ;;  %9747 = vmatpush3.msra.mxu0 %v8927_v33 }
 0x30a   :  { %v520_v37 = vmul.f32 %v10786_v35, %v11302_v41  ;;  %10590 = vmatprep.subr.bf16.mxu0 %v10971_v22  ;;  %v8965_v41 = vld [vmem:[%s12928_s5 + $0x18] sm:$0xff] }
 0x30c   :  { %9730 = vmatmul.mubr.msk.f32.gmra.mrb[14].mxu0 %vm487_vm6, %v520_v37 }
 0x30d   :  { %v10788_v40 = vpop.eup %10787  ;;  %9732 = vmatprep.mubr.msk.f32.mxu0 %vm10969_vm1, %v10968_v2 }
 0x30e   :  { %v521_v45 = vmul.f32 %v10788_v40, %v11306_v43  ;;  %v1111_v43 = vadd.f32 %v8945_v38, %v1110_v20 }
 0x30f   :  { %9814 = vmatpush3.xpose.msk.msra.mxu1 %vm385_vm3, %v1209_v42 }
 0x310   :  { %9733 = vmatmul.mubr.msk.f32.gmra.mrb[16].mxu0 %vm487_vm6, %v521_v45  ;;  %9839 = vmatprep.subr.mxu1 %v10968_v2 }
 0x311   :  { %9748 = vmatprep.mubr.msk.f32.mxu0 %vm10969_vm1, %v10968_v2 }
 0x312   :  { %9816 = vmatmul.mubr.msk.f32.vlgmr.msra.gmra.mrb[30].mxu1 %vm385_vm3, %v1101_v44 }
 0x313   :  { %9818 = vmatprep.mubr.msk.f32.mxu1 %vm10969_vm1, %v10968_v2  ;;  %9840 = vmatpush3.msra.mxu1 %v8965_v41 }
 0x314   :  { %9749 = vmatmul.mubr.msk.f32.vlgmr.msra.gmra.mrb[18].mxu0 %vm119_vm2, %v11126_v14  ;;  %10600 = vmatprep.subr.bf16.mxu1 %v10971_v22 }
 0x315   :  { %9751 = vmatprep.mubr.msk.f32.mxu0 %vm10969_vm1, %v10968_v2 }
 0x316   :  { %9819 = vmatmul.mubr.msk.f32.gmra.mrb[32].mxu1 %vm385_vm3, %v1106_v46 }
 0x317   :  { %9821 = vmatprep.mubr.msk.f32.mxu1 %vm10969_vm1, %v10968_v2 }
 0x318   :  { %9752 = vmatmul.mubr.msk.f32.gmra.mrb[20].mxu0 %vm119_vm2, %v11132_v17 }
 0x319   :  { %9754 = vmatprep.mubr.msk.f32.mxu0 %vm10969_vm1, %v10968_v2 }
 0x31a   :  { %9822 = vmatmul.mubr.msk.f32.gmra.mrb[34].mxu1 %vm385_vm3, %v1111_v43 }
 0x31b   :  { %9841 = vmatprep.mubr.msk.f32.mxu1 %vm10969_vm1, %v10968_v2 }
 0x31c   :  { %9755 = vmatmul.mubr.msk.f32.gmra.mrb[22].mxu0 %vm119_vm2, %v11151_v21 }
 0x31d   :  { %9778 = vmatprep.mubr.msk.f32.mxu0 %vm10969_vm1, %v10968_v2 }
 0x31e   :  { %9842 = vmatmul.mubr.msk.f32.vlgmr.msra.gmra.mrb[36].mxu1 %vm119_vm2, %v11126_v14 }
 0x31f   :  { %9844 = vmatprep.mubr.msk.f32.mxu1 %vm10969_vm1, %v10968_v2 }
 0x322   :  { %9845 = vmatmul.mubr.msk.f32.gmra.mrb[38].mxu1 %vm119_vm2, %v11132_v17 }
 0x323   :  { %9847 = vmatprep.mubr.msk.f32.mxu1 %vm10969_vm1, %v10968_v2 }
 0x326   :  { %9848 = vmatmul.mubr.msk.f32.gmra.mrb[40].mxu1 %vm119_vm2, %v11151_v21 }
 0x327   :  { %9867 = vmatprep.mubr.msk.f32.mxu1 %vm10969_vm1, %v10968_v2 }
 0x33e   :  { %v901_v49 = vpop.xlane.xlu1 %900 }
 0x33f   :  { %v908_v50 = vsub.f32 %v11322_v61, %v901_v49  ;;  %v8967_v49 = vld [vmem:[%s12929_s6 + $0x3] ss:$0 sm:$0xff] }
 0x341   :  { %v911_v51 = vmul.f32 1.442695, %v908_v50 }
 0x342   :  { %v904_v52 = vpop.xlane.xlu0 %903 }
 0x343   :  { %10789 = vpow2.f32 %v911_v51  ;;  %v909_v53 = vsub.f32 %v11328_v5, %v904_v52 }
 0x345   :  { %v913_v55 = vmul.f32 1.442695, %v909_v53 }
 0x346   :  { %v907_v56 = vpop.xlane.xlu0 %906 }
 0x347   :  { %10791 = vpow2.f32 %v913_v55  ;;  %v910_v58 = vsub.f32 %v11334_v10, %v907_v56 }
 0x349   :  { %v915_v59 = vmul.f32 1.442695, %v910_v58 }
 0x34b   :  { %10793 = vpow2.f32 %v915_v59 }
 0x34d   :  { %v11401_v60 = vpop.eup %10789 }
 0x34e   :  { %v917_v63 = vsel %vm487_vm6, %v11401_v60, 0.0 }
 0x34f   :  { %918 = vadd.xlane.f32.xlu1 %v917_v63 }
 0x351   :  { %v11405_v0 = vpop.eup %10791 }
 0x352   :  { %v920_v61 = vsel %vm487_vm6, %v11405_v0, 0.0 }
 0x353   :  { %921 = vadd.xlane.f32.xlu0 %v920_v61  ;;  %v8949_v61 = vld [vmem:[%s12932_s9 + $0x10] sm:$0xff] }
 0x355   :  { %v11409_v1 = vpop.eup %10793 }
 0x356   :  { %v923_v5 = vsel %vm12957_vm9, %v11409_v1, 0.0 }
 0x357   :  { %924 = vadd.xlane.f32.xlu1 %v923_v5 }
 0x368   :  { %1617 = vrot.lane.b32.xlu1 %v11183_v39, %s12948_s0 }
 0x369   :  { %10728 = vrot.lane.b32.xlu0 %v11177_v36, %s12948_s0  ;;  %s12979_s0 = smov 124  }
 0x3db   :  { %v11417_v6 = vpop.f32.mrb[12].mxu0 }
 0x3dc   :  { %v9728_v8 = vpop.f32.mrb[13].mxu0  ;;  %v919_v13 = vpop.xlane.xlu1 %918 }
 0x3dd   :  { %10795 = vrcp.f32 %v919_v13 }
 0x3df   :  { %v11419_v9 = vpop.f32.mrb[14].mxu0 }
 0x3e0   :  { %v922_v10 = vpop.xlane.xlu0 %921  ;;  %v9731_v12 = vpop.f32.mrb[15].mxu0 }
 0x3e1   :  { %10797 = vrcp.f32 %v922_v10 }
 0x3e3   :  { %v11421_v15 = vpop.f32.mrb[16].mxu0 }
 0x3e4   :  { %v10729_v16 = vpop.permute.xlu0 %10728  ;;  %v9734_v20 = vpop.f32.mrb[17].mxu0 }
 0x3e5   :  { %v10731_v18 = vunpack.i.h.bf16 %v10729_v16  ;;  %v10730_v19 = vunpack.i.l.bf16 %v10729_v16  ;;  %v1291_v23 = vpop.f32.mrb[30].mxu1  ;;  %v925_v30 = vpop.xlane.xlu1 %924 }
 0x3e6   :  { %v11425_v39 = vsel %vm11250_vm5, %v1291_v23, -1e+30  ;;  %v9817_v36 = vpop.f32.mrb[31].mxu1  ;;  %10799 = vrcp.f32 %v925_v30 }
 0x3e7   :  { %v10601_v24 = vpack.c.bf16 %v10731_v18, %v10730_v19  ;;  %v1308_v25 = vsel %vm487_vm6, %v11425_v39, -inf  ;;  %v781_v27 = vpop.f32.mrb[18].mxu0  ;;  %v10796_v50 = vpop.eup %10795 }
 0x3e8   :  { %1309 = vmax.xlane.f32.xlu1 %v1308_v25  ;;  %v9750_v28 = vpop.f32.mrb[19].mxu0  ;;  %v782_v31 = vadd.f32 %v8929_v26, %v781_v27  ;;  %v929_v59 = vmul.f32 %v10796_v50, %v11401_v60 }
 0x3e9   :  { %v1296_v29 = vpop.f32.mrb[32].mxu1  ;;  %10603 = vmatpush3.bf16.xpose.msk.msra.mxu1 %vm11173_vm4, %v10601_v24  ;;  %v1618_v51 = vpop.permute.xlu1 %1617 }
 0x3ea   :  { %v11436_v32 = vsel %vm11258_vm7, %v1296_v29, -1e+30  ;;  %v9820_v33 = vpop.f32.mrb[33].mxu1  ;;  %9865 = vmatprep.subr.mxu1 %v10968_v2 }
 0x3eb   :  { %v786_v35 = vpop.f32.mrb[20].mxu0  ;;  %v1311_v37 = vsel %vm487_vm6, %v11436_v32, -inf  ;;  %v10798_v63 = vpop.eup %10797 }
 0x3ec   :  { %v787_v38 = vadd.f32 %v8929_v26, %v786_v35  ;;  %1312 = vmax.xlane.f32.xlu0 %v1311_v37  ;;  %v9753_v40 = vpop.f32.mrb[21].mxu0  ;;  %v930_v10 = vmul.f32 %v10798_v63, %v11405_v0 }
 0x3ed   :  { %v1301_v42 = vpop.f32.mrb[34].mxu1 }
 0x3ee   :  { %v10591_v44 = vpack.c.bf16 %v787_v38, %v782_v31  ;;  %v1307_v45 = vsel %vm11265_vm8, %v1301_v42, -1e+30  ;;  %v9823_v41 = vpop.f32.mrb[35].mxu1 }
 0x3ef   :  { %v1314_v46 = vsel %vm12957_vm9, %v1307_v45, -inf  ;;  %v791_v43 = vpop.f32.mrb[22].mxu0 }
 0x3f0   :  { %1315 = vmax.xlane.f32.xlu0 %v1314_v46  ;;  %10592 = vmatpush3.bf16.msra.mxu0 %v10591_v44  ;;  %v792_v52 = vadd.f32 %v8929_v26, %v791_v43  ;;  %v9756_v53 = vpop.f32.mrb[23].mxu0  ;;  %v10800_v12 = vpop.eup %10799 }
 0x3f1   :  { %v1509_v55 = vpop.f32.mrb[36].mxu1  ;;  %9866 = vmatpush3.xpose.msk.msra.mxu1 %vm385_vm3, %v1618_v51  ;;  %9776 = vmatprep.subr.mxu0 %v10968_v2  ;;  %v931_v19 = vmul.f32 %v10800_v12, %v11409_v1 }
 0x3f2   :  { %v1510_v56 = vadd.f32 %v8967_v49, %v1509_v55  ;;  %v9843_v58 = vpop.f32.mrb[37].mxu1  ;;  %9891 = vmatprep.subr.mxu1 %v10968_v2 }
 0x3f3   :  { %v8951_v58 = vld [vmem:[%s12933_s10 + $0x2] ss:$0 sm:$0xff] }
 0x3f4   :  { %9777 = vmatpush3.msk.msra.mxu0 %vm531_vm10, %v792_v52  ;;  %9868 = vmatmul.mubr.msk.f32.vlgmr.msra.gmra.mrb[42].mxu1 %vm385_vm3, %v1510_v56 }
 0x3f5   :  { %9779 = vmatmul.mubr.msk.f32.vlgmr.msra.gmra.mrb[24].mxu0 %vm487_vm6, %v929_v59  ;;  %v1514_v5 = vpop.f32.mrb[38].mxu1  ;;  %9870 = vmatprep.mubr.msk.f32.mxu1 %vm10969_vm1, %v10968_v2 }
 0x3f6   :  { %v1515_v8 = vadd.f32 %v8967_v49, %v1514_v5  ;;  %9781 = vmatprep.mubr.msk.f32.mxu0 %vm10969_vm1, %v10968_v2  ;;  %v9846_v60 = vpop.f32.mrb[39].mxu1  ;;  %9798 = vmatprep.subr.mxu0 %v10968_v2 }
 0x3f7   :  { %9799 = vmatpush3.msra.mxu0 %v8949_v61 }
 0x3f8   :  { %9871 = vmatmul.mubr.msk.f32.gmra.mrb[44].mxu1 %vm385_vm3, %v1515_v8  ;;  %10597 = vmatprep.subr.bf16.mxu0 %v10971_v22 }
 0x3f9   :  { %9782 = vmatmul.mubr.msk.f32.gmra.mrb[26].mxu0 %vm487_vm6, %v930_v10  ;;  %v1519_v13 = vpop.f32.mrb[40].mxu1  ;;  %9873 = vmatprep.mubr.msk.f32.mxu1 %vm10969_vm1, %v10968_v2 }
 0x3fa   :  { %v1520_v16 = vadd.f32 %v8967_v49, %v1519_v13  ;;  %9784 = vmatprep.mubr.msk.f32.mxu0 %vm10969_vm1, %v10968_v2  ;;  %v9849_v18 = vpop.f32.mrb[41].mxu1 }
 0x3fc   :  { %9874 = vmatmul.mubr.msk.f32.gmra.mrb[46].mxu1 %vm385_vm3, %v1520_v16 }
 0x3fd   :  { %9785 = vmatmul.mubr.msk.f32.gmra.mrb[28].mxu0 %vm487_vm6, %v931_v19  ;;  %9893 = vmatprep.mubr.msk.f32.mxu1 %vm10969_vm1, %v10968_v2 }
 0x3fe   :  { %9800 = vmatprep.mubr.msk.f32.mxu0 %vm10969_vm1, %v10968_v2 }
 0x401   :  { %9801 = vmatmul.mubr.msk.f32.vlgmr.msra.gmra.mrb[30].mxu0 %vm119_vm2, %v11126_v14 }
 0x402   :  { %9803 = vmatprep.mubr.msk.f32.mxu0 %vm10969_vm1, %v10968_v2 }
 0x405   :  { %9804 = vmatmul.mubr.msk.f32.gmra.mrb[32].mxu0 %vm119_vm2, %v11132_v17 }
 0x406   :  { %9806 = vmatprep.mubr.msk.f32.mxu0 %vm10969_vm1, %v10968_v2 }
 0x409   :  { %9807 = vmatmul.mubr.msk.f32.gmra.mrb[34].mxu0 %vm119_vm2, %v11151_v21 }
 0x40a   :  { %9830 = vmatprep.mubr.msk.f32.mxu0 %vm10969_vm1, %v10968_v2 }
 0x475   :  { %v1310_v0 = vpop.xlane.xlu1 %1309 }
 0x476   :  { %v1317_v1 = vsub.f32 %v11425_v39, %v1310_v0 }
 0x478   :  { %v1320_v20 = vmul.f32 1.442695, %v1317_v1 }
 0x479   :  { %v1313_v23 = vpop.xlane.xlu0 %1312 }
 0x47a   :  { %10801 = vpow2.f32 %v1320_v20  ;;  %v1318_v36 = vsub.f32 %v11436_v32, %v1313_v23  ;;  %v8971_v23 = vld [vmem:[%s12932_s9 + $0x18] sm:$0xff] }
 0x47c   :  { %v1322_v24 = vmul.f32 1.442695, %v1318_v36 }
 0x47d   :  { %v1316_v25 = vpop.xlane.xlu0 %1315 }
 0x47e   :  { %10803 = vpow2.f32 %v1322_v24  ;;  %v1319_v26 = vsub.f32 %v1307_v45, %v1316_v25 }
 0x480   :  { %v1324_v27 = vmul.f32 1.442695, %v1319_v26 }
 0x482   :  { %10805 = vpow2.f32 %v1324_v27 }
 0x484   :  { %v10802_v28 = vpop.eup %10801 }
 0x485   :  { %v1326_v29 = vsel %vm487_vm6, %v10802_v28, 0.0 }
 0x486   :  { %1327 = vadd.xlane.f32.xlu1 %v1326_v29 }
 0x488   :  { %v10804_v30 = vpop.eup %10803 }
 0x489   :  { %v1329_v31 = vsel %vm487_vm6, %v10804_v30, 0.0 }
 0x48a   :  { %1330 = vadd.xlane.f32.xlu0 %v1329_v31 }
 0x48c   :  { %v10806_v39 = vpop.eup %10805 }
 0x48d   :  { %v1332_v33 = vsel %vm12957_vm9, %v10806_v39, 0.0 }
 0x48e   :  { %1333 = vadd.xlane.f32.xlu1 %v1332_v33 }
 0x4c7   :  { %v1700_v35 = vpop.f32.mrb[42].mxu1 }
 0x4c8   :  { %v11496_v32 = vsel %vm11250_vm5, %v1700_v35, -1e+30  ;;  %v11498_v37 = vpop.f32.mrb[24].mxu0  ;;  %v9869_v38 = vpop.f32.mrb[43].mxu1 }
 0x4c9   :  { %v9780_v40 = vpop.f32.mrb[25].mxu0  ;;  %v1717_v42 = vsel %vm487_vm6, %v11496_v32, -inf }
 0x4ca   :  { %1718 = vmax.xlane.f32.xlu0 %v1717_v42 }
 0x4cb   :  { %v1705_v44 = vpop.f32.mrb[44].mxu1 }
 0x4cc   :  { %v1715_v45 = vsel %vm11258_vm7, %v1705_v44, -1e+30  ;;  %v11504_v41 = vpop.f32.mrb[26].mxu0  ;;  %v9872_v46 = vpop.f32.mrb[45].mxu1 }
 0x4cd   :  { %v9783_v43 = vpop.f32.mrb[27].mxu0  ;;  %v1720_v49 = vsel %vm487_vm6, %v1715_v45, -inf }
 0x4ce   :  { %1721 = vmax.xlane.f32.xlu1 %v1720_v49 }
 0x4cf   :  { %v1710_v50 = vpop.f32.mrb[46].mxu1 }
 0x4d0   :  { %v1716_v51 = vsel %vm11265_vm8, %v1710_v50, -1e+30  ;;  %v11509_v52 = vpop.f32.mrb[28].mxu0  ;;  %v9875_v53 = vpop.f32.mrb[47].mxu1 }
 0x4d1   :  { %v9786_v55 = vpop.f32.mrb[29].mxu0  ;;  %v1723_v56 = vsel %vm12957_vm9, %v1716_v51, -inf }
 0x4d2   :  { %1724 = vmax.xlane.f32.xlu0 %v1723_v56 }
 0x4d4   :  { %v1190_v59 = vpop.f32.mrb[30].mxu0 }
 0x4d5   :  { %v9802_v63 = vpop.f32.mrb[31].mxu0  ;;  %v1191_v61 = vadd.f32 %v8951_v58, %v1190_v59 }
 0x4d8   :  { %v1195_v5 = vpop.f32.mrb[32].mxu0 }
 0x4d9   :  { %v1196_v8 = vadd.f32 %v8951_v58, %v1195_v5  ;;  %v9805_v60 = vpop.f32.mrb[33].mxu0 }
 0x4db   :  { %v10598_v10 = vpack.c.bf16 %v1196_v8, %v1191_v61 }
 0x4dc   :  { %v1200_v12 = vpop.f32.mrb[34].mxu0 }
 0x4dd   :  { %10599 = vmatpush3.bf16.msra.mxu0 %v10598_v10  ;;  %v1201_v13 = vadd.f32 %v8951_v58, %v1200_v12  ;;  %v9808_v16 = vpop.f32.mrb[35].mxu0 }
 0x4de   :  { %9828 = vmatprep.subr.mxu0 %v10968_v2 }
 0x4e1   :  { %9829 = vmatpush3.msk.msra.mxu0 %vm531_vm10, %v1201_v13 }
 0x4e2   :  { %9850 = vmatprep.subr.mxu0 %v10968_v2 }
 0x513   :  { %v1328_v18 = vpop.xlane.xlu1 %1327 }
 0x514   :  { %10807 = vrcp.f32 %v1328_v18 }
 0x517   :  { %v1331_v19 = vpop.xlane.xlu0 %1330 }
 0x518   :  { %10809 = vrcp.f32 %v1331_v19 }
 0x51b   :  { %v1334_v0 = vpop.xlane.xlu1 %1333 }
 0x51c   :  { %10811 = vrcp.f32 %v1334_v0 }
 0x51e   :  { %v10808_v1 = vpop.eup %10807 }
 0x51f   :  { %v1338_v20 = vmul.f32 %v10808_v1, %v10802_v28 }
 0x521   :  { %9831 = vmatmul.mubr.msk.f32.vlgmr.msra.gmra.mrb[36].mxu0 %vm487_vm6, %v1338_v20 }
 0x522   :  { %v10810_v36 = vpop.eup %10809  ;;  %9833 = vmatprep.mubr.msk.f32.mxu0 %vm10969_vm1, %v10968_v2  ;;  %9851 = vmatpush3.msra.mxu0 %v8971_v23 }
 0x523   :  { %v1339_v24 = vmul.f32 %v10810_v36, %v10804_v30  ;;  %10604 = vmatprep.subr.bf16.mxu0 %v10971_v22  ;;  %v1888_v36 = vld [vmem:[%s12934_s11] sm:$0xff] }
 0x524   :  { %9892 = vmatpush3.msra.mxu1 %v1888_v36 }
 0x525   :  { %9834 = vmatmul.mubr.msk.f32.gmra.mrb[38].mxu0 %vm487_vm6, %v1339_v24  ;;  %10607 = vmatprep.subr.bf16.mxu1 %v10971_v22 }
 0x526   :  { %v10812_v25 = vpop.eup %10811  ;;  %9836 = vmatprep.mubr.msk.f32.mxu0 %vm10969_vm1, %v10968_v2 }
 0x527   :  { %v1340_v26 = vmul.f32 %v10812_v25, %v10806_v39 }
 0x529   :  { %9837 = vmatmul.mubr.msk.f32.gmra.mrb[40].mxu0 %vm487_vm6, %v1340_v26 }
 0x52a   :  { %9852 = vmatprep.mubr.msk.f32.mxu0 %vm10969_vm1, %v10968_v2 }
 0x52d   :  { %9853 = vmatmul.mubr.msk.f32.vlgmr.msra.gmra.mrb[42].mxu0 %vm119_vm2, %v11126_v14 }
 0x52e   :  { %9855 = vmatprep.mubr.msk.f32.mxu0 %vm10969_vm1, %v10968_v2 }
 0x531   :  { %9856 = vmatmul.mubr.msk.f32.gmra.mrb[44].mxu0 %vm119_vm2, %v11132_v17 }
 0x532   :  { %9858 = vmatprep.mubr.msk.f32.mxu0 %vm10969_vm1, %v10968_v2 }
 0x535   :  { %9859 = vmatmul.mubr.msk.f32.gmra.mrb[46].mxu0 %vm119_vm2, %v11151_v21 }
 0x536   :  { %9882 = vmatprep.mubr.msk.f32.mxu0 %vm10969_vm1, %v10968_v2 }
 0x557   :  { %v1719_v27 = vpop.xlane.xlu0 %1718 }
 0x558   :  { %v1726_v28 = vsub.f32 %v11496_v32, %v1719_v27 }
 0x55a   :  { %v1729_v29 = vmul.f32 1.442695, %v1726_v28 }
 0x55b   :  { %v1722_v30 = vpop.xlane.xlu1 %1721 }
 0x55c   :  { %10813 = vpow2.f32 %v1729_v29  ;;  %v1727_v31 = vsub.f32 %v1715_v45, %v1722_v30 }
 0x55e   :  { %v1731_v39 = vmul.f32 1.442695, %v1727_v31 }
 0x55f   :  { %v1725_v33 = vpop.xlane.xlu0 %1724 }
 0x560   :  { %10815 = vpow2.f32 %v1731_v39  ;;  %v1728_v35 = vsub.f32 %v1716_v51, %v1725_v33 }
 0x562   :  { %v1733_v38 = vmul.f32 1.442695, %v1728_v35 }
 0x564   :  { %10817 = vpow2.f32 %v1733_v38 }
 0x566   :  { %v10814_v40 = vpop.eup %10813 }
 0x567   :  { %v1735_v42 = vsel %vm487_vm6, %v10814_v40, 0.0 }
 0x568   :  { %1736 = vadd.xlane.f32.xlu1 %v1735_v42 }
 0x56a   :  { %v10816_v44 = vpop.eup %10815 }
 0x56b   :  { %v1738_v46 = vsel %vm487_vm6, %v10816_v44, 0.0 }
 0x56c   :  { %1739 = vadd.xlane.f32.xlu0 %v1738_v46 }
 0x56e   :  { %v10818_v43 = vpop.eup %10817 }
 0x56f   :  { %v1741_v32 = vsel %vm12957_vm9, %v10818_v43, 0.0 }
 0x570   :  { %1742 = vadd.xlane.f32.xlu1 %v1741_v32 }
 0x582   :  { %1845 = vrot.lane.b32.xlu0 %v11498_v37, %s10975_s22  ;;  %v8973_v37 = vld [vmem:[%s12933_s10 + $0x3] ss:$0 sm:$0xff] }
 0x586   :  { %1847 = vrot.lane.b32.xlu0 %v11504_v41, %s10975_s22 }
 0x5f4   :  { %v1419_v45 = vpop.f32.mrb[36].mxu0 }
 0x5f5   :  { %1857 = vrot.lane.b32.xlu1 %v1419_v45, %s10976_s23  ;;  %v9832_v49 = vpop.f32.mrb[37].mxu0  ;;  %v1737_v53 = vpop.xlane.xlu1 %1736 }
 0x5f6   :  { %10819 = vrcp.f32 %v1737_v53  ;;  %v2085_v53 = vld [vmem:[%s12938_s15] sm:$0xff] }
 0x5f8   :  { %v1424_v50 = vpop.f32.mrb[38].mxu0 }
 0x5f9   :  { %1859 = vrot.lane.b32.xlu1 %v1424_v50, %s10976_s23  ;;  %v9835_v51 = vpop.f32.mrb[39].mxu0  ;;  %v1740_v58 = vpop.xlane.xlu0 %1739 }
 0x5fa   :  { %10821 = vrcp.f32 %v1740_v58  ;;  %v1988_v51 = vld [vmem:[%s12936_s13] sm:$0xff] }
 0x5fb   :  { %v8987_v58 = vld [vmem:[%s12935_s12] ss:$0 sm:$0xff] }
 0x5fc   :  { %v1429_v55 = vpop.f32.mrb[40].mxu0 }
 0x5fd   :  { %v9838_v56 = vpop.f32.mrb[41].mxu0  ;;  %v1743_v41 = vpop.xlane.xlu1 %1742 }
 0x5fe   :  { %10823 = vrcp.f32 %v1743_v41  ;;  %v1846_v31 = vpop.permute.xlu0 %1845 }
 0x5ff   :  { %v1878_v33 = vsel %vm385_vm3, %v11417_v6, %v1846_v31 }
 0x600   :  { %v1599_v59 = vpop.f32.mrb[42].mxu0  ;;  %v10820_v13 = vpop.eup %10819 }
 0x601   :  { %v9854_v63 = vpop.f32.mrb[43].mxu0  ;;  %v1600_v5 = vadd.f32 %v8973_v37, %v1599_v59  ;;  %v1747_v19 = vmul.f32 %v10820_v13, %v10814_v40 }
 0x602   :  { %v1848_v35 = vpop.permute.xlu0 %1847 }
 0x603   :  { %v1879_v42 = vsel %vm385_vm3, %v11419_v9, %v1848_v35 }
 0x604   :  { %v1604_v61 = vpop.f32.mrb[44].mxu0  ;;  %v10822_v0 = vpop.eup %10821 }
 0x605   :  { %v1605_v8 = vadd.f32 %v8973_v37, %v1604_v61  ;;  %v9857_v60 = vpop.f32.mrb[45].mxu0  ;;  %v1748_v1 = vmul.f32 %v10822_v0, %v10816_v44 }
 0x607   :  { %v10605_v10 = vpack.c.bf16 %v1605_v8, %v1600_v5 }
 0x608   :  { %v1609_v12 = vpop.f32.mrb[46].mxu0  ;;  %v10824_v20 = vpop.eup %10823 }
 0x609   :  { %v1610_v16 = vadd.f32 %v8973_v37, %v1609_v12  ;;  %10606 = vmatpush3.bf16.msra.mxu0 %v10605_v10  ;;  %v9860_v18 = vpop.f32.mrb[47].mxu0  ;;  %v1749_v23 = vmul.f32 %v10824_v20, %v10818_v43 }
 0x60a   :  { %9880 = vmatprep.subr.mxu0 %v10968_v2  ;;  %v8999_v18 = vld [vmem:[%s12932_s9 + $0x20] sm:$0xff] }
 0x60d   :  { %9881 = vmatpush3.msk.msra.mxu0 %vm531_vm10, %v1610_v16 }
 0x60e   :  { %9883 = vmatmul.mubr.msk.f32.vlgmr.msra.gmra.mrb[48].mxu0 %vm487_vm6, %v1747_v19  ;;  %9902 = vmatprep.subr.mxu0 %v10968_v2  ;;  %v8991_v19 = vld [vmem:[%s12937_s14] ss:$0 sm:$0xff] }
 0x60f   :  { %9885 = vmatprep.mubr.msk.f32.mxu0 %vm10969_vm1, %v10968_v2  ;;  %9903 = vmatpush3.msra.mxu0 %v1988_v51 }
 0x610   :  { %9926 = vmatprep.subr.mxu0 %v10968_v2 }
 0x612   :  { %9886 = vmatmul.mubr.msk.f32.gmra.mrb[50].mxu0 %vm487_vm6, %v1748_v1 }
 0x613   :  { %9888 = vmatprep.mubr.msk.f32.mxu0 %vm10969_vm1, %v10968_v2 }
 0x616   :  { %9889 = vmatmul.mubr.msk.f32.gmra.mrb[52].mxu0 %vm487_vm6, %v1749_v23  ;;  %v9003_v23 = vld [vmem:[%s12932_s9 + $0x28] sm:$0xff] }
 0x617   :  { %9904 = vmatprep.mubr.msk.f32.mxu0 %vm10969_vm1, %v10968_v2 }
 0x667   :  { %v1858_v30 = vpop.permute.xlu1 %1857 }
 0x668   :  { %v1881_v38 = vsel %vm103_vm0, %v1878_v33, %v1858_v30  ;;  %v9019_v30 = vld [vmem:[%s12930_s7 + $0x10] sm:$0xff]  ;;  %v9009_v33 = vld [vmem:[%s12933_s10 + $0x6] ss:$0 sm:$0xff] }
 0x66b   :  { %v1860_v39 = vpop.permute.xlu1 %1859 }
 0x66c   :  { %v1882_v44 = vsel %vm103_vm0, %v1879_v42, %v1860_v39 }
 0x6e1   :  { %v1828_v24 = vpop.f32.mrb[48].mxu0 }
 0x6e2   :  { %1869 = vrot.lane.b32.xlu1 %v1828_v24, %s10977_s29  ;;  %v9884_v25 = vpop.f32.mrb[49].mxu0 }
 0x6e5   :  { %v1833_v26 = vpop.f32.mrb[50].mxu0 }
 0x6e6   :  { %1849 = vrot.lane.b32.xlu1 %v11509_v52, %s10975_s22  ;;  %1871 = vrot.lane.b32.xlu0 %v1833_v26, %s10977_s29  ;;  %v9887_v27 = vpop.f32.mrb[51].mxu0 }
 0x6e9   :  { %v1838_v28 = vpop.f32.mrb[52].mxu0 }
 0x6ea   :  { %1861 = vrot.lane.b32.xlu0 %v1429_v55, %s10976_s23  ;;  %1873 = vrot.lane.b32.xlu1 %v1838_v28, %s10977_s29  ;;  %v9890_v29 = vpop.f32.mrb[53].mxu0  ;;  %v2086_v55 = vld [vmem:[%s12938_s15 + $0x8] sm:$0xff] }
 0x6eb   :  { %v10608_v56 = vpack.c.bf16 %v2086_v55, %v2085_v53  ;;  %v9011_v29 = vld [vmem:[%s12932_s9 + $0x38] sm:$0xff]  ;;  %v9005_v53 = vld [vmem:[%s12933_s10 + $0x5] ss:$0 sm:$0xff] }
 0x754   :  { %v1870_v52 = vpop.permute.xlu1 %1869 }
 0x755   :  { %v1885_v40 = vsel %vm12956_vm11, %v1881_v38, %v1870_v52 }
 0x756   :  { %9894 = vmatmul.mubr.msk.f32.vlgmr.msra.gmra.mrb[48].mxu1 %vm119_vm2, %v1885_v40  ;;  %v8995_v40 = vld [vmem:[%s12939_s16] ss:$0 sm:$0xff] }
 0x757   :  { %9896 = vmatprep.mubr.msk.f32.mxu1 %vm10969_vm1, %v10968_v2  ;;  %10609 = vmatpush3.bf16.msra.mxu1 %v10608_v56 }
 0x758   :  { %v1850_v46 = vpop.permute.xlu1 %1849  ;;  %v1872_v43 = vpop.permute.xlu0 %1871  ;;  %9931 = vmatprep.subr.mxu1 %v10968_v2 }
 0x759   :  { %v1886_v6 = vsel %vm12956_vm11, %v1882_v44, %v1872_v43  ;;  %v1880_v32 = vsel %vm385_vm3, %v11421_v15, %v1850_v46  ;;  %v69_v15 = vld [vmem:[%s12975_s27] sm:$0x3] }
 0x75a   :  { %9897 = vmatmul.mubr.msk.f32.gmra.mrb[50].mxu1 %vm119_vm2, %v1886_v6  ;;  %100 = vrot.lane.b32.xlu0 %v69_v15, %s10976_s23 }
 0x75b   :  { %9899 = vmatprep.mubr.msk.f32.mxu1 %vm10969_vm1, %v10968_v2 }
 0x75c   :  { %v1862_v45 = vpop.permute.xlu0 %1861  ;;  %v1874_v49 = vpop.permute.xlu1 %1873 }
 0x75d   :  { %v1883_v9 = vsel %vm103_vm0, %v1880_v32, %v1862_v45 }
 0x75e   :  { %v1887_v50 = vsel %vm12956_vm11, %v1883_v9, %v1874_v49  ;;  %v9015_v9 = vld [vmem:[%s12934_s11 + $0x8] sm:$0xff] }
 0x75f   :  { %9900 = vmatmul.mubr.msk.f32.gmra.mrb[52].mxu1 %vm119_vm2, %v1887_v50 }
 0x760   :  { %9917 = vmatprep.mubr.msk.f32.mxu1 %vm10969_vm1, %v10968_v2 }
 0x829   :  { %v1971_v59 = vpop.f32.mrb[48].mxu1 }
 0x82a   :  { %v1972_v63 = vadd.f32 %v8987_v58, %v1971_v59  ;;  %v9895_v37 = vpop.f32.mrb[49].mxu1 }
 0x82c   :  { %v11618_v41 = vadd.f32 %v1972_v63, %v11126_v14  ;;  %v9013_v63 = vld [vmem:[%s12933_s10 + $0x7] ss:$0 sm:$0xff] }
 0x82d   :  { %v1976_v61 = vpop.f32.mrb[50].mxu1 }
 0x82e   :  { %v1977_v5 = vadd.f32 %v8987_v58, %v1976_v61  ;;  %v9898_v8 = vpop.f32.mrb[51].mxu1  ;;  %9905 = vmatmul.mubr.msk.f32.vlgmr.msra.gmra.mrb[54].mxu0 %vm119_vm2, %v11618_v41 }
 0x82f   :  { %9907 = vmatprep.mubr.msk.f32.mxu0 %vm10969_vm1, %v10968_v2  ;;  %9927 = vmatpush3.msra.mxu0 %v8999_v18 }
 0x830   :  { %v11625_v60 = vadd.f32 %v1977_v5, %v11132_v17  ;;  %v101_v17 = vpop.permute.xlu0 %100  ;;  %9936 = vmatprep.subr.mxu0 %v10968_v2  ;;  %v9001_v5 = vld [vmem:[%s12933_s10 + $0x4] ss:$0 sm:$0xff] }
 0x831   :  { %v11639_v16 = vsel %vm103_vm0, %v69_v15, %v101_v17 }
 0x832   :  { %v1981_v10 = vpop.f32.mrb[52].mxu1  ;;  %9908 = vmatmul.mubr.msk.f32.gmra.mrb[56].mxu0 %vm119_vm2, %v11625_v60 }
 0x833   :  { %v1982_v12 = vadd.f32 %v8987_v58, %v1981_v10  ;;  %v9901_v13 = vpop.f32.mrb[53].mxu1  ;;  %9910 = vmatprep.mubr.msk.f32.mxu0 %vm10969_vm1, %v10968_v2 }
 0x835   :  { %v11632_v14 = vadd.f32 %v1982_v12, %v11151_v21  ;;  %v9007_v21 = vld [vmem:[%s12932_s9 + $0x30] sm:$0xff] }
 0x837   :  { %9911 = vmatmul.mubr.msk.f32.gmra.mrb[58].mxu0 %vm119_vm2, %v11632_v14 }
 0x838   :  { %9928 = vmatprep.mubr.msk.f32.mxu0 %vm10969_vm1, %v10968_v2 }
 0x83b   :  { %9929 = vmatmul.mubr.msk.f32.vlgmr.msra.gmra.mrb[60].mxu0 %vm119_vm2, %v11639_v16 }
 0x83c   :  { %9938 = vmatprep.mubr.msk.f32.mxu0 %vm10969_vm1, %v10968_v2  ;;  %9937 = vmatpush3.msra.mxu0 %v9007_v21 }
 0x83d   :  { %9946 = vmatprep.subr.mxu0 %v10968_v2 }
 0x83f   :  { %9939 = vmatmul.mubr.msk.f32.vlgmr.msra.gmra.mrb[62].mxu0 %vm119_vm2, %v11639_v16 }
 0x840   :  { %9948 = vmatprep.mubr.msk.f32.mxu0 %vm10969_vm1, %v10968_v2  ;;  %9947 = vmatpush3.msra.mxu0 %v9015_v9 }
 0x841   :  { %9962 = vmatprep.subr.mxu0 %v10968_v2 }
 0x901   :  { %v2071_v0 = vpop.f32.mrb[54].mxu0 }
 0x902   :  { %v2072_v1 = vadd.f32 %v8991_v19, %v2071_v0  ;;  %v9906_v20 = vpop.f32.mrb[55].mxu0 }
 0x904   :  { %9918 = vmatmul.mubr.msk.f32.vlgmr.msra.gmra.mrb[54].mxu1 %vm12955_vm12, %v2072_v1 }
 0x905   :  { %v2076_v36 = vpop.f32.mrb[56].mxu0  ;;  %9920 = vmatprep.mubr.msk.f32.mxu1 %vm10969_vm1, %v10968_v2  ;;  %9932 = vmatpush3.msra.mxu1 %v9003_v23 }
 0x906   :  { %v2077_v24 = vadd.f32 %v8991_v19, %v2076_v36  ;;  %v9909_v25 = vpop.f32.mrb[57].mxu0  ;;  %9941 = vmatprep.subr.mxu1 %v10968_v2  ;;  %v9025_v36 = vld [vmem:[%s12928_s5 + $0x40] sm:$0xff] }
 0x908   :  { %9921 = vmatmul.mubr.msk.f32.gmra.mrb[56].mxu1 %vm12955_vm12, %v2077_v24 }
 0x909   :  { %9923 = vmatprep.mubr.msk.f32.mxu1 %vm10969_vm1, %v10968_v2 }
 0x90a   :  { %v2081_v26 = vpop.f32.mrb[58].mxu0 }
 0x90b   :  { %v2082_v27 = vadd.f32 %v8991_v19, %v2081_v26  ;;  %v9912_v28 = vpop.f32.mrb[59].mxu0  ;;  %v9021_v19 = vld [vmem:[%s12931_s8 + $0x2] ss:$0 sm:$0xff] }
 0x90d   :  { %9924 = vmatmul.mubr.msk.f32.gmra.mrb[58].mxu1 %vm12955_vm12, %v2082_v27 }
 0x90e   :  { %9933 = vmatprep.mubr.msk.f32.mxu1 %vm10969_vm1, %v10968_v2  ;;  %v2266_v31 = vpop.f32.mrb[60].mxu0 }
 0x90f   :  { %v9930_v39 = vpop.f32.mrb[61].mxu0  ;;  %v2267_v8 = vadd.f32 %v9001_v5, %v2266_v31 }
 0x911   :  { %9934 = vmatmul.mubr.msk.f32.vlgmr.msra.gmra.mrb[60].mxu1 %vm119_vm2, %v11639_v16 }
 0x912   :  { %9942 = vmatpush3.msra.mxu1 %v9011_v29  ;;  %9943 = vmatprep.mubr.msk.f32.mxu1 %vm10969_vm1, %v10968_v2  ;;  %v2426_v35 = vpop.f32.mrb[62].mxu0  ;;  %v9017_v29 = vld [vmem:[%s12935_s12 + $0x1] ss:$0 sm:$0xff] }
 0x913   :  { %9951 = vmatprep.subr.mxu1 %v10968_v2  ;;  %v2427_v38 = vadd.f32 %v9009_v33, %v2426_v35  ;;  %v9940_v52 = vpop.f32.mrb[63].mxu0  ;;  %v9029_v35 = vld [vmem:[%s12932_s9 + $0x40] sm:$0xff] }
 0x915   :  { %9944 = vmatmul.mubr.msk.f32.vlgmr.msra.gmra.mrb[62].mxu1 %vm119_vm2, %v11639_v16  ;;  %2515 = vrot.lane.b32.xlu0 %v2427_v38, %s10976_s23  ;;  %v9041_v38 = vld [vmem:[%s12928_s5 + $0x48] sm:$0xff] }
 0x916   :  { %9953 = vmatprep.mubr.msk.f32.mxu1 %vm10969_vm1, %v10968_v2  ;;  %9952 = vmatpush3.msra.mxu1 %v9019_v30 }
 0x917   :  { %10610 = vmatprep.subr.bf16.mxu1 %v10971_v22 }
 0x987   :  { %v2516_v12 = vpop.permute.xlu0 %2515 }
 0x9d7   :  { %v2170_v42 = vpop.f32.mrb[54].mxu1 }
 0x9d8   :  { %v2171_v44 = vadd.f32 %v8995_v40, %v2170_v42  ;;  %v9919_v46 = vpop.f32.mrb[55].mxu1 }
 0x9da   :  { %v11697_v43 = vadd.f32 %v2171_v44, %v11618_v41 }
 0x9db   :  { %v2175_v6 = vpop.f32.mrb[56].mxu1 }
 0x9dc   :  { %v2176_v32 = vadd.f32 %v8995_v40, %v2175_v6  ;;  %v9922_v45 = vpop.f32.mrb[57].mxu1  ;;  %9954 = vmatmul.mubr.msk.f32.vlgmr.msra.gmra.mrb[64].mxu1 %vm119_vm2, %v11697_v43  ;;  %v9027_v6 = vld [vmem:[%s12929_s6 + $0x8] ss:$0 sm:$0xff] }
 0x9dd   :  { %9956 = vmatprep.mubr.msk.f32.mxu1 %vm10969_vm1, %v10968_v2 }
 0x9de   :  { %v11704_v49 = vadd.f32 %v2176_v32, %v11625_v60 }
 0x9e0   :  { %v2180_v50 = vpop.f32.mrb[58].mxu1  ;;  %9957 = vmatmul.mubr.msk.f32.gmra.mrb[66].mxu1 %vm119_vm2, %v11704_v49 }
 0x9e1   :  { %v2181_v51 = vadd.f32 %v8995_v40, %v2180_v50  ;;  %v9925_v15 = vpop.f32.mrb[59].mxu1  ;;  %9959 = vmatprep.mubr.msk.f32.mxu1 %vm10969_vm1, %v10968_v2 }
 0x9e2   :  { %v9031_v15 = vld [vmem:[%s12933_s10 + $0x8] ss:$0 sm:$0xff] }
 0x9e3   :  { %v11718_v55 = vadd.f32 %v2181_v51, %v11632_v14 }
 0x9e4   :  { %v2346_v56 = vpop.f32.mrb[60].mxu1 }
 0x9e5   :  { %v2347_v58 = vadd.f32 %v9005_v53, %v2346_v56  ;;  %v9935_v59 = vpop.f32.mrb[61].mxu1  ;;  %9960 = vmatmul.mubr.msk.f32.gmra.mrb[68].mxu1 %vm119_vm2, %v11718_v55 }
 0x9e6   :  { %9984 = vmatprep.mubr.msk.f32.mxu1 %vm10969_vm1, %v10968_v2 }
 0x9e7   :  { %2511 = vrot.lane.b32.xlu1 %v2347_v58, %s10975_s22 }
 0x9e8   :  { %v2506_v37 = vpop.f32.mrb[62].mxu1 }
 0x9e9   :  { %v2507_v41 = vadd.f32 %v9013_v63, %v2506_v37  ;;  %v9945_v61 = vpop.f32.mrb[63].mxu1 }
 0x9ea   :  { %v9043_v61 = vld [vmem:[%s12929_s6 + $0x9] ss:$0 sm:$0xff] }
 0x9eb   :  { %2519 = vrot.lane.b32.xlu1 %v2507_v41, %s10977_s29 }
 0xa59   :  { %v2512_v60 = vpop.permute.xlu1 %2511 }
 0xa5a   :  { %v2522_v10 = vsel %vm385_vm3, %v2267_v8, %v2512_v60 }
 0xa5b   :  { %v2523_v14 = vsel %vm103_vm0, %v2522_v10, %v2516_v12  ;;  %v9057_v12 = vld [vmem:[%s12928_s5 + $0x50] sm:$0xff] }
 0xa5d   :  { %v2520_v13 = vpop.permute.xlu1 %2519 }
 0xa5e   :  { %v2524_v17 = vsel %vm12956_vm11, %v2523_v14, %v2520_v13  ;;  %v93_v13 = vlaneseq }
 0xa5f   :  { %9949 = vmatmul.mubr.msk.f32.vlgmr.msra.gmra.mrb[64].mxu0 %vm119_vm2, %v2524_v17  ;;  %v10913_v17 = vld [vmem:[%s12968_s4] ss:$0 sm:$0xff]  ;;  %s12980_s4 = smov 122  }
 0xa60   :  { %9964 = vmatprep.mubr.msk.f32.mxu0 %vm10969_vm1, %v10968_v2  ;;  %9963 = vmatpush3.msra.mxu0 %v9025_v36  ;;  %v94_v14 = vshrl.u32 %v93_v13, 7 }
 0xa61   :  { %9967 = vmatprep.subr.mxu0 %v10968_v2 }
 0xa62   :  { %vm11828_vm13 = vcmp.eq.s32.totalorder %v94_v14, %v10913_v17 }
 0xaaf   :  { %v2694_v18 = vpop.f32.mrb[64].mxu1 }
 0xab0   :  { %v9955_v21 = vpop.f32.mrb[65].mxu1  ;;  %v2695_v1 = vadd.f32 %v9021_v19, %v2694_v18 }
 0xab3   :  { %v2699_v0 = vpop.f32.mrb[66].mxu1 }
 0xab4   :  { %v2700_v20 = vadd.f32 %v9021_v19, %v2699_v0  ;;  %v9958_v23 = vpop.f32.mrb[67].mxu1 }
 0xab6   :  { %v10611_v24 = vpack.c.bf16 %v2700_v20, %v2695_v1  ;;  %v11744_v25 = vpack.i.bf16 %v2700_v20, %v2695_v1 }
 0xab8   :  { %v2704_v26 = vpop.f32.mrb[68].mxu1  ;;  %10613 = vmatpush3.bf16.xpose.msk.msra.mxu1 %vm11173_vm4, %v10611_v24  ;;  %10733 = vrot.lane.b32.xlu0 %v11744_v25, %s12976_s24 }
 0xab9   :  { %v11751_v27 = vadd.f32 %v9021_v19, %v2704_v26  ;;  %v9961_v28 = vpop.f32.mrb[69].mxu1  ;;  %9982 = vmatprep.subr.mxu1 %v10968_v2 }
 0xabb   :  { %3226 = vrot.lane.b32.xlu1 %v11751_v27, %s12976_s24 }
 0xac0   :  { %9983 = vmatpush3.xpose.msk.msra.mxu1 %vm385_vm3, %v11751_v27 }
 0xac1   :  { %10614 = vmatprep.subr.bf16.mxu1 %v10971_v22 }
 0xb2a   :  { %v10734_v52 = vpop.permute.xlu0 %10733 }
 0xb2b   :  { %v10736_v40 = vunpack.i.h.bf16 %v10734_v52  ;;  %v10735_v42 = vunpack.i.l.bf16 %v10734_v52 }
 0xb2d   :  { %v10618_v44 = vpack.c.bf16 %v10736_v40, %v10735_v42  ;;  %v3227_v46 = vpop.permute.xlu1 %3226 }
 0xb32   :  { %v2604_v30 = vpop.f32.mrb[64].mxu0 }
 0xb33   :  { %v2605_v31 = vadd.f32 %v9017_v29, %v2604_v30  ;;  %v9950_v39 = vpop.f32.mrb[65].mxu0 }
 0xb35   :  { %v11763_v33 = vadd.f32 %v2605_v31, %v11639_v16 }
 0xb37   :  { %9965 = vmatmul.mubr.msk.f32.vlgmr.msra.gmra.mrb[66].mxu0 %vm119_vm2, %v11763_v33 }
 0xb38   :  { %9968 = vmatpush3.msra.mxu0 %v9029_v35  ;;  %9969 = vmatprep.mubr.msk.f32.mxu0 %vm10969_vm1, %v10968_v2 }
 0xb39   :  { %9996 = vmatprep.subr.mxu0 %v10968_v2 }
 0xb3b   :  { %9970 = vmatmul.mubr.msk.f32.vlgmr.msra.gmra.mrb[68].mxu0 %vm119_vm2, %v11697_v43 }
 0xb3c   :  { %9972 = vmatprep.mubr.msk.f32.mxu0 %vm10969_vm1, %v10968_v2  ;;  %9997 = vmatpush3.msra.mxu0 %v9041_v38 }
 0xb3d   :  { %10617 = vmatprep.subr.bf16.mxu0 %v10971_v22 }
 0xb3f   :  { %9973 = vmatmul.mubr.msk.f32.gmra.mrb[70].mxu0 %vm119_vm2, %v11704_v49 }
 0xb40   :  { %9975 = vmatprep.mubr.msk.f32.mxu0 %vm10969_vm1, %v10968_v2 }
 0xb43   :  { %9976 = vmatmul.mubr.msk.f32.gmra.mrb[72].mxu0 %vm119_vm2, %v11718_v55 }
 0xb44   :  { %9998 = vmatprep.mubr.msk.f32.mxu0 %vm10969_vm1, %v10968_v2 }
 0xb47   :  { %9999 = vmatmul.mubr.msk.f32.vlgmr.msra.gmra.mrb[74].mxu0 %vm119_vm2, %v11763_v33 }
 0xb48   :  { %10620 = vmatpush3.bf16.xpose.msk.msra.mxu0 %vm11173_vm4, %v10618_v44  ;;  %10018 = vmatprep.mubr.msk.f32.mxu0 %vm10969_vm1, %v10968_v2 }
 0xb49   :  { %10016 = vmatprep.subr.mxu0 %v10968_v2 }
 0xb50   :  { %10017 = vmatpush3.xpose.msk.msra.mxu0 %vm385_vm3, %v3227_v46 }
 0xb51   :  { %10030 = vmatprep.subr.mxu0 %v10968_v2 }
 0xc0a   :  { %v2787_v32 = vpop.f32.mrb[66].mxu0 }
 0xc0b   :  { %v2788_v45 = vadd.f32 %v9027_v6, %v2787_v32  ;;  %v9966_v9 = vpop.f32.mrb[67].mxu0 }
 0xc0c   :  { %v9059_v9 = vld [vmem:[%s12929_s6 + $0xa] ss:$0 sm:$0xff] }
 0xc0d   :  { %9985 = vmatmul.mubr.msk.f32.vlgmr.msra.gmra.mrb[70].mxu1 %vm385_vm3, %v2788_v45 }
 0xc0e   :  { %v2867_v50 = vpop.f32.mrb[68].mxu0  ;;  %9993 = vmatprep.mubr.msk.f32.mxu1 %vm10969_vm1, %v10968_v2 }
 0xc0f   :  { %v9971_v51 = vpop.f32.mrb[69].mxu0  ;;  %v2868_v56 = vadd.f32 %v9031_v15, %v2867_v50 }
 0xc12   :  { %v2872_v53 = vpop.f32.mrb[70].mxu0 }
 0xc13   :  { %v2873_v58 = vadd.f32 %v9031_v15, %v2872_v53  ;;  %v9974_v59 = vpop.f32.mrb[71].mxu0 }
 0xc15   :  { %v10615_v63 = vpack.c.bf16 %v2873_v58, %v2868_v56 }
 0xc16   :  { %v2877_v37 = vpop.f32.mrb[72].mxu0 }
 0xc17   :  { %v9977_v41 = vpop.f32.mrb[73].mxu0  ;;  %10616 = vmatpush3.bf16.msra.mxu1 %v10615_v63  ;;  %v2878_v5 = vadd.f32 %v9031_v15, %v2877_v37  ;;  %v9073_v15 = vld [vmem:[%s12928_s5 + $0x58] sm:$0xff]  ;;  %v9045_v63 = vld [vmem:[%s12932_s9 + $0x48] sm:$0xff] }
 0xc18   :  { %9991 = vmatprep.subr.mxu1 %v10968_v2 }
 0xc1a   :  { %v3128_v8 = vpop.f32.mrb[74].mxu0 }
 0xc1b   :  { %v3129_v60 = vadd.f32 %v9043_v61, %v3128_v8  ;;  %9992 = vmatpush3.msk.msra.mxu1 %vm531_vm10, %v2878_v5  ;;  %v10000_v10 = vpop.f32.mrb[75].mxu0 }
 0xc1c   :  { %10001 = vmatprep.subr.mxu1 %v10968_v2 }
 0xc1d   :  { %10019 = vmatmul.mubr.msk.f32.vlgmr.msra.gmra.mrb[76].mxu0 %vm385_vm3, %v3129_v60 }
 0xc1e   :  { %10031 = vmatpush3.msra.mxu0 %v9057_v12  ;;  %10032 = vmatprep.mubr.msk.f32.mxu0 %vm10969_vm1, %v10968_v2  ;;  %v9075_v12 = vld [vmem:[%s12929_s6 + $0xb] ss:$0 sm:$0xff] }
 0xc1f   :  { %10624 = vmatprep.subr.bf16.mxu0 %v10971_v22 }
 0xc21   :  { %10033 = vmatmul.mubr.msk.f32.vlgmr.msra.gmra.mrb[78].mxu0 %vm119_vm2, %v11763_v33 }
 0xc22   :  { %10052 = vmatprep.mubr.msk.f32.mxu0 %vm10969_vm1, %v10968_v2 }
 0xce0   :  { %v2959_v21 = vpop.f32.mrb[70].mxu1 }
 0xce1   :  { %v2963_v19 = vsel %vm11828_vm13, %v2959_v21, -1e+30  ;;  %v9986_v0 = vpop.f32.mrb[71].mxu1 }
 0xce2   :  { %v2965_v1 = vsel %vm12954_vm14, %v2963_v19, -inf }
 0xce3   :  { %2966 = vmax.xlane.f32.xlu0 %v2965_v1 }
 0xcf0   :  { %v3303_v20 = vpop.f32.mrb[76].mxu0 }
 0xcf1   :  { %v10020_v23 = vpop.f32.mrb[77].mxu0  ;;  %v3307_v26 = vsel %vm11828_vm13, %v3303_v20, -1e+30 }
 0xcf2   :  { %v3308_v28 = vsel %vm12954_vm14, %v3307_v26, -inf  ;;  %v9047_v23 = vld [vmem:[%s12933_s10 + $0x9] ss:$0 sm:$0xff] }
 0xcf4   :  { %v3471_v36 = vpop.f32.mrb[78].mxu0 }
 0xcf5   :  { %v10034_v24 = vpop.f32.mrb[79].mxu0  ;;  %v3472_v51 = vadd.f32 %v9059_v9, %v3471_v36 }
 0xcf9   :  { %10738 = vrot.lane.b32.xlu0 %v11744_v25, %s12979_s0 }
 0xd18   :  { %3309 = vmax.xlane.f32.xlu0 %v3308_v28 }
 0xd2e   :  { %10743 = vrot.lane.b32.xlu0 %v11744_v25, %s12980_s4 }
 0xd70   :  { %v2967_v29 = vpop.xlane.xlu0 %2966 }
 0xd71   :  { %v2968_v30 = vsub.f32 %v2963_v19, %v2967_v29 }
 0xd73   :  { %v2969_v31 = vmul.f32 1.442695, %v2968_v30 }
 0xd74   :  { %v10739_v39 = vpop.permute.xlu0 %10738 }
 0xd75   :  { %10825 = vpow2.f32 %v2969_v31  ;;  %v10741_v35 = vunpack.i.h.bf16 %v10739_v39  ;;  %v10740_v38 = vunpack.i.l.bf16 %v10739_v39 }
 0xd77   :  { %v10625_v52 = vpack.c.bf16 %v10741_v35, %v10740_v38 }
 0xd79   :  { %10627 = vmatpush3.bf16.xpose.msk.msra.mxu0 %vm11173_vm4, %v10625_v52  ;;  %v9061_v52 = vld [vmem:[%s12932_s9 + $0x50] sm:$0xff] }
 0xd7a   :  { %10050 = vmatprep.subr.mxu0 %v10968_v2 }
 0xd7f   :  { %v10826_v40 = vpop.eup %10825 }
 0xd80   :  { %v2971_v42 = vsel %vm12954_vm14, %v10826_v40, 0.0 }
 0xd81   :  { %2972 = vadd.xlane.f32.xlu1 %v2971_v42 }
 0xd92   :  { %3569 = vrot.lane.b32.xlu1 %v11751_v27, %s12979_s0 }
 0xda5   :  { %v3310_v25 = vpop.xlane.xlu0 %3309 }
 0xda6   :  { %v3311_v44 = vsub.f32 %v3307_v26, %v3310_v25 }
 0xda8   :  { %v3312_v46 = vmul.f32 1.442695, %v3311_v44 }
 0xda9   :  { %v10744_v53 = vpop.permute.xlu0 %10743 }
 0xdaa   :  { %10827 = vpow2.f32 %v3312_v46  ;;  %v10745_v56 = vunpack.i.l.bf16 %v10744_v53 }
 0xdb4   :  { %v11848_v6 = vpop.eup %10827 }
 0xdb5   :  { %v3314_v32 = vsel %vm12954_vm14, %v11848_v6, 0.0 }
 0xdb6   :  { %3315 = vadd.xlane.f32.xlu1 %v3314_v32 }
 0xdc7   :  { %3912 = vrot.lane.b32.xlu1 %v11751_v27, %s12980_s4  ;;  %v10746_v27 = vunpack.i.h.bf16 %v10744_v53 }
 0xdc9   :  { %v10632_v37 = vpack.c.bf16 %v10746_v27, %v10745_v56  ;;  %v9063_v27 = vld [vmem:[%s12933_s10 + $0xa] ss:$0 sm:$0xff] }
 0xe0e   :  { %v2973_v45 = vpop.xlane.xlu1 %2972 }
 0xe0f   :  { %10829 = vrcp.f32 %v2973_v45 }
 0xe12   :  { %v3570_v50 = vpop.permute.xlu1 %3569 }
 0xe13   :  { %10051 = vmatpush3.xpose.msk.msra.mxu0 %vm385_vm3, %v3570_v50 }
 0xe14   :  { %10064 = vmatprep.subr.mxu0 %v10968_v2 }
 0xe16   :  { %10053 = vmatmul.mubr.msk.f32.vlgmr.msra.gmra.mrb[80].mxu0 %vm385_vm3, %v3472_v51 }
 0xe17   :  { %10065 = vmatpush3.msra.mxu0 %v9073_v15  ;;  %10066 = vmatprep.mubr.msk.f32.mxu0 %vm10969_vm1, %v10968_v2 }
 0xe18   :  { %10631 = vmatprep.subr.bf16.mxu0 %v10971_v22 }
 0xe19   :  { %v10830_v58 = vpop.eup %10829 }
 0xe1a   :  { %v2975_v59 = vmul.f32 %v10830_v58, %v10826_v40  ;;  %10067 = vmatmul.mubr.msk.f32.vlgmr.msra.gmra.mrb[82].mxu0 %vm119_vm2, %v11763_v33 }
 0xe1b   :  { %10086 = vmatprep.mubr.msk.f32.mxu0 %vm10969_vm1, %v10968_v2 }
 0xe1c   :  { %9994 = vmatmul.mubr.msk.f32.vlgmr.msra.gmra.mrb[72].mxu1 %vm487_vm6, %v2975_v59 }
 0xe1d   :  { %10002 = vmatpush3.msra.mxu1 %v9045_v63  ;;  %10003 = vmatprep.mubr.msk.f32.mxu1 %vm10969_vm1, %v10968_v2 }
 0xe1e   :  { %10634 = vmatpush3.bf16.xpose.msk.msra.mxu0 %vm11173_vm4, %v10632_v37  ;;  %10621 = vmatprep.subr.bf16.mxu1 %v10971_v22 }
 0xe1f   :  { %10084 = vmatprep.subr.mxu0 %v10968_v2 }
 0xe20   :  { %10004 = vmatmul.mubr.msk.f32.vlgmr.msra.gmra.mrb[74].mxu1 %vm119_vm2, %v11697_v43 }
 0xe21   :  { %10006 = vmatprep.mubr.msk.f32.mxu1 %vm10969_vm1, %v10968_v2 }
 0xe24   :  { %10007 = vmatmul.mubr.msk.f32.gmra.mrb[76].mxu1 %vm119_vm2, %v11704_v49 }
 0xe25   :  { %10009 = vmatprep.mubr.msk.f32.mxu1 %vm10969_vm1, %v10968_v2 }
 0xe28   :  { %10010 = vmatmul.mubr.msk.f32.gmra.mrb[78].mxu1 %vm119_vm2, %v11718_v55 }
 0xe29   :  { %10027 = vmatprep.mubr.msk.f32.mxu1 %vm10969_vm1, %v10968_v2 }
 0xe43   :  { %v3316_v41 = vpop.xlane.xlu1 %3315 }
 0xe44   :  { %10831 = vrcp.f32 %v3316_v41 }
 0xe47   :  { %v3913_v61 = vpop.permute.xlu1 %3912 }
 0xe48   :  { %10085 = vmatpush3.xpose.msk.msra.mxu0 %vm385_vm3, %v3913_v61 }
 0xe49   :  { %10098 = vmatprep.subr.mxu0 %v10968_v2 }
 0xe4e   :  { %v10832_v31 = vpop.eup %10831 }
 0xe4f   :  { %v3318_v38 = vmul.f32 %v10832_v31, %v11848_v6 }
 0xee9   :  { %v3646_v5 = vpop.f32.mrb[80].mxu0 }
 0xeea   :  { %v3650_v8 = vsel %vm11828_vm13, %v3646_v5, -1e+30  ;;  %v10054_v60 = vpop.f32.mrb[81].mxu0 }
 0xeeb   :  { %v3651_v10 = vsel %vm12954_vm14, %v3650_v8, -inf }
 0xeec   :  { %3652 = vmax.xlane.f32.xlu0 %v3651_v10 }
 0xeed   :  { %v3814_v14 = vpop.f32.mrb[82].mxu0 }
 0xeee   :  { %v3815_v17 = vadd.f32 %v9075_v12, %v3814_v14  ;;  %v10068_v21 = vpop.f32.mrb[83].mxu0  ;;  %v9077_v12 = vld [vmem:[%s12932_s9 + $0x58] sm:$0xff] }
 0xeef   :  { %v11900_v19 = vpop.f32.mrb[72].mxu1 }
 0xef0   :  { %v9995_v0 = vpop.f32.mrb[73].mxu1  ;;  %10087 = vmatmul.mubr.msk.f32.vlgmr.msra.gmra.mrb[84].mxu0 %vm385_vm3, %v3815_v17 }
 0xef1   :  { %10100 = vmatprep.mubr.msk.f32.mxu0 %vm10969_vm1, %v10968_v2 }
 0xef3   :  { %v3208_v1 = vpop.f32.mrb[74].mxu1 }
 0xef4   :  { %v10005_v20 = vpop.f32.mrb[75].mxu1  ;;  %v3209_v24 = vadd.f32 %v9047_v23, %v3208_v1 }
 0xef7   :  { %v3213_v36 = vpop.f32.mrb[76].mxu1 }
 0xef8   :  { %v3214_v26 = vadd.f32 %v9047_v23, %v3213_v36  ;;  %v10008_v28 = vpop.f32.mrb[77].mxu1 }
 0xefa   :  { %v10622_v29 = vpack.c.bf16 %v3214_v26, %v3209_v24 }
 0xefb   :  { %v3218_v30 = vpop.f32.mrb[78].mxu1 }
 0xefc   :  { %v10011_v39 = vpop.f32.mrb[79].mxu1  ;;  %10623 = vmatpush3.bf16.msra.mxu1 %v10622_v29  ;;  %v3219_v35 = vadd.f32 %v9047_v23, %v3218_v30 }
 0xefd   :  { %10025 = vmatprep.subr.mxu1 %v10968_v2 }
 0xf00   :  { %10026 = vmatpush3.msk.msra.mxu1 %vm531_vm10, %v3219_v35 }
 0xf01   :  { %10028 = vmatmul.mubr.msk.f32.vlgmr.msra.gmra.mrb[80].mxu1 %vm487_vm6, %v3318_v38  ;;  %10035 = vmatprep.subr.mxu1 %v10968_v2 }
 0xf02   :  { %10036 = vmatpush3.msra.mxu1 %v9061_v52  ;;  %10037 = vmatprep.mubr.msk.f32.mxu1 %vm10969_vm1, %v10968_v2 }
 0xf03   :  { %10628 = vmatprep.subr.bf16.mxu1 %v10971_v22 }
 0xf05   :  { %10038 = vmatmul.mubr.msk.f32.vlgmr.msra.gmra.mrb[82].mxu1 %vm119_vm2, %v11697_v43 }
 0xf06   :  { %10040 = vmatprep.mubr.msk.f32.mxu1 %vm10969_vm1, %v10968_v2 }
 0xf09   :  { %10041 = vmatmul.mubr.msk.f32.gmra.mrb[84].mxu1 %vm119_vm2, %v11704_v49 }
 0xf0a   :  { %10043 = vmatprep.mubr.msk.f32.mxu1 %vm10969_vm1, %v10968_v2 }
 0xf0d   :  { %10044 = vmatmul.mubr.msk.f32.gmra.mrb[86].mxu1 %vm119_vm2, %v11718_v55 }
 0xf0e   :  { %10061 = vmatprep.mubr.msk.f32.mxu1 %vm10969_vm1, %v10968_v2 }
 0xf79   :  { %v3653_v40 = vpop.xlane.xlu0 %3652 }
 0xf7a   :  { %v3654_v42 = vsub.f32 %v3650_v8, %v3653_v40  ;;  %v9089_v40 = vld [vmem:[%s12934_s11 + $0x10] sm:$0xff] }
 0xf7b   :  { %10099 = vmatpush3.msra.mxu0 %v9089_v40 }
 0xf7c   :  { %v3655_v25 = vmul.f32 1.442695, %v3654_v42  ;;  %10638 = vmatprep.subr.bf16.mxu0 %v10971_v22 }
 0xf7e   :  { %10833 = vpow2.f32 %v3655_v25 }
 0xf88   :  { %v10834_v44 = vpop.eup %10833 }
 0xf89   :  { %v3657_v46 = vsel %vm12954_vm14, %v10834_v44, 0.0 }
 0xf8a   :  { %3658 = vadd.xlane.f32.xlu1 %v3657_v46 }
 0xfc3   :  { %v3989_v6 = vpop.f32.mrb[84].mxu0 }
 0xfc4   :  { %v3993_v32 = vsel %vm11828_vm13, %v3989_v6, -1e+30  ;;  %v10088_v45 = vpop.f32.mrb[85].mxu0 }
 0xfc5   :  { %v3994_v9 = vsel %vm12954_vm14, %v3993_v32, -inf }
 0xfc6   :  { %3995 = vmax.xlane.f32.xlu0 %v3994_v9 }
 0xfd4   :  { %v3391_v50 = vpop.f32.mrb[80].mxu1 }
 0xfd5   :  { %v10029_v51 = vpop.f32.mrb[81].mxu1  ;;  %4082 = vrot.lane.b32.xlu1 %v3391_v50, %s10975_s22  ;;  %v9093_v50 = vld [vmem:[%s12936_s13 + $0x8] sm:$0xff] }
 0xfd8   :  { %v3551_v15 = vpop.f32.mrb[82].mxu1 }
 0xfd9   :  { %v10039_v53 = vpop.f32.mrb[83].mxu1  ;;  %v3552_v58 = vadd.f32 %v9063_v27, %v3551_v15 }
 0xfdc   :  { %v3556_v56 = vpop.f32.mrb[84].mxu1 }
 0xfdd   :  { %v3557_v59 = vadd.f32 %v9063_v27, %v3556_v56  ;;  %v10042_v63 = vpop.f32.mrb[85].mxu1  ;;  %v9097_v56 = vld [vmem:[%s12938_s15 + $0x10] sm:$0xff] }
 0xfdf   :  { %v10629_v37 = vpack.c.bf16 %v3557_v59, %v3552_v58  ;;  %v9098_v58 = vld [vmem:[%s12938_s15 + $0x18] sm:$0xff] }
 0xfe0   :  { %v3561_v41 = vpop.f32.mrb[86].mxu1  ;;  %v10639_v59 = vpack.c.bf16 %v9098_v58, %v9097_v56 }
 0xfe1   :  { %v10045_v61 = vpop.f32.mrb[87].mxu1  ;;  %10630 = vmatpush3.bf16.msra.mxu1 %v10629_v37  ;;  %v3562_v5 = vadd.f32 %v9063_v27, %v3561_v41 }
 0xfe2   :  { %10059 = vmatprep.subr.mxu1 %v10968_v2  ;;  %v4348_v61 = vld [vmem:[%s12940_s17] sm:$0xff] }
 0xfe5   :  { %10060 = vmatpush3.msk.msra.mxu1 %vm531_vm10, %v3562_v5  ;;  %v9100_v5 = vld [vmem:[%s12939_s16 + $0x1] ss:$0 sm:$0xff] }
 0xfe6   :  { %10069 = vmatprep.subr.mxu1 %v10968_v2 }
0x1017   :  { %v3659_v8 = vpop.xlane.xlu1 %3658 }
0x1018   :  { %10835 = vrcp.f32 %v3659_v8 }
0x1022   :  { %v10836_v60 = vpop.eup %10835 }
0x1023   :  { %v3661_v10 = vmul.f32 %v10836_v60, %v10834_v44 }
0x1025   :  { %10062 = vmatmul.mubr.msk.f32.vlgmr.msra.gmra.mrb[88].mxu1 %vm487_vm6, %v3661_v10 }
0x1026   :  { %10070 = vmatpush3.msra.mxu1 %v9077_v12  ;;  %10071 = vmatprep.mubr.msk.f32.mxu1 %vm10969_vm1, %v10968_v2 }
0x1027   :  { %10635 = vmatprep.subr.bf16.mxu1 %v10971_v22 }
0x1029   :  { %10072 = vmatmul.mubr.msk.f32.vlgmr.msra.gmra.mrb[90].mxu1 %vm119_vm2, %v11697_v43 }
0x102a   :  { %10074 = vmatprep.mubr.msk.f32.mxu1 %vm10969_vm1, %v10968_v2 }
0x102d   :  { %10075 = vmatmul.mubr.msk.f32.gmra.mrb[92].mxu1 %vm119_vm2, %v11704_v49 }
0x102e   :  { %10077 = vmatprep.mubr.msk.f32.mxu1 %vm10969_vm1, %v10968_v2 }
0x1031   :  { %10078 = vmatmul.mubr.msk.f32.gmra.mrb[94].mxu1 %vm119_vm2, %v11718_v55  ;;  %v9079_v55 = vld [vmem:[%s12933_s10 + $0xb] ss:$0 sm:$0xff] }
0x1032   :  { %10095 = vmatprep.mubr.msk.f32.mxu1 %vm10969_vm1, %v10968_v2 }
0x1047   :  { %v4083_v44 = vpop.permute.xlu1 %4082 }
0x1048   :  { %v4093_v6 = vsel %vm385_vm3, %v11900_v19, %v4083_v44  ;;  %v9091_v19 = vld [vmem:[%s12935_s12 + $0x2] ss:$0 sm:$0xff]  ;;  %v10916_v44 = vld [vmem:[%s12963_s2 + $0x10] sm:$0xf] }
0x1053   :  { %v3996_v14 = vpop.xlane.xlu0 %3995 }
0x1054   :  { %v3997_v17 = vsub.f32 %v3993_v32, %v3996_v14  ;;  %v9102_v14 = vld [vmem:[%s12941_s18] ss:$0 sm:$0xff] }
0x1056   :  { %v3998_v21 = vmul.f32 1.442695, %v3997_v17 }
0x1058   :  { %10837 = vpow2.f32 %v3998_v21 }
0x1062   :  { %v10838_v43 = vpop.eup %10837 }
0x1063   :  { %v4000_v0 = vsel %vm12954_vm14, %v10838_v43, 0.0  ;;  %vm4457_vm14 = vcmask 1041408  }
0x1064   :  { %4001 = vadd.xlane.f32.xlu0 %v4000_v0 }
0x10f1   :  { %v4002_v1 = vpop.xlane.xlu0 %4001 }
0x10f2   :  { %10839 = vrcp.f32 %v4002_v1 }
0x10f8   :  { %v3734_v20 = vpop.f32.mrb[88].mxu1 }
0x10f9   :  { %v10063_v49 = vpop.f32.mrb[89].mxu1  ;;  %4086 = vrot.lane.b32.xlu0 %v3734_v20, %s10976_s23 }
0x10fc   :  { %v3894_v23 = vpop.f32.mrb[90].mxu1  ;;  %v10840_v39 = vpop.eup %10839 }
0x10fd   :  { %v10073_v36 = vpop.f32.mrb[91].mxu1  ;;  %v3895_v26 = vadd.f32 %v9079_v55, %v3894_v23  ;;  %v4004_v52 = vmul.f32 %v10840_v39, %v10838_v43  ;;  %v4438_v23 = vand.u32 127, %v93_v13 }
0x10ff   :  { %vm4439_vm15 = vcmp.eq.s32.totalorder %v11221_v48, %v4438_v23  ;;  %vm4441_vm9 = vcmp.eq.s32.totalorder %v11219_v47, %v4438_v23  ;;  %v4665_v47 = vld [vmem:[%s12928_s5] sm:$0xff] }
0x1100   :  { %v3899_v24 = vpop.f32.mrb[92].mxu1  ;;  %v9106_v48 = vsel %vm4441_vm9, 1.0, %v10968_v2  ;;  %vm12981_vm9 = vcmask 158720  }
0x1101   :  { %v3900_v28 = vadd.f32 %v9079_v55, %v3899_v24  ;;  %v10076_v29 = vpop.f32.mrb[93].mxu1 }
0x1103   :  { %v10636_v30 = vpack.c.bf16 %v3900_v28, %v3895_v26  ;;  %v10914_v26 = vld [vmem:[%s12963_s2] sm:$0xff] }
0x1104   :  { %v3904_v31 = vpop.f32.mrb[94].mxu1 }
0x1105   :  { %v10079_v35 = vpop.f32.mrb[95].mxu1  ;;  %10637 = vmatpush3.bf16.msra.mxu1 %v10636_v30  ;;  %v3905_v38 = vadd.f32 %v9079_v55, %v3904_v31  ;;  %v9104_v55 = vsel %vm4439_vm15, 1.0, %v10968_v2  ;;  %vm12984_vm15 = vmmov %vm12981_vm9 }
0x1106   :  { %10093 = vmatprep.subr.mxu1 %v10968_v2  ;;  %v10915_v35 = vld [vmem:[%s12963_s2 + $0x8] sm:$0xff] }
0x1109   :  { %10094 = vmatpush3.msk.msra.mxu1 %vm531_vm10, %v3905_v38 }
0x110a   :  { %10096 = vmatmul.mubr.msk.f32.vlgmr.msra.gmra.mrb[96].mxu1 %vm487_vm6, %v4004_v52  ;;  %10103 = vmatprep.subr.mxu1 %v10968_v2 }
0x110b   :  { %10105 = vmatprep.mubr.msk.f32.mxu1 %vm10969_vm1, %v10968_v2  ;;  %10104 = vmatpush3.msra.mxu1 %v9093_v50 }
0x110c   :  { %10115 = vmatprep.subr.mxu1 %v10968_v2 }
0x116b   :  { %v4087_v46 = vpop.permute.xlu0 %4086 }
0x116c   :  { %v4094_v32 = vsel %vm103_vm0, %v4093_v6, %v4087_v46 }
0x11dd   :  { %v4077_v42 = vpop.f32.mrb[96].mxu1 }
0x11de   :  { %4090 = vrot.lane.b32.xlu1 %v4077_v42, %s10977_s29  ;;  %v10097_v25 = vpop.f32.mrb[97].mxu1 }
0x1250   :  { %v4091_v45 = vpop.permute.xlu1 %4090 }
0x1251   :  { %v4095_v9 = vsel %vm12956_vm11, %v4094_v32, %v4091_v45  ;;  %vm4440_vm11 = vcmp.eq.s32.totalorder %v11230_v54, %v4438_v23  ;;  %v4568_v54 = vld [vmem:[%s12930_s7] sm:$0xff] }
0x1252   :  { %10101 = vmatmul.mubr.msk.f32.vlgmr.msra.gmra.mrb[86].mxu0 %vm119_vm2, %v4095_v9  ;;  %v9105_v13 = vsel %vm4440_vm11, 1.0, %v10968_v2  ;;  %vm12982_vm11 = vmmov %vm12981_vm9 }
0x1253   :  { %10112 = vmatprep.mubr.msk.f32.mxu0 %vm10969_vm1, %v10968_v2  ;;  %10640 = vmatpush3.bf16.msra.mxu0 %v10639_v59  ;;  %v10919_v59 = vld [vmem:[%s12964_s26 + $0x10] sm:$0xf] }
0x1254   :  { %10120 = vmatprep.subr.mxu0 %v10968_v2 }
0x1325   :  { %v4175_v51 = vpop.f32.mrb[86].mxu0 }
0x1326   :  { %v4176_v15 = vadd.f32 %v9091_v19, %v4175_v51  ;;  %v10102_v53 = vpop.f32.mrb[87].mxu0  ;;  %v10917_v19 = vld [vmem:[%s12964_s26] sm:$0xff] }
0x1328   :  { %v4179_v27 = vadd.f32 %v4176_v15, %v11763_v33  ;;  %v9095_v33 = vld [vmem:[%s12937_s14 + $0x1] ss:$0 sm:$0xff] }
0x1329   :  { %v4753_v15 = vld [vmem:[%s12932_s9] sm:$0xff] }
0x132a   :  { %10106 = vmatmul.mubr.msk.f32.vlgmr.msra.gmra.mrb[98].mxu1 %vm119_vm2, %v4179_v27 }
0x132b   :  { %10117 = vmatprep.mubr.msk.f32.mxu1 %vm10969_vm1, %v10968_v2  ;;  %10116 = vmatpush3.msra.mxu1 %v4348_v61  ;;  %v9111_v61 = vld [vmem:[%s12931_s8] ss:$0 sm:$0xff] }
0x132c   :  { %10131 = vmatprep.subr.mxu1 %v10968_v2 }
0x13fd   :  { %v4259_v63 = vpop.f32.mrb[98].mxu1 }
0x13fe   :  { %v4260_v37 = vadd.f32 %v9095_v33, %v4259_v63  ;;  %v10107_v41 = vpop.f32.mrb[99].mxu1 }
0x1400   :  { %10113 = vmatmul.mubr.msk.f32.vlgmr.msra.gmra.mrb[88].mxu0 %vm12955_vm12, %v4260_v37  ;;  %vm4435_vm12 = vcmask 25600  }
0x1401   :  { %10122 = vmatprep.mubr.msk.f32.mxu0 %vm10969_vm1, %v10968_v2 }
0x14d3   :  { %v4343_v8 = vpop.f32.mrb[88].mxu0 }
0x14d4   :  { %v4344_v60 = vadd.f32 %v9100_v5, %v4343_v8  ;;  %v10114_v10 = vpop.f32.mrb[89].mxu0 }
0x14d6   :  { %v4347_v12 = vadd.f32 %v4344_v60, %v4179_v27  ;;  %v10918_v27 = vld [vmem:[%s12964_s26 + $0x8] sm:$0xff] }
0x14d8   :  { %10118 = vmatmul.mubr.msk.f32.vlgmr.msra.gmra.mrb[100].mxu1 %vm119_vm2, %v4347_v12 }
0x14d9   :  { %10133 = vmatprep.mubr.msk.f32.mxu1 %vm10969_vm1, %v10968_v2  ;;  %10132 = vmatpush3.msra.mxu1 %v4568_v54 }
0x14da   :  { %10153 = vmatprep.subr.mxu1 %v10968_v2 }
0x15ab   :  { %v4425_v17 = vpop.f32.mrb[100].mxu1 }
0x15ac   :  { %v4426_v21 = vadd.f32 %v9102_v14, %v4425_v17  ;;  %v10119_v43 = vpop.f32.mrb[101].mxu1 }
0x15ae   :  { %v4429_v0 = vsub.f32 0.0, %v4426_v21 }
0x15b0   :  { %v4430_v1 = vmul.f32 1.442695, %v4429_v0 }
0x15b2   :  { %10841 = vpow2.f32 %v4430_v1 }
0x15bc   :  { %v10842_v20 = vpop.eup %10841 }
0x15bd   :  { %v4432_v49 = vadd.f32 1.0, %v10842_v20 }
0x15bf   :  { %10843 = vrcp.f32 %v4432_v49 }
0x15c9   :  { %v10844_v36 = vpop.eup %10843 }
0x15ca   :  { %10121 = vmatpush3.msk.msra.mxu0 %vm4457_vm14, %v10844_v36  ;;  %4436 = vst.msk [vmem:[#allocation2] sm:$0x3] %vm4435_vm12, %v10844_v36  ;;  %vm12983_vm14 = vmmov %vm12981_vm9 }
0x15cb   :  { %10123 = vmatmul.mubr.msk.f32.vlgmr.msra.gmra.mrb[90].mxu0 %vm385_vm3, %v9104_v55  ;;  %10142 = vmatprep.subr.mxu0 %v10968_v2  ;;  %v9119_v55 = vld [vmem:[%s12933_s10] ss:$0 sm:$0xff] }
0x15cc   :  { %10125 = vmatprep.mubr.msk.f32.mxu0 %vm10969_vm1, %v10968_v2  ;;  %10143 = vmatpush3.msra.mxu0 %v4665_v47 }
0x15cd   :  { %10641 = vmatprep.subr.bf16.mxu0 %v10971_v22 }
0x15cf   :  { %10126 = vmatmul.mubr.msk.f32.gmra.mrb[92].mxu0 %vm385_vm3, %v9105_v13  ;;  %v9115_v13 = vld [vmem:[%s12929_s6] ss:$0 sm:$0xff] }
0x15d0   :  { %10128 = vmatprep.mubr.msk.f32.mxu0 %vm10969_vm1, %v10968_v2 }
0x15d3   :  { %10129 = vmatmul.mubr.msk.f32.gmra.mrb[94].mxu0 %vm385_vm3, %v9106_v48 }
0x15d4   :  { %10144 = vmatprep.mubr.msk.f32.mxu0 %vm10969_vm1, %v10968_v2 }
0x169e   :  { %v4527_v24 = vpop.f32.mrb[90].mxu0 }
0x169f   :  { %v4541_v28 = vsub.f32 %v4527_v24, %v10914_v26  ;;  %v10124_v29 = vpop.f32.mrb[91].mxu0 }
0x16a0   :  { %v9133_v29 = vld [vmem:[%s12928_s5 + $0x8] sm:$0xff] }
0x16a1   :  { %v4544_v30 = vmul.f32 %v4541_v28, %v4541_v28 }
0x16a2   :  { %v4532_v31 = vpop.f32.mrb[92].mxu0 }
0x16a3   :  { %v4547_v39 = vmul.f32 2.0, %v4544_v30  ;;  %v4542_v38 = vsub.f32 %v4532_v31, %v10915_v35  ;;  %v10127_v52 = vpop.f32.mrb[93].mxu0 }
0x16a5   :  { %v4545_v40 = vmul.f32 %v4542_v38, %v4542_v38  ;;  %4553 = vrot.lane.b32.xlu1 %v4547_v39, %s10976_s23 }
0x16a6   :  { %v4537_v42 = vpop.f32.mrb[94].mxu0 }
0x16a7   :  { %v4548_v25 = vmul.f32 2.0, %v4545_v40  ;;  %v4543_v46 = vsub.f32 %v4537_v42, %v10916_v44  ;;  %v10130_v6 = vpop.f32.mrb[95].mxu0 }
0x16a9   :  { %v4546_v32 = vmul.f32 %v4543_v46, %v4543_v46  ;;  %4555 = vrot.lane.b32.xlu0 %v4548_v25, %s10976_s23 }
0x16ab   :  { %v4549_v45 = vmul.f32 2.0, %v4546_v32 }
0x16ad   :  { %4557 = vrot.lane.b32.xlu1 %v4549_v45, %s10976_s23 }
0x1717   :  { %v4554_v9 = vpop.permute.xlu1 %4553 }
0x1718   :  { %v4562_v50 = vsel %vm103_vm0, %v11097_v4, %v4554_v9 }
0x1719   :  { %v12064_v51 = vadd.f32 %v10917_v19, %v4562_v50 }
0x171b   :  { %10134 = vmatmul.mubr.msk.f32.vlgmr.msra.gmra.mrb[102].mxu1 %vm119_vm2, %v12064_v51  ;;  %10145 = vmatmul.mubr.msk.f32.vlgmr.msra.gmra.mrb[96].mxu0 %vm119_vm2, %v12064_v51  ;;  %v4556_v53 = vpop.permute.xlu0 %4555 }
0x171c   :  { %v4563_v4 = vsel %vm103_vm0, %v11105_v7, %v4556_v53  ;;  %10136 = vmatprep.mubr.msk.f32.mxu1 %vm10969_vm1, %v10968_v2  ;;  %10147 = vmatprep.mubr.msk.f32.mxu0 %vm10969_vm1, %v10968_v2 }
0x171d   :  { %v12082_v56 = vadd.f32 %v10918_v27, %v4563_v4  ;;  %10154 = vmatpush3.msra.mxu1 %v4753_v15 }
0x171e   :  { %10645 = vmatprep.subr.bf16.mxu1 %v10971_v22 }
0x171f   :  { %10137 = vmatmul.mubr.msk.f32.gmra.mrb[104].mxu1 %vm119_vm2, %v12082_v56  ;;  %10148 = vmatmul.mubr.msk.f32.gmra.mrb[98].mxu0 %vm119_vm2, %v12082_v56  ;;  %v4558_v7 = vpop.permute.xlu1 %4557 }
0x1720   :  { %v4564_v58 = vsel %vm103_vm0, %v11116_v11, %v4558_v7  ;;  %10139 = vmatprep.mubr.msk.f32.mxu1 %vm10969_vm1, %v10968_v2  ;;  %10150 = vmatprep.mubr.msk.f32.mxu0 %vm10969_vm1, %v10968_v2 }
0x1721   :  { %v12098_v33 = vadd.f32 %v10919_v59, %v4564_v58  ;;  %v9135_v58 = vld [vmem:[%s12929_s6 + $0x1] ss:$0 sm:$0xff] }
0x1723   :  { %10140 = vmatmul.mubr.msk.f32.gmra.mrb[106].mxu1 %vm119_vm2, %v12098_v33  ;;  %10151 = vmatmul.mubr.msk.f32.gmra.mrb[100].mxu0 %vm119_vm2, %v12098_v33 }
0x1724   :  { %10155 = vmatprep.mubr.msk.f32.mxu1 %vm10969_vm1, %v10968_v2  ;;  %10170 = vmatprep.mubr.msk.f32.mxu0 %vm10969_vm1, %v10968_v2 }
0x1727   :  { %10156 = vmatmul.mubr.msk.f32.vlgmr.msra.gmra.mrb[108].mxu1 %vm119_vm2, %v12064_v51 }
0x1728   :  { %10158 = vmatprep.mubr.msk.f32.mxu1 %vm10969_vm1, %v10968_v2 }
0x172b   :  { %10159 = vmatmul.mubr.msk.f32.gmra.mrb[110].mxu1 %vm119_vm2, %v12082_v56 }
0x172c   :  { %10161 = vmatprep.mubr.msk.f32.mxu1 %vm10969_vm1, %v10968_v2 }
0x172f   :  { %10162 = vmatmul.mubr.msk.f32.gmra.mrb[112].mxu1 %vm119_vm2, %v12098_v33 }
0x1730   :  { %10185 = vmatprep.mubr.msk.f32.mxu1 %vm10969_vm1, %v10968_v2 }
0x17ee   :  { %v4651_v11 = vpop.f32.mrb[102].mxu1  ;;  %v4739_v63 = vpop.f32.mrb[96].mxu0 }
0x17ef   :  { %v10135_v37 = vpop.f32.mrb[103].mxu1  ;;  %v10146_v41 = vpop.f32.mrb[97].mxu0  ;;  %v4652_v60 = vadd.f32 %v9111_v61, %v4651_v11  ;;  %v4740_v26 = vadd.f32 %v9115_v13, %v4739_v63 }
0x17f0   :  { %v9155_v37 = vld [vmem:[%s12928_s5 + $0x10] sm:$0xff] }
0x17f2   :  { %v4656_v5 = vpop.f32.mrb[104].mxu1  ;;  %v4744_v8 = vpop.f32.mrb[98].mxu0 }
0x17f3   :  { %v4657_v10 = vadd.f32 %v9111_v61, %v4656_v5  ;;  %v10138_v12 = vpop.f32.mrb[105].mxu1  ;;  %v10149_v14 = vpop.f32.mrb[99].mxu0  ;;  %v4745_v39 = vadd.f32 %v9115_v13, %v4744_v8 }
0x17f5   :  { %v10642_v17 = vpack.c.bf16 %v4657_v10, %v4652_v60  ;;  %v12123_v21 = vpack.i.bf16 %v4657_v10, %v4652_v60 }
0x17f6   :  { %v4661_v43 = vpop.f32.mrb[106].mxu1  ;;  %v4749_v0 = vpop.f32.mrb[100].mxu0 }
0x17f7   :  { %v12125_v1 = vadd.f32 %v9111_v61, %v4661_v43  ;;  %10748 = vrot.lane.b32.xlu0 %v12123_v21, %s12976_s24  ;;  %v10141_v20 = vpop.f32.mrb[107].mxu1  ;;  %v10152_v49 = vpop.f32.mrb[101].mxu0  ;;  %10644 = vmatpush3.bf16.xpose.msk.msra.mxu0 %vm11173_vm4, %v10642_v17  ;;  %v4750_v38 = vadd.f32 %v9115_v13, %v4749_v0 }
0x17f8   :  { %10168 = vmatprep.subr.mxu0 %v10968_v2 }
0x17f9   :  { %5247 = vrot.lane.b32.xlu1 %v12125_v1, %s12976_s24 }
0x17fa   :  { %v4827_v23 = vpop.f32.mrb[108].mxu1 }
0x17fb   :  { %v10157_v36 = vpop.f32.mrb[109].mxu1  ;;  %v4828_v54 = vadd.f32 %v9119_v55, %v4827_v23 }
0x17fe   :  { %v4832_v48 = vpop.f32.mrb[110].mxu1 }
0x17ff   :  { %v4833_v47 = vadd.f32 %v9119_v55, %v4832_v48  ;;  %v10160_v24 = vpop.f32.mrb[111].mxu1  ;;  %10169 = vmatpush3.xpose.msk.msra.mxu0 %vm385_vm3, %v12125_v1 }
0x1800   :  { %10194 = vmatprep.subr.mxu0 %v10968_v2 }
0x1801   :  { %v10646_v28 = vpack.c.bf16 %v4833_v47, %v4828_v54 }
0x1802   :  { %v4837_v30 = vpop.f32.mrb[112].mxu1  ;;  %10171 = vmatmul.mubr.msk.f32.vlgmr.msra.gmra.mrb[102].mxu0 %vm385_vm3, %v4740_v26 }
0x1803   :  { %v10163_v31 = vpop.f32.mrb[113].mxu1  ;;  %10647 = vmatpush3.bf16.msra.mxu1 %v10646_v28  ;;  %10173 = vmatprep.mubr.msk.f32.mxu0 %vm10969_vm1, %v10968_v2  ;;  %v4838_v35 = vadd.f32 %v9119_v55, %v4837_v30 }
0x1804   :  { %10183 = vmatprep.subr.mxu1 %v10968_v2  ;;  %10195 = vmatpush3.msra.mxu0 %v9133_v29 }
0x1805   :  { %10648 = vmatprep.subr.bf16.mxu0 %v10971_v22 }
0x1806   :  { %10174 = vmatmul.mubr.msk.f32.gmra.mrb[104].mxu0 %vm385_vm3, %v4745_v39 }
0x1807   :  { %10184 = vmatpush3.msk.msra.mxu1 %vm531_vm10, %v4838_v35  ;;  %10176 = vmatprep.mubr.msk.f32.mxu0 %vm10969_vm1, %v10968_v2 }
0x1808   :  { %10205 = vmatprep.subr.mxu1 %v10968_v2 }
0x180a   :  { %10177 = vmatmul.mubr.msk.f32.gmra.mrb[106].mxu0 %vm385_vm3, %v4750_v38 }
0x180b   :  { %10196 = vmatprep.mubr.msk.f32.mxu0 %vm10969_vm1, %v10968_v2 }
0x180e   :  { %10197 = vmatmul.mubr.msk.f32.vlgmr.msra.gmra.mrb[108].mxu0 %vm119_vm2, %v12064_v51 }
0x180f   :  { %10199 = vmatprep.mubr.msk.f32.mxu0 %vm10969_vm1, %v10968_v2 }
0x1812   :  { %10200 = vmatmul.mubr.msk.f32.gmra.mrb[110].mxu0 %vm119_vm2, %v12082_v56 }
0x1813   :  { %10202 = vmatprep.mubr.msk.f32.mxu0 %vm10969_vm1, %v10968_v2 }
0x1816   :  { %10203 = vmatmul.mubr.msk.f32.gmra.mrb[112].mxu0 %vm119_vm2, %v12098_v33 }
0x1817   :  { %10222 = vmatprep.mubr.msk.f32.mxu0 %vm10969_vm1, %v10968_v2 }
0x1869   :  { %v10749_v52 = vpop.permute.xlu0 %10748 }
0x186a   :  { %v10751_v40 = vunpack.i.h.bf16 %v10749_v52  ;;  %v10750_v42 = vunpack.i.l.bf16 %v10749_v52 }
0x186b   :  { %v5248_v44 = vpop.permute.xlu1 %5247 }
0x186c   :  { %v10649_v25 = vpack.c.bf16 %v10751_v40, %v10750_v42 }
0x186e   :  { %10651 = vmatpush3.bf16.xpose.msk.msra.mxu0 %vm11173_vm4, %v10649_v25 }
0x186f   :  { %10220 = vmatprep.subr.mxu0 %v10968_v2 }
0x1876   :  { %10221 = vmatpush3.xpose.msk.msra.mxu0 %vm385_vm3, %v5248_v44 }
0x1877   :  { %10246 = vmatprep.subr.mxu0 %v10968_v2 }
0x18d5   :  { %v4925_v46 = vpop.f32.mrb[102].mxu0 }
0x18d6   :  { %v4939_v6 = vsel %vm11250_vm5, %v4925_v46, -1e+30  ;;  %v10172_v32 = vpop.f32.mrb[103].mxu0 }
0x18d7   :  { %v4942_v45 = vsel %vm487_vm6, %v4939_v6, -inf }
0x18d8   :  { %4943 = vmax.xlane.f32.xlu0 %v4942_v45 }
0x18d9   :  { %v4930_v9 = vpop.f32.mrb[104].mxu0 }
0x18da   :  { %v4940_v50 = vsel %vm11258_vm7, %v4930_v9, -1e+30  ;;  %v10175_v19 = vpop.f32.mrb[105].mxu0 }
0x18db   :  { %v4945_v15 = vsel %vm487_vm6, %v4940_v50, -inf }
0x18dc   :  { %4946 = vmax.xlane.f32.xlu1 %v4945_v15 }
0x18dd   :  { %v4935_v53 = vpop.f32.mrb[106].mxu0 }
0x18de   :  { %v4941_v4 = vsel %vm11265_vm8, %v4935_v53, -1e+30  ;;  %v10178_v27 = vpop.f32.mrb[107].mxu0 }
0x18df   :  { %v4948_v7 = vsel %vm12981_vm9, %v4941_v4, -inf }
0x18e0   :  { %4949 = vmax.xlane.f32.xlu0 %v4948_v7 }
0x18e1   :  { %v5141_v59 = vpop.f32.mrb[108].mxu0 }
0x18e2   :  { %v5142_v11 = vadd.f32 %v9135_v58, %v5141_v59  ;;  %v10198_v63 = vpop.f32.mrb[109].mxu0 }
0x18e4   :  { %10223 = vmatmul.mubr.msk.f32.vlgmr.msra.gmra.mrb[114].mxu0 %vm385_vm3, %v5142_v11  ;;  %v9139_v11 = vld [vmem:[%s12932_s9 + $0x8] sm:$0xff] }
0x18e5   :  { %v5146_v41 = vpop.f32.mrb[110].mxu0  ;;  %10225 = vmatprep.mubr.msk.f32.mxu0 %vm10969_vm1, %v10968_v2  ;;  %10247 = vmatpush3.msra.mxu0 %v9155_v37 }
0x18e6   :  { %v5147_v61 = vadd.f32 %v9135_v58, %v5146_v41  ;;  %v10201_v5 = vpop.f32.mrb[111].mxu0  ;;  %10655 = vmatprep.subr.bf16.mxu0 %v10971_v22 }
0x18e8   :  { %10226 = vmatmul.mubr.msk.f32.gmra.mrb[116].mxu0 %vm385_vm3, %v5147_v61  ;;  %v9157_v61 = vld [vmem:[%s12929_s6 + $0x2] ss:$0 sm:$0xff] }
0x18e9   :  { %v5151_v8 = vpop.f32.mrb[112].mxu0  ;;  %10228 = vmatprep.mubr.msk.f32.mxu0 %vm10969_vm1, %v10968_v2 }
0x18ea   :  { %v5152_v60 = vadd.f32 %v9135_v58, %v5151_v8  ;;  %v10204_v10 = vpop.f32.mrb[113].mxu0 }
0x18eb   :  { %v9177_v10 = vld [vmem:[%s12928_s5 + $0x18] sm:$0xff] }
0x18ec   :  { %10229 = vmatmul.mubr.msk.f32.gmra.mrb[118].mxu0 %vm385_vm3, %v5152_v60 }
0x18ed   :  { %10248 = vmatprep.mubr.msk.f32.mxu0 %vm10969_vm1, %v10968_v2 }
0x18f0   :  { %10249 = vmatmul.mubr.msk.f32.vlgmr.msra.gmra.mrb[120].mxu0 %vm119_vm2, %v12064_v51 }
0x18f1   :  { %10251 = vmatprep.mubr.msk.f32.mxu0 %vm10969_vm1, %v10968_v2 }
0x18f4   :  { %10252 = vmatmul.mubr.msk.f32.gmra.mrb[122].mxu0 %vm119_vm2, %v12082_v56 }
0x18f5   :  { %10254 = vmatprep.mubr.msk.f32.mxu0 %vm10969_vm1, %v10968_v2 }
0x18f8   :  { %10255 = vmatmul.mubr.msk.f32.gmra.mrb[124].mxu0 %vm119_vm2, %v12098_v33 }
0x18f9   :  { %10274 = vmatprep.mubr.msk.f32.mxu0 %vm10969_vm1, %v10968_v2 }
0x1965   :  { %v4944_v12 = vpop.xlane.xlu0 %4943 }
0x1966   :  { %v4951_v14 = vsub.f32 %v4939_v6, %v4944_v12 }
0x1968   :  { %v4954_v17 = vmul.f32 1.442695, %v4951_v14 }
0x1969   :  { %v4947_v43 = vpop.xlane.xlu1 %4946 }
0x196a   :  { %10845 = vpow2.f32 %v4954_v17  ;;  %v4952_v0 = vsub.f32 %v4940_v50, %v4947_v43 }
0x196c   :  { %v4956_v20 = vmul.f32 1.442695, %v4952_v0 }
0x196d   :  { %v4950_v49 = vpop.xlane.xlu0 %4949 }
0x196e   :  { %10847 = vpow2.f32 %v4956_v20  ;;  %v4953_v23 = vsub.f32 %v4941_v4, %v4950_v49 }
0x1970   :  { %v4958_v36 = vmul.f32 1.442695, %v4953_v23 }
0x1972   :  { %10849 = vpow2.f32 %v4958_v36 }
0x1974   :  { %v10846_v55 = vpop.eup %10845 }
0x1975   :  { %v4960_v13 = vsel %vm487_vm6, %v10846_v55, 0.0 }
0x1976   :  { %4961 = vadd.xlane.f32.xlu0 %v4960_v13 }
0x1978   :  { %v10848_v48 = vpop.eup %10847 }
0x1979   :  { %v4963_v54 = vsel %vm487_vm6, %v10848_v48, 0.0 }
0x197a   :  { %4964 = vadd.xlane.f32.xlu1 %v4963_v54 }
0x197c   :  { %v10850_v47 = vpop.eup %10849 }
0x197d   :  { %v4966_v24 = vsel %vm12982_vm11, %v10850_v47, 0.0  ;;  %vm12985_vm11 = vmmov %vm12981_vm9 }
0x197e   :  { %4967 = vadd.xlane.f32.xlu0 %v4966_v24 }
0x198b   :  { %10753 = vrot.lane.b32.xlu1 %v12123_v21, %s12979_s0 }
0x1994   :  { %5652 = vrot.lane.b32.xlu0 %v12125_v1, %s12979_s0 }
0x19b7   :  { %v5330_v26 = vpop.f32.mrb[114].mxu0 }
0x19b8   :  { %v12222_v28 = vsel %vm11250_vm5, %v5330_v26, -1e+30  ;;  %v10224_v29 = vpop.f32.mrb[115].mxu0 }
0x19b9   :  { %v5347_v30 = vsel %vm487_vm6, %v12222_v28, -inf }
0x19ba   :  { %5348 = vmax.xlane.f32.xlu1 %v5347_v30 }
0x19bb   :  { %v5335_v31 = vpop.f32.mrb[116].mxu0 }
0x19bc   :  { %v12228_v39 = vsel %vm11258_vm7, %v5335_v31, -1e+30  ;;  %v10227_v35 = vpop.f32.mrb[117].mxu0 }
0x19bd   :  { %v5350_v38 = vsel %vm487_vm6, %v12228_v39, -inf }
0x19be   :  { %5351 = vmax.xlane.f32.xlu0 %v5350_v38 }
0x19bf   :  { %v5340_v52 = vpop.f32.mrb[118].mxu0 }
0x19c0   :  { %v12234_v40 = vsel %vm11265_vm8, %v5340_v52, -1e+30  ;;  %v10230_v42 = vpop.f32.mrb[119].mxu0 }
0x19c1   :  { %v5353_v25 = vsel %vm12983_vm14, %v12234_v40, -inf }
0x19c2   :  { %5354 = vmax.xlane.f32.xlu1 %v5353_v25 }
0x19c3   :  { %v5546_v44 = vpop.f32.mrb[120].mxu0 }
0x19c4   :  { %v10250_v46 = vpop.f32.mrb[121].mxu0  ;;  %v5547_v60 = vadd.f32 %v9157_v61, %v5546_v44 }
0x19c7   :  { %v5551_v6 = vpop.f32.mrb[122].mxu0 }
0x19c8   :  { %v10253_v32 = vpop.f32.mrb[123].mxu0  ;;  %v5552_v12 = vadd.f32 %v9157_v61, %v5551_v6 }
0x19cb   :  { %v5556_v45 = vpop.f32.mrb[124].mxu0 }
0x19cc   :  { %v10256_v9 = vpop.f32.mrb[125].mxu0  ;;  %v5557_v14 = vadd.f32 %v9157_v61, %v5556_v45 }
0x1a03   :  { %v4962_v50 = vpop.xlane.xlu0 %4961 }
0x1a04   :  { %10851 = vrcp.f32 %v4962_v50  ;;  %v9141_v50 = vld [vmem:[%s12933_s10 + $0x1] ss:$0 sm:$0xff] }
0x1a07   :  { %v4965_v19 = vpop.xlane.xlu1 %4964 }
0x1a08   :  { %10853 = vrcp.f32 %v4965_v19 }
0x1a0b   :  { %v10754_v15 = vpop.permute.xlu1 %10753  ;;  %v4968_v53 = vpop.xlane.xlu0 %4967 }
0x1a0c   :  { %v10756_v4 = vunpack.i.h.bf16 %v10754_v15  ;;  %v10755_v27 = vunpack.i.l.bf16 %v10754_v15  ;;  %10855 = vrcp.f32 %v4968_v53 }
0x1a0e   :  { %v10852_v7 = vpop.eup %10851  ;;  %v10656_v58 = vpack.c.bf16 %v10756_v4, %v10755_v27 }
0x1a0f   :  { %v4972_v59 = vmul.f32 %v10852_v7, %v10846_v55  ;;  %v5653_v5 = vpop.permute.xlu0 %5652 }
0x1a10   :  { %10658 = vmatpush3.bf16.xpose.msk.msra.mxu0 %vm11173_vm4, %v10656_v58 }
0x1a11   :  { %10186 = vmatmul.mubr.msk.f32.vlgmr.msra.gmra.mrb[114].mxu1 %vm487_vm6, %v4972_v59  ;;  %10272 = vmatprep.subr.mxu0 %v10968_v2 }
0x1a12   :  { %v10854_v63 = vpop.eup %10853  ;;  %10188 = vmatprep.mubr.msk.f32.mxu1 %vm10969_vm1, %v10968_v2  ;;  %10206 = vmatpush3.msra.mxu1 %v9139_v11 }
0x1a13   :  { %v4973_v37 = vmul.f32 %v10854_v63, %v10848_v48  ;;  %10652 = vmatprep.subr.bf16.mxu1 %v10971_v22 }
0x1a15   :  { %10189 = vmatmul.mubr.msk.f32.gmra.mrb[116].mxu1 %vm487_vm6, %v4973_v37 }
0x1a16   :  { %v10856_v41 = vpop.eup %10855  ;;  %10191 = vmatprep.mubr.msk.f32.mxu1 %vm10969_vm1, %v10968_v2 }
0x1a17   :  { %v4974_v8 = vmul.f32 %v10856_v41, %v10850_v47 }
0x1a18   :  { %10273 = vmatpush3.xpose.msk.msra.mxu0 %vm385_vm3, %v5653_v5 }
0x1a19   :  { %10192 = vmatmul.mubr.msk.f32.gmra.mrb[118].mxu1 %vm487_vm6, %v4974_v8  ;;  %10298 = vmatprep.subr.mxu0 %v10968_v2 }
0x1a1a   :  { %10207 = vmatprep.mubr.msk.f32.mxu1 %vm10969_vm1, %v10968_v2 }
0x1a1b   :  { %10275 = vmatmul.mubr.msk.f32.vlgmr.msra.gmra.mrb[126].mxu0 %vm385_vm3, %v5547_v60  ;;  %v9179_v60 = vld [vmem:[%s12929_s6 + $0x3] ss:$0 sm:$0xff] }
0x1a1c   :  { %10277 = vmatprep.mubr.msk.f32.mxu0 %vm10969_vm1, %v10968_v2  ;;  %10299 = vmatpush3.msra.mxu0 %v9177_v10 }
0x1a1d   :  { %10208 = vmatmul.mubr.msk.f32.vlgmr.msra.gmra.mrb[120].mxu1 %vm119_vm2, %v12064_v51  ;;  %10662 = vmatprep.subr.bf16.mxu0 %v10971_v22 }
0x1a1e   :  { %10210 = vmatprep.mubr.msk.f32.mxu1 %vm10969_vm1, %v10968_v2 }
0x1a1f   :  { %10278 = vmatmul.mubr.msk.f32.gmra.mrb[128].mxu0 %vm385_vm3, %v5552_v12 }
0x1a20   :  { %10280 = vmatprep.mubr.msk.f32.mxu0 %vm10969_vm1, %v10968_v2 }
0x1a21   :  { %10211 = vmatmul.mubr.msk.f32.gmra.mrb[122].mxu1 %vm119_vm2, %v12082_v56 }
0x1a22   :  { %10213 = vmatprep.mubr.msk.f32.mxu1 %vm10969_vm1, %v10968_v2 }
0x1a23   :  { %10281 = vmatmul.mubr.msk.f32.gmra.mrb[130].mxu0 %vm385_vm3, %v5557_v14 }
0x1a24   :  { %10300 = vmatprep.mubr.msk.f32.mxu0 %vm10969_vm1, %v10968_v2 }
0x1a25   :  { %10214 = vmatmul.mubr.msk.f32.gmra.mrb[124].mxu1 %vm119_vm2, %v12098_v33 }
0x1a26   :  { %10237 = vmatprep.mubr.msk.f32.mxu1 %vm10969_vm1, %v10968_v2 }
0x1a27   :  { %10301 = vmatmul.mubr.msk.f32.vlgmr.msra.gmra.mrb[132].mxu0 %vm119_vm2, %v12064_v51 }
0x1a28   :  { %10303 = vmatprep.mubr.msk.f32.mxu0 %vm10969_vm1, %v10968_v2 }
0x1a2b   :  { %10304 = vmatmul.mubr.msk.f32.gmra.mrb[134].mxu0 %vm119_vm2, %v12082_v56 }
0x1a2c   :  { %10306 = vmatprep.mubr.msk.f32.mxu0 %vm10969_vm1, %v10968_v2 }
0x1a2f   :  { %10307 = vmatmul.mubr.msk.f32.gmra.mrb[136].mxu0 %vm119_vm2, %v12098_v33 }
0x1a30   :  { %10326 = vmatprep.mubr.msk.f32.mxu0 %vm10969_vm1, %v10968_v2 }
0x1a47   :  { %v5349_v17 = vpop.xlane.xlu1 %5348 }
0x1a48   :  { %v5356_v43 = vsub.f32 %v12222_v28, %v5349_v17 }
0x1a4a   :  { %v5359_v0 = vmul.f32 1.442695, %v5356_v43 }
0x1a4b   :  { %v5352_v20 = vpop.xlane.xlu0 %5351 }
0x1a4c   :  { %10857 = vpow2.f32 %v5359_v0  ;;  %v5357_v49 = vsub.f32 %v12228_v39, %v5352_v20 }
0x1a4e   :  { %v5361_v23 = vmul.f32 1.442695, %v5357_v49 }
0x1a4f   :  { %v5355_v36 = vpop.xlane.xlu1 %5354 }
0x1a50   :  { %10859 = vpow2.f32 %v5361_v23  ;;  %v5358_v55 = vsub.f32 %v12234_v40, %v5355_v36 }
0x1a52   :  { %v5363_v13 = vmul.f32 1.442695, %v5358_v55  ;;  %v9161_v55 = vld [vmem:[%s12932_s9 + $0x10] sm:$0xff] }
0x1a54   :  { %10861 = vpow2.f32 %v5363_v13 }
0x1a56   :  { %v12299_v48 = vpop.eup %10857 }
0x1a57   :  { %v5365_v54 = vsel %vm487_vm6, %v12299_v48, 0.0 }
0x1a58   :  { %5366 = vadd.xlane.f32.xlu0 %v5365_v54 }
0x1a5a   :  { %v12303_v47 = vpop.eup %10859 }
0x1a5b   :  { %v5368_v24 = vsel %vm487_vm6, %v12303_v47, 0.0 }
0x1a5c   :  { %5369 = vadd.xlane.f32.xlu1 %v5368_v24 }
0x1a5e   :  { %v12307_v26 = vpop.eup %10861 }
0x1a5f   :  { %v5371_v28 = vsel %vm12984_vm15, %v12307_v26, 0.0 }
0x1a60   :  { %5372 = vadd.xlane.f32.xlu0 %v5371_v28 }
0x1a6d   :  { %10758 = vrot.lane.b32.xlu1 %v12123_v21, %s12980_s4 }
0x1a76   :  { %6057 = vrot.lane.b32.xlu0 %v12125_v1, %s12980_s4 }
0x1ae4   :  { %v12315_v29 = vpop.f32.mrb[114].mxu1 }
0x1ae5   :  { %v10187_v30 = vpop.f32.mrb[115].mxu1  ;;  %v5367_v38 = vpop.xlane.xlu0 %5366 }
0x1ae6   :  { %10863 = vrcp.f32 %v5367_v38 }
0x1ae8   :  { %v12317_v31 = vpop.f32.mrb[116].mxu1 }
0x1ae9   :  { %v10190_v39 = vpop.f32.mrb[117].mxu1  ;;  %v5370_v35 = vpop.xlane.xlu1 %5369 }
0x1aea   :  { %10865 = vrcp.f32 %v5370_v35 }
0x1aec   :  { %v12319_v52 = vpop.f32.mrb[118].mxu1 }
0x1aed   :  { %v10193_v40 = vpop.f32.mrb[119].mxu1  ;;  %v10759_v42 = vpop.permute.xlu1 %10758 }
0x1aee   :  { %v5735_v25 = vpop.f32.mrb[126].mxu0  ;;  %v10761_v44 = vunpack.i.h.bf16 %v10759_v42  ;;  %v10760_v46 = vunpack.i.l.bf16 %v10759_v42  ;;  %v5373_v4 = vpop.xlane.xlu0 %5372 }
0x1aef   :  { %v12323_v21 = vsel %vm11250_vm5, %v5735_v25, -1e+30  ;;  %v10276_v1 = vpop.f32.mrb[127].mxu0  ;;  %10867 = vrcp.f32 %v5373_v4 }
0x1af0   :  { %v5229_v6 = vpop.f32.mrb[120].mxu1  ;;  %v5752_v32 = vsel %vm487_vm6, %v12323_v21, -inf  ;;  %v10663_v45 = vpack.c.bf16 %v10761_v44, %v10760_v46  ;;  %v10864_v10 = vpop.eup %10863 }
0x1af1   :  { %v10209_v9 = vpop.f32.mrb[121].mxu1  ;;  %5753 = vmax.xlane.f32.xlu1 %v5752_v32  ;;  %v5230_v58 = vadd.f32 %v9141_v50, %v5229_v6  ;;  %v5377_v49 = vmul.f32 %v10864_v10, %v12299_v48 }
0x1af2   :  { %v5740_v19 = vpop.f32.mrb[128].mxu0  ;;  %10665 = vmatpush3.bf16.xpose.msk.msra.mxu0 %vm11173_vm4, %v10663_v45  ;;  %v6058_v14 = vpop.permute.xlu0 %6057 }
0x1af3   :  { %v12332_v15 = vsel %vm11258_vm7, %v5740_v19, -1e+30  ;;  %v10279_v53 = vpop.f32.mrb[129].mxu0  ;;  %10324 = vmatprep.subr.mxu0 %v10968_v2 }
0x1af4   :  { %v5234_v27 = vpop.f32.mrb[122].mxu1  ;;  %v5755_v7 = vsel %vm487_vm6, %v12332_v15, -inf  ;;  %v10866_v23 = vpop.eup %10865 }
0x1af5   :  { %v5235_v59 = vadd.f32 %v9141_v50, %v5234_v27  ;;  %v10212_v11 = vpop.f32.mrb[123].mxu1  ;;  %5756 = vmax.xlane.f32.xlu0 %v5755_v7  ;;  %v5378_v48 = vmul.f32 %v10866_v23, %v12303_v47 }
0x1af6   :  { %v5745_v63 = vpop.f32.mrb[130].mxu0 }
0x1af7   :  { %v10653_v37 = vpack.c.bf16 %v5235_v59, %v5230_v58  ;;  %v5751_v41 = vsel %vm11265_vm8, %v5745_v63, -1e+30  ;;  %v10282_v61 = vpop.f32.mrb[131].mxu0 }
0x1af8   :  { %v5239_v5 = vpop.f32.mrb[124].mxu1  ;;  %v5758_v8 = vsel %vm12981_vm9, %v5751_v41, -inf }
0x1af9   :  { %v10215_v12 = vpop.f32.mrb[125].mxu1  ;;  %10654 = vmatpush3.bf16.msra.mxu1 %v10653_v37  ;;  %5759 = vmax.xlane.f32.xlu1 %v5758_v8  ;;  %v5240_v43 = vadd.f32 %v9141_v50, %v5239_v5  ;;  %v10868_v24 = vpop.eup %10867 }
0x1afa   :  { %v5951_v17 = vpop.f32.mrb[132].mxu0  ;;  %10235 = vmatprep.subr.mxu1 %v10968_v2  ;;  %10325 = vmatpush3.xpose.msk.msra.mxu0 %vm385_vm3, %v6058_v14  ;;  %v5379_v35 = vmul.f32 %v10868_v24, %v12307_v26 }
0x1afb   :  { %v5952_v0 = vadd.f32 %v9179_v60, %v5951_v17  ;;  %v10302_v20 = vpop.f32.mrb[133].mxu0  ;;  %10350 = vmatprep.subr.mxu0 %v10968_v2 }
0x1afd   :  { %10236 = vmatpush3.msk.msra.mxu1 %vm531_vm10, %v5240_v43  ;;  %10327 = vmatmul.mubr.msk.f32.vlgmr.msra.gmra.mrb[138].mxu0 %vm385_vm3, %v5952_v0 }
0x1afe   :  { %10238 = vmatmul.mubr.msk.f32.vlgmr.msra.gmra.mrb[126].mxu1 %vm487_vm6, %v5377_v49  ;;  %v5956_v36 = vpop.f32.mrb[134].mxu0  ;;  %10329 = vmatprep.mubr.msk.f32.mxu0 %vm10969_vm1, %v10968_v2 }
0x1aff   :  { %v5957_v13 = vadd.f32 %v9179_v60, %v5956_v36  ;;  %v10305_v54 = vpop.f32.mrb[135].mxu0  ;;  %10240 = vmatprep.mubr.msk.f32.mxu1 %vm10969_vm1, %v10968_v2  ;;  %10257 = vmatprep.subr.mxu1 %v10968_v2 }
0x1b00   :  { %10258 = vmatpush3.msra.mxu1 %v9161_v55 }
0x1b01   :  { %10330 = vmatmul.mubr.msk.f32.gmra.mrb[140].mxu0 %vm385_vm3, %v5957_v13  ;;  %10659 = vmatprep.subr.bf16.mxu1 %v10971_v22 }
0x1b02   :  { %10241 = vmatmul.mubr.msk.f32.gmra.mrb[128].mxu1 %vm487_vm6, %v5378_v48  ;;  %v5961_v28 = vpop.f32.mrb[136].mxu0  ;;  %10332 = vmatprep.mubr.msk.f32.mxu0 %vm10969_vm1, %v10968_v2 }
0x1b03   :  { %v5962_v30 = vadd.f32 %v9179_v60, %v5961_v28  ;;  %v10308_v39 = vpop.f32.mrb[137].mxu0  ;;  %10243 = vmatprep.mubr.msk.f32.mxu1 %vm10969_vm1, %v10968_v2  ;;  %v9183_v28 = vld [vmem:[%s12932_s9 + $0x18] sm:$0xff] }
0x1b05   :  { %10333 = vmatmul.mubr.msk.f32.gmra.mrb[142].mxu0 %vm385_vm3, %v5962_v30 }
0x1b06   :  { %10244 = vmatmul.mubr.msk.f32.gmra.mrb[130].mxu1 %vm487_vm6, %v5379_v35  ;;  %10352 = vmatprep.mubr.msk.f32.mxu0 %vm10969_vm1, %v10968_v2 }
0x1b07   :  { %10259 = vmatprep.mubr.msk.f32.mxu1 %vm10969_vm1, %v10968_v2 }
0x1b0a   :  { %10260 = vmatmul.mubr.msk.f32.vlgmr.msra.gmra.mrb[132].mxu1 %vm119_vm2, %v12064_v51 }
0x1b0b   :  { %10262 = vmatprep.mubr.msk.f32.mxu1 %vm10969_vm1, %v10968_v2 }
0x1b0e   :  { %10263 = vmatmul.mubr.msk.f32.gmra.mrb[134].mxu1 %vm119_vm2, %v12082_v56 }
0x1b0f   :  { %10265 = vmatprep.mubr.msk.f32.mxu1 %vm10969_vm1, %v10968_v2 }
0x1b12   :  { %10266 = vmatmul.mubr.msk.f32.gmra.mrb[136].mxu1 %vm119_vm2, %v12098_v33 }
0x1b13   :  { %10289 = vmatprep.mubr.msk.f32.mxu1 %vm10969_vm1, %v10968_v2 }
0x1b7e   :  { %v5754_v47 = vpop.xlane.xlu1 %5753 }
0x1b7f   :  { %v5761_v26 = vsub.f32 %v12323_v21, %v5754_v47 }
0x1b81   :  { %v5764_v38 = vmul.f32 1.442695, %v5761_v26 }
0x1b82   :  { %v5757_v40 = vpop.xlane.xlu0 %5756 }
0x1b83   :  { %10869 = vpow2.f32 %v5764_v38  ;;  %v5762_v42 = vsub.f32 %v12332_v15, %v5757_v40 }
0x1b85   :  { %v5766_v25 = vmul.f32 1.442695, %v5762_v42 }
0x1b86   :  { %v5760_v44 = vpop.xlane.xlu1 %5759 }
0x1b87   :  { %10871 = vpow2.f32 %v5766_v25  ;;  %v5763_v46 = vsub.f32 %v5751_v41, %v5760_v44 }
0x1b89   :  { %v5768_v1 = vmul.f32 1.442695, %v5763_v46 }
0x1b8b   :  { %10873 = vpow2.f32 %v5768_v1 }
0x1b8d   :  { %v10870_v6 = vpop.eup %10869 }
0x1b8e   :  { %v5770_v32 = vsel %vm487_vm6, %v10870_v6, 0.0 }
0x1b8f   :  { %5771 = vadd.xlane.f32.xlu0 %v5770_v32 }
0x1b91   :  { %v10872_v45 = vpop.eup %10871 }
0x1b92   :  { %v5773_v9 = vsel %vm487_vm6, %v10872_v45, 0.0 }
0x1b93   :  { %5774 = vadd.xlane.f32.xlu1 %v5773_v9 }
0x1b95   :  { %v10874_v21 = vpop.eup %10873 }
0x1b96   :  { %v5776_v50 = vsel %vm12985_vm11, %v10874_v21, 0.0 }
0x1b97   :  { %5777 = vadd.xlane.f32.xlu0 %v5776_v50 }
0x1bd0   :  { %v6140_v19 = vpop.f32.mrb[138].mxu0 }
0x1bd1   :  { %v12392_v15 = vpop.f32.mrb[126].mxu1  ;;  %v12396_v53 = vsel %vm11250_vm5, %v6140_v19, -1e+30  ;;  %v10328_v4 = vpop.f32.mrb[139].mxu0  ;;  %vm12986_vm5 = vmmov %vm12981_vm9  ;;  %vm12991_vm9 = vcmask 130048  }
0x1bd2   :  { %v10239_v27 = vpop.f32.mrb[127].mxu1  ;;  %v6157_v7 = vsel %vm487_vm6, %v12396_v53, -inf  ;;  %vm12992_vm11 = vmmov %vm12991_vm9 }
0x1bd3   :  { %6158 = vmax.xlane.f32.xlu1 %v6157_v7 }
0x1bd4   :  { %v6145_v58 = vpop.f32.mrb[140].mxu0 }
0x1bd5   :  { %v12400_v59 = vpop.f32.mrb[128].mxu1  ;;  %v6155_v11 = vsel %vm11258_vm7, %v6145_v58, -1e+30  ;;  %v10331_v63 = vpop.f32.mrb[141].mxu0  ;;  %vm12987_vm7 = vmmov %vm12986_vm5 }
0x1bd6   :  { %v10242_v37 = vpop.f32.mrb[129].mxu1  ;;  %v6160_v41 = vsel %vm487_vm6, %v6155_v11, -inf }
0x1bd7   :  { %6161 = vmax.xlane.f32.xlu0 %v6160_v41 }
0x1bd8   :  { %v6150_v57 = vpop.f32.mrb[142].mxu0 }
0x1bd9   :  { %v12405_v61 = vpop.f32.mrb[130].mxu1  ;;  %v6156_v5 = vsel %vm11265_vm8, %v6150_v57, -1e+30  ;;  %v10334_v8 = vpop.f32.mrb[143].mxu0  ;;  %vm12988_vm8 = vcmask 48128  }
0x1bda   :  { %v10245_v60 = vpop.f32.mrb[131].mxu1  ;;  %v6163_v10 = vsel %vm12986_vm5, %v6156_v5, -inf  ;;  %vm12989_vm14 = vmmov %vm12988_vm8 }
0x1bdb   :  { %6164 = vmax.xlane.f32.xlu1 %v6163_v10  ;;  %vm12990_vm15 = vmmov %vm12988_vm8 }
0x1bdc   :  { %vm12993_vm5 = vmmov %vm12991_vm9 }
0x1bdd   :  { %v5634_v12 = vpop.f32.mrb[132].mxu1 }
0x1bde   :  { %v10261_v14 = vpop.f32.mrb[133].mxu1  ;;  %v5635_v43 = vadd.f32 %v9163_v62, %v5634_v12 }
0x1be1   :  { %v5639_v17 = vpop.f32.mrb[134].mxu1 }
0x1be2   :  { %v5640_v0 = vadd.f32 %v9163_v62, %v5639_v17  ;;  %v10264_v20 = vpop.f32.mrb[135].mxu1 }
0x1be4   :  { %v10660_v49 = vpack.c.bf16 %v5640_v0, %v5635_v43 }
0x1be5   :  { %v5644_v23 = vpop.f32.mrb[136].mxu1 }
0x1be6   :  { %v10267_v36 = vpop.f32.mrb[137].mxu1  ;;  %10661 = vmatpush3.bf16.msra.mxu1 %v10660_v49  ;;  %v5645_v3 = vadd.f32 %v9163_v62, %v5644_v23 }
0x1be7   :  { %10287 = vmatprep.subr.mxu1 %v10968_v2  ;;  %v6327_v36 = vld [vmem:[%s12934_s11] sm:$0xff] }
0x1be8   :  { %10351 = vmatpush3.msra.mxu0 %v6327_v36 }
0x1be9   :  { %10669 = vmatprep.subr.bf16.mxu0 %v10971_v22 }
0x1bea   :  { %10288 = vmatpush3.msk.msra.mxu1 %vm531_vm10, %v5645_v3 }
0x1beb   :  { %10309 = vmatprep.subr.mxu1 %v10968_v2 }
0x1c1c   :  { %v5772_v55 = vpop.xlane.xlu0 %5771 }
0x1c1d   :  { %10875 = vrcp.f32 %v5772_v55 }
0x1c20   :  { %v5775_v13 = vpop.xlane.xlu1 %5774 }
0x1c21   :  { %10877 = vrcp.f32 %v5775_v13 }
0x1c24   :  { %v5778_v54 = vpop.xlane.xlu0 %5777 }
0x1c25   :  { %10879 = vrcp.f32 %v5778_v54 }
0x1c27   :  { %v10876_v48 = vpop.eup %10875 }
0x1c28   :  { %v5782_v24 = vmul.f32 %v10876_v48, %v10870_v6 }
0x1c2a   :  { %10290 = vmatmul.mubr.msk.f32.vlgmr.msra.gmra.mrb[138].mxu1 %vm487_vm6, %v5782_v24 }
0x1c2b   :  { %v10878_v30 = vpop.eup %10877  ;;  %10292 = vmatprep.mubr.msk.f32.mxu1 %vm10969_vm1, %v10968_v2  ;;  %10310 = vmatpush3.msra.mxu1 %v9183_v28 }
0x1c2c   :  { %v5783_v39 = vmul.f32 %v10878_v30, %v10872_v45  ;;  %10666 = vmatprep.subr.bf16.mxu1 %v10971_v22 }
0x1c2e   :  { %10293 = vmatmul.mubr.msk.f32.gmra.mrb[140].mxu1 %vm487_vm6, %v5783_v39 }
0x1c2f   :  { %v10880_v35 = vpop.eup %10879  ;;  %10295 = vmatprep.mubr.msk.f32.mxu1 %vm10969_vm1, %v10968_v2 }
0x1c30   :  { %v5784_v47 = vmul.f32 %v10880_v35, %v10874_v21 }
0x1c32   :  { %10296 = vmatmul.mubr.msk.f32.gmra.mrb[142].mxu1 %vm487_vm6, %v5784_v47 }
0x1c33   :  { %10311 = vmatprep.mubr.msk.f32.mxu1 %vm10969_vm1, %v10968_v2 }
0x1c36   :  { %10312 = vmatmul.mubr.msk.f32.vlgmr.msra.gmra.mrb[144].mxu1 %vm119_vm2, %v12064_v51 }
0x1c37   :  { %10314 = vmatprep.mubr.msk.f32.mxu1 %vm10969_vm1, %v10968_v2 }
0x1c3a   :  { %10315 = vmatmul.mubr.msk.f32.gmra.mrb[146].mxu1 %vm119_vm2, %v12082_v56 }
0x1c3b   :  { %10317 = vmatprep.mubr.msk.f32.mxu1 %vm10969_vm1, %v10968_v2 }
0x1c3e   :  { %10318 = vmatmul.mubr.msk.f32.gmra.mrb[148].mxu1 %vm119_vm2, %v12098_v33 }
0x1c3f   :  { %10341 = vmatprep.mubr.msk.f32.mxu1 %vm10969_vm1, %v10968_v2 }
0x1c60   :  { %v6159_v26 = vpop.xlane.xlu1 %6158 }
0x1c61   :  { %v6166_v38 = vsub.f32 %v12396_v53, %v6159_v26 }
0x1c63   :  { %v6169_v40 = vmul.f32 1.442695, %v6166_v38 }
0x1c64   :  { %v6162_v42 = vpop.xlane.xlu0 %6161 }
0x1c65   :  { %10881 = vpow2.f32 %v6169_v40  ;;  %v6167_v25 = vsub.f32 %v6155_v11, %v6162_v42 }
0x1c67   :  { %v6171_v44 = vmul.f32 1.442695, %v6167_v25 }
0x1c68   :  { %v6165_v46 = vpop.xlane.xlu1 %6164 }
0x1c69   :  { %10883 = vpow2.f32 %v6171_v44  ;;  %v6168_v1 = vsub.f32 %v6156_v5, %v6165_v46 }
0x1c6b   :  { %v6173_v6 = vmul.f32 1.442695, %v6168_v1 }
0x1c6d   :  { %10885 = vpow2.f32 %v6173_v6 }
0x1c6f   :  { %v10882_v32 = vpop.eup %10881 }
0x1c70   :  { %v6175_v45 = vsel %vm487_vm6, %v10882_v32, 0.0 }
0x1c71   :  { %6176 = vadd.xlane.f32.xlu0 %v6175_v45 }
0x1c73   :  { %v10884_v9 = vpop.eup %10883 }
0x1c74   :  { %v6178_v21 = vsel %vm487_vm6, %v10884_v9, 0.0 }
0x1c75   :  { %6179 = vadd.xlane.f32.xlu1 %v6178_v21  ;;  %v6525_v21 = vld [vmem:[%s12938_s15 + $0x8] sm:$0xff] }
0x1c77   :  { %v10886_v50 = vpop.eup %10885 }
0x1c78   :  { %v6181_v19 = vsel %vm12987_vm7, %v10886_v50, 0.0  ;;  %vm12994_vm7 = vmmov %vm12988_vm8 }
0x1c79   :  { %6182 = vadd.xlane.f32.xlu0 %v6181_v19  ;;  %v9199_v19 = vld [vmem:[%s12935_s12] ss:$0 sm:$0xff] }
0x1c86   :  { %6285 = vrot.lane.b32.xlu1 %v12392_v15, %s10975_s22 }
0x1c8a   :  { %6287 = vrot.lane.b32.xlu1 %v12400_v59, %s10975_s22  ;;  %v9185_v59 = vld [vmem:[%s12933_s10 + $0x3] ss:$0 sm:$0xff] }
0x1cfd   :  { %v5863_v53 = vpop.f32.mrb[138].mxu1 }
0x1cfe   :  { %v10291_v4 = vpop.f32.mrb[139].mxu1  ;;  %6297 = vrot.lane.b32.xlu0 %v5863_v53, %s10976_s23  ;;  %v6177_v58 = vpop.xlane.xlu0 %6176 }
0x1cff   :  { %10887 = vrcp.f32 %v6177_v58  ;;  %v9211_v58 = vld [vmem:[%s12932_s9 + $0x60] sm:$0xff] }
0x1d01   :  { %v5868_v27 = vpop.f32.mrb[140].mxu1 }
0x1d02   :  { %v10294_v7 = vpop.f32.mrb[141].mxu1  ;;  %6299 = vrot.lane.b32.xlu0 %v5868_v27, %s10976_s23  ;;  %v6180_v37 = vpop.xlane.xlu1 %6179 }
0x1d03   :  { %10889 = vrcp.f32 %v6180_v37 }
0x1d05   :  { %v5873_v11 = vpop.f32.mrb[142].mxu1 }
0x1d06   :  { %v10297_v63 = vpop.f32.mrb[143].mxu1  ;;  %6289 = vrot.lane.b32.xlu0 %v12405_v61, %s10975_s22  ;;  %v6183_v57 = vpop.xlane.xlu0 %6182 }
0x1d07   :  { %10891 = vrcp.f32 %v6183_v57  ;;  %v6286_v28 = vpop.permute.xlu1 %6285 }
0x1d08   :  { %v6318_v47 = vsel %vm385_vm3, %v12315_v29, %v6286_v28  ;;  %v9231_v28 = vld [vmem:[%s12930_s7 + $0x20] sm:$0xff] }
0x1d09   :  { %v6039_v15 = vpop.f32.mrb[144].mxu1  ;;  %v10888_v62 = vpop.eup %10887 }
0x1d0a   :  { %v10313_v41 = vpop.f32.mrb[145].mxu1  ;;  %v6040_v8 = vadd.f32 %v9185_v59, %v6039_v15  ;;  %v6187_v43 = vmul.f32 %v10888_v62, %v10882_v32 }
0x1d0b   :  { %v6288_v39 = vpop.permute.xlu1 %6287 }
0x1d0c   :  { %v6319_v42 = vsel %vm385_vm3, %v12317_v31, %v6288_v39 }
0x1d0d   :  { %v6044_v5 = vpop.f32.mrb[146].mxu1  ;;  %v10890_v0 = vpop.eup %10889 }
0x1d0e   :  { %v6045_v60 = vadd.f32 %v9185_v59, %v6044_v5  ;;  %v10316_v10 = vpop.f32.mrb[147].mxu1  ;;  %v6188_v20 = vmul.f32 %v10890_v0, %v10884_v9  ;;  %v6427_v9 = vld [vmem:[%s12936_s13] sm:$0xff] }
0x1d0f   :  { %v9203_v5 = vld [vmem:[%s12937_s14] ss:$0 sm:$0xff] }
0x1d10   :  { %v10667_v12 = vpack.c.bf16 %v6045_v60, %v6040_v8 }
0x1d11   :  { %v6049_v14 = vpop.f32.mrb[148].mxu1  ;;  %v10892_v49 = vpop.eup %10891 }
0x1d12   :  { %v10319_v17 = vpop.f32.mrb[149].mxu1  ;;  %10668 = vmatpush3.bf16.msra.mxu1 %v10667_v12  ;;  %v6050_v61 = vadd.f32 %v9185_v59, %v6049_v14  ;;  %v6189_v23 = vmul.f32 %v10892_v49, %v10886_v50  ;;  %v9223_v12 = vld [vmem:[%s12932_s9 + $0x78] sm:$0xff] }
0x1d13   :  { %10339 = vmatprep.subr.mxu1 %v10968_v2 }
0x1d16   :  { %10340 = vmatpush3.msk.msra.mxu1 %vm531_vm10, %v6050_v61 }
0x1d17   :  { %10342 = vmatmul.mubr.msk.f32.vlgmr.msra.gmra.mrb[150].mxu1 %vm487_vm6, %v6187_v43  ;;  %10361 = vmatprep.subr.mxu1 %v10968_v2 }
0x1d18   :  { %10344 = vmatprep.mubr.msk.f32.mxu1 %vm10969_vm1, %v10968_v2  ;;  %10362 = vmatpush3.msra.mxu1 %v6427_v9 }
0x1d19   :  { %10385 = vmatprep.subr.mxu1 %v10968_v2 }
0x1d1b   :  { %10345 = vmatmul.mubr.msk.f32.gmra.mrb[152].mxu1 %vm487_vm6, %v6188_v20 }
0x1d1c   :  { %10347 = vmatprep.mubr.msk.f32.mxu1 %vm10969_vm1, %v10968_v2 }
0x1d1f   :  { %10348 = vmatmul.mubr.msk.f32.gmra.mrb[154].mxu1 %vm487_vm6, %v6189_v23  ;;  %v9217_v23 = vld [vmem:[%s12933_s10 + $0xd] ss:$0 sm:$0xff] }
0x1d20   :  { %10363 = vmatprep.mubr.msk.f32.mxu1 %vm10969_vm1, %v10968_v2 }
0x1d70   :  { %v6298_v30 = vpop.permute.xlu0 %6297 }
0x1d71   :  { %v6321_v26 = vsel %vm103_vm0, %v6318_v47, %v6298_v30  ;;  %v9207_v30 = vld [vmem:[%s12939_s16] ss:$0 sm:$0xff] }
0x1d74   :  { %v6300_v35 = vpop.permute.xlu0 %6299 }
0x1d75   :  { %v6322_v25 = vsel %vm103_vm0, %v6319_v42, %v6300_v35 }
0x1d78   :  { %v6290_v44 = vpop.permute.xlu0 %6289 }
0x1d79   :  { %v6320_v29 = vsel %vm385_vm3, %v12319_v52, %v6290_v44  ;;  %v6524_v52 = vld [vmem:[%s12938_s15] sm:$0xff] }
0x1d7a   :  { %v10670_v50 = vpack.c.bf16 %v6525_v21, %v6524_v52  ;;  %v9213_v52 = vld [vmem:[%s12933_s10 + $0xc] ss:$0 sm:$0xff] }
0x1dea   :  { %v6268_v3 = vpop.f32.mrb[150].mxu1 }
0x1deb   :  { %v10343_v55 = vpop.f32.mrb[151].mxu1  ;;  %6309 = vrot.lane.b32.xlu1 %v6268_v3, %s10977_s29 }
0x1dee   :  { %v6273_v13 = vpop.f32.mrb[152].mxu1 }
0x1def   :  { %6311 = vrot.lane.b32.xlu1 %v6273_v13, %s10977_s29  ;;  %v10346_v54 = vpop.f32.mrb[153].mxu1  ;;  %v9221_v13 = vld [vmem:[%s12933_s10 + $0xe] ss:$0 sm:$0xff] }
0x1df2   :  { %v6278_v48 = vpop.f32.mrb[154].mxu1 }
0x1df3   :  { %6301 = vrot.lane.b32.xlu1 %v5873_v11, %s10976_s23  ;;  %6313 = vrot.lane.b32.xlu0 %v6278_v48, %s10977_s29  ;;  %v10349_v24 = vpop.f32.mrb[155].mxu1 }
0x1e5d   :  { %v6310_v38 = vpop.permute.xlu1 %6309 }
0x1e5e   :  { %v6324_v40 = vsel %vm12988_vm8, %v6321_v26, %v6310_v38  ;;  %v9227_v38 = vld [vmem:[%s12934_s11 + $0x18] sm:$0xff]  ;;  %vm12995_vm8 = vcmask 156672  }
0x1e5f   :  { %10353 = vmatmul.mubr.msk.f32.vlgmr.msra.gmra.mrb[144].mxu0 %vm119_vm2, %v6324_v40 }
0x1e60   :  { %10355 = vmatprep.mubr.msk.f32.mxu0 %vm10969_vm1, %v10968_v2  ;;  %10671 = vmatpush3.bf16.msra.mxu0 %v10670_v50 }
0x1e61   :  { %v6312_v46 = vpop.permute.xlu1 %6311  ;;  %10400 = vmatprep.subr.mxu0 %v10968_v2 }
0x1e62   :  { %v6325_v1 = vsel %vm12989_vm14, %v6322_v25, %v6312_v46  ;;  %vm12996_vm14 = vmmov %vm12995_vm8 }
0x1e63   :  { %10356 = vmatmul.mubr.msk.f32.gmra.mrb[146].mxu0 %vm119_vm2, %v6325_v1 }
0x1e64   :  { %10358 = vmatprep.mubr.msk.f32.mxu0 %vm10969_vm1, %v10968_v2 }
0x1e65   :  { %v6314_v6 = vpop.permute.xlu0 %6313  ;;  %v6302_v32 = vpop.permute.xlu1 %6301 }
0x1e66   :  { %v6323_v31 = vsel %vm103_vm0, %v6320_v29, %v6302_v32 }
0x1e67   :  { %v6326_v45 = vsel %vm12990_vm15, %v6323_v31, %v6314_v6  ;;  %v9225_v6 = vld [vmem:[%s12933_s10 + $0xf] ss:$0 sm:$0xff]  ;;  %vm12997_vm15 = vmmov %vm12995_vm8 }
0x1e68   :  { %10359 = vmatmul.mubr.msk.f32.gmra.mrb[148].mxu0 %vm119_vm2, %v6326_v45 }
0x1e69   :  { %10376 = vmatprep.mubr.msk.f32.mxu0 %vm10969_vm1, %v10968_v2 }
0x1f32   :  { %v6410_v53 = vpop.f32.mrb[144].mxu0 }
0x1f33   :  { %v6411_v4 = vadd.f32 %v9199_v19, %v6410_v53  ;;  %v10354_v27 = vpop.f32.mrb[145].mxu0 }
0x1f35   :  { %v12512_v7 = vadd.f32 %v6411_v4, %v12064_v51 }
0x1f36   :  { %v6415_v11 = vpop.f32.mrb[146].mxu0 }
0x1f37   :  { %v6416_v63 = vadd.f32 %v9199_v19, %v6415_v11  ;;  %v10357_v37 = vpop.f32.mrb[147].mxu0  ;;  %10364 = vmatmul.mubr.msk.f32.vlgmr.msra.gmra.mrb[156].mxu1 %vm119_vm2, %v12512_v7 }
0x1f38   :  { %10366 = vmatprep.mubr.msk.f32.mxu1 %vm10969_vm1, %v10968_v2  ;;  %10386 = vmatpush3.msra.mxu1 %v9211_v58  ;;  %v9237_v37 = vld [vmem:[%s12928_s5 + $0x80] sm:$0xff] }
0x1f39   :  { %v12522_v15 = vadd.f32 %v6416_v63, %v12082_v56  ;;  %10390 = vmatprep.subr.mxu1 %v10968_v2  ;;  %v9215_v56 = vld [vmem:[%s12932_s9 + $0x68] sm:$0xff]  ;;  %v9233_v63 = vld [vmem:[%s12931_s8 + $0x4] ss:$0 sm:$0xff] }
0x1f3b   :  { %v6420_v51 = vpop.f32.mrb[148].mxu0  ;;  %10367 = vmatmul.mubr.msk.f32.gmra.mrb[158].mxu1 %vm119_vm2, %v12522_v15 }
0x1f3c   :  { %v6421_v41 = vadd.f32 %v9199_v19, %v6420_v51  ;;  %v10360_v59 = vpop.f32.mrb[149].mxu0  ;;  %10369 = vmatprep.mubr.msk.f32.mxu1 %vm10969_vm1, %v10968_v2 }
0x1f3e   :  { %v12530_v57 = vadd.f32 %v6421_v41, %v12098_v33  ;;  %v9219_v33 = vld [vmem:[%s12932_s9 + $0x70] sm:$0xff] }
0x1f40   :  { %10370 = vmatmul.mubr.msk.f32.gmra.mrb[160].mxu1 %vm119_vm2, %v12530_v57 }
0x1f41   :  { %10387 = vmatprep.mubr.msk.f32.mxu1 %vm10969_vm1, %v10968_v2 }
0x1f44   :  { %10388 = vmatmul.mubr.msk.f32.vlgmr.msra.gmra.mrb[162].mxu1 %vm119_vm2, %v11639_v16 }
0x1f45   :  { %10391 = vmatpush3.msra.mxu1 %v9215_v56  ;;  %10392 = vmatprep.mubr.msk.f32.mxu1 %vm10969_vm1, %v10968_v2 }
0x1f46   :  { %10395 = vmatprep.subr.mxu1 %v10968_v2 }
0x1f48   :  { %10393 = vmatmul.mubr.msk.f32.vlgmr.msra.gmra.mrb[164].mxu1 %vm119_vm2, %v11639_v16 }
0x1f49   :  { %10396 = vmatpush3.msra.mxu1 %v9219_v33  ;;  %10397 = vmatprep.mubr.msk.f32.mxu1 %vm10969_vm1, %v10968_v2 }
0x1f4a   :  { %10405 = vmatprep.subr.mxu1 %v10968_v2 }
0x1f4c   :  { %10398 = vmatmul.mubr.msk.f32.vlgmr.msra.gmra.mrb[166].mxu1 %vm119_vm2, %v11639_v16 }
0x1f4d   :  { %10407 = vmatprep.mubr.msk.f32.mxu1 %vm10969_vm1, %v10968_v2  ;;  %10406 = vmatpush3.msra.mxu1 %v9227_v38 }
0x1f4e   :  { %10421 = vmatprep.subr.mxu1 %v10968_v2 }
0x200a   :  { %v6510_v8 = vpop.f32.mrb[156].mxu1 }
0x200b   :  { %v6511_v60 = vadd.f32 %v9203_v5, %v6510_v8  ;;  %v10365_v10 = vpop.f32.mrb[157].mxu1 }
0x200d   :  { %10377 = vmatmul.mubr.msk.f32.vlgmr.msra.gmra.mrb[150].mxu0 %vm12991_vm9, %v6511_v60  ;;  %v9229_v60 = vld [vmem:[%s12935_s12 + $0x3] ss:$0 sm:$0xff]  ;;  %vm12998_vm9 = vmmov %vm12995_vm8 }
0x200e   :  { %v6515_v14 = vpop.f32.mrb[158].mxu1  ;;  %10379 = vmatprep.mubr.msk.f32.mxu0 %vm10969_vm1, %v10968_v2  ;;  %10401 = vmatpush3.msra.mxu0 %v9223_v12 }
0x200f   :  { %v6516_v62 = vadd.f32 %v9203_v5, %v6515_v14  ;;  %v10368_v17 = vpop.f32.mrb[159].mxu1  ;;  %10410 = vmatprep.subr.mxu0 %v10968_v2 }
0x2010   :  { %v9241_v17 = vld [vmem:[%s12932_s9 + $0x80] sm:$0xff] }
0x2011   :  { %10380 = vmatmul.mubr.msk.f32.gmra.mrb[152].mxu0 %vm12992_vm11, %v6516_v62 }
0x2012   :  { %10382 = vmatprep.mubr.msk.f32.mxu0 %vm10969_vm1, %v10968_v2 }
0x2013   :  { %v6520_v61 = vpop.f32.mrb[160].mxu1 }
0x2014   :  { %v6521_v43 = vadd.f32 %v9203_v5, %v6520_v61  ;;  %v10371_v0 = vpop.f32.mrb[161].mxu1  ;;  %v9253_v61 = vld [vmem:[%s12928_s5 + $0x88] sm:$0xff] }
0x2016   :  { %10383 = vmatmul.mubr.msk.f32.gmra.mrb[154].mxu0 %vm12993_vm5, %v6521_v43 }
0x2017   :  { %v6701_v20 = vpop.f32.mrb[162].mxu1  ;;  %10402 = vmatprep.mubr.msk.f32.mxu0 %vm10969_vm1, %v10968_v2 }
0x2018   :  { %v10389_v49 = vpop.f32.mrb[163].mxu1  ;;  %v6702_v50 = vadd.f32 %v9213_v52, %v6701_v20 }
0x201a   :  { %10403 = vmatmul.mubr.msk.f32.vlgmr.msra.gmra.mrb[156].mxu0 %vm119_vm2, %v11639_v16 }
0x201b   :  { %v6781_v36 = vpop.f32.mrb[164].mxu1  ;;  %10412 = vmatprep.mubr.msk.f32.mxu0 %vm10969_vm1, %v10968_v2  ;;  %10411 = vmatpush3.msra.mxu0 %v9231_v28 }
0x201c   :  { %v6782_v3 = vadd.f32 %v9217_v23, %v6781_v36  ;;  %v10394_v55 = vpop.f32.mrb[165].mxu1  ;;  %10672 = vmatprep.subr.bf16.mxu0 %v10971_v22  ;;  %v9239_v23 = vld [vmem:[%s12929_s6 + $0x10] ss:$0 sm:$0xff] }
0x201e   :  { %6946 = vrot.lane.b32.xlu1 %v6782_v3, %s10975_s22 }
0x201f   :  { %v6861_v54 = vpop.f32.mrb[166].mxu1 }
0x2020   :  { %v6862_v48 = vadd.f32 %v9221_v13, %v6861_v54  ;;  %v10399_v24 = vpop.f32.mrb[167].mxu1 }
0x2022   :  { %6950 = vrot.lane.b32.xlu0 %v6862_v48, %s10976_s23  ;;  %v9243_v48 = vld [vmem:[%s12933_s10 + $0x10] ss:$0 sm:$0xff] }
0x2090   :  { %v6947_v21 = vpop.permute.xlu1 %6946 }
0x2091   :  { %v6957_v53 = vsel %vm385_vm3, %v6702_v50, %v6947_v21 }
0x2094   :  { %v6951_v19 = vpop.permute.xlu0 %6950 }
0x2095   :  { %v6958_v4 = vsel %vm103_vm0, %v6957_v53, %v6951_v19 }
0x20e0   :  { %v6608_v39 = vpop.f32.mrb[150].mxu0 }
0x20e1   :  { %v6609_v35 = vadd.f32 %v9207_v30, %v6608_v39  ;;  %v10378_v47 = vpop.f32.mrb[151].mxu0 }
0x20e3   :  { %v12592_v26 = vadd.f32 %v6609_v35, %v12512_v7 }
0x20e4   :  { %v6613_v40 = vpop.f32.mrb[152].mxu0 }
0x20e5   :  { %v6614_v42 = vadd.f32 %v9207_v30, %v6613_v40  ;;  %v10381_v25 = vpop.f32.mrb[153].mxu0  ;;  %10413 = vmatmul.mubr.msk.f32.vlgmr.msra.gmra.mrb[158].mxu0 %vm119_vm2, %v12592_v26  ;;  %v9255_v40 = vld [vmem:[%s12929_s6 + $0x11] ss:$0 sm:$0xff] }
0x20e6   :  { %10415 = vmatprep.mubr.msk.f32.mxu0 %vm10969_vm1, %v10968_v2 }
0x20e7   :  { %v12603_v44 = vadd.f32 %v6614_v42, %v12522_v15 }
0x20e9   :  { %v6618_v46 = vpop.f32.mrb[154].mxu0  ;;  %10416 = vmatmul.mubr.msk.f32.gmra.mrb[160].mxu0 %vm119_vm2, %v12603_v44 }
0x20ea   :  { %v6619_v1 = vadd.f32 %v9207_v30, %v6618_v46  ;;  %v10384_v29 = vpop.f32.mrb[155].mxu0  ;;  %10418 = vmatprep.mubr.msk.f32.mxu0 %vm10969_vm1, %v10968_v2 }
0x20eb   :  { %v9269_v29 = vld [vmem:[%s12928_s5 + $0x90] sm:$0xff] }
0x20ec   :  { %v12613_v32 = vadd.f32 %v6619_v1, %v12530_v57 }
0x20ed   :  { %v6941_v31 = vpop.f32.mrb[156].mxu0 }
0x20ee   :  { %v6942_v45 = vadd.f32 %v9225_v6, %v6941_v31  ;;  %v10404_v9 = vpop.f32.mrb[157].mxu0  ;;  %10419 = vmatmul.mubr.msk.f32.gmra.mrb[162].mxu0 %vm119_vm2, %v12613_v32 }
0x20ef   :  { %10443 = vmatprep.mubr.msk.f32.mxu0 %vm10969_vm1, %v10968_v2 }
0x20f0   :  { %6954 = vrot.lane.b32.xlu1 %v6942_v45, %s10977_s29 }
0x2162   :  { %v6955_v27 = vpop.permute.xlu1 %6954 }
0x2163   :  { %v6959_v7 = vsel %vm12994_vm7, %v6958_v4, %v6955_v27 }
0x2164   :  { %10408 = vmatmul.mubr.msk.f32.vlgmr.msra.gmra.mrb[168].mxu1 %vm119_vm2, %v6959_v7 }
0x2165   :  { %10423 = vmatprep.mubr.msk.f32.mxu1 %vm10969_vm1, %v10968_v2  ;;  %10422 = vmatpush3.msra.mxu1 %v9237_v37 }
0x2166   :  { %10426 = vmatprep.subr.mxu1 %v10968_v2 }
0x21b8   :  { %v7129_v58 = vpop.f32.mrb[158].mxu0 }
0x21b9   :  { %v10414_v11 = vpop.f32.mrb[159].mxu0  ;;  %v7130_v51 = vadd.f32 %v9233_v63, %v7129_v58 }
0x21bc   :  { %v7134_v15 = vpop.f32.mrb[160].mxu0 }
0x21bd   :  { %v7135_v41 = vadd.f32 %v9233_v63, %v7134_v15  ;;  %v10417_v59 = vpop.f32.mrb[161].mxu0 }
0x21bf   :  { %v10673_v57 = vpack.c.bf16 %v7135_v41, %v7130_v51  ;;  %v12636_v56 = vpack.i.bf16 %v7135_v41, %v7130_v51 }
0x21c1   :  { %10763 = vrot.lane.b32.xlu0 %v12636_v56, %s12976_s24  ;;  %v7139_v33 = vpop.f32.mrb[162].mxu0  ;;  %10675 = vmatpush3.bf16.xpose.msk.msra.mxu0 %vm11173_vm4, %v10673_v57 }
0x21c2   :  { %v12642_v5 = vadd.f32 %v9233_v63, %v7139_v33  ;;  %v10420_v8 = vpop.f32.mrb[163].mxu0  ;;  %10441 = vmatprep.subr.mxu0 %v10968_v2 }
0x21c4   :  { %7660 = vrot.lane.b32.xlu1 %v12642_v5, %s12976_s24 }
0x21c9   :  { %10442 = vmatpush3.xpose.msk.msra.mxu0 %vm385_vm3, %v12642_v5 }
0x21ca   :  { %10676 = vmatprep.subr.bf16.mxu0 %v10971_v22 }
0x2236   :  { %v7661_v49 = vpop.permute.xlu1 %7660 }
0x2237   :  { %v7039_v10 = vpop.f32.mrb[168].mxu1 }
0x2238   :  { %v7040_v12 = vadd.f32 %v9229_v60, %v7039_v10  ;;  %v10409_v14 = vpop.f32.mrb[169].mxu1  ;;  %v9271_v10 = vld [vmem:[%s12929_s6 + $0x12] ss:$0 sm:$0xff] }
0x223a   :  { %v12654_v62 = vadd.f32 %v7040_v12, %v11639_v16  ;;  %v10764_v16 = vpop.permute.xlu0 %10763 }
0x223b   :  { %v10766_v43 = vunpack.i.h.bf16 %v10764_v16  ;;  %v10765_v0 = vunpack.i.l.bf16 %v10764_v16 }
0x223c   :  { %10424 = vmatmul.mubr.msk.f32.vlgmr.msra.gmra.mrb[170].mxu1 %vm119_vm2, %v12654_v62 }
0x223d   :  { %10427 = vmatpush3.msra.mxu1 %v9241_v17  ;;  %10428 = vmatprep.mubr.msk.f32.mxu1 %vm10969_vm1, %v10968_v2  ;;  %v10680_v20 = vpack.c.bf16 %v10766_v43, %v10765_v0  ;;  %v9285_v17 = vld [vmem:[%s12928_s5 + $0x98] sm:$0xff] }
0x223e   :  { %10455 = vmatprep.subr.mxu1 %v10968_v2 }
0x2240   :  { %10429 = vmatmul.mubr.msk.f32.vlgmr.msra.gmra.mrb[172].mxu1 %vm119_vm2, %v12592_v26 }
0x2241   :  { %10431 = vmatprep.mubr.msk.f32.mxu1 %vm10969_vm1, %v10968_v2  ;;  %10456 = vmatpush3.msra.mxu1 %v9253_v61 }
0x2242   :  { %10679 = vmatprep.subr.bf16.mxu1 %v10971_v22 }
0x2244   :  { %10432 = vmatmul.mubr.msk.f32.gmra.mrb[174].mxu1 %vm119_vm2, %v12603_v44 }
0x2245   :  { %10434 = vmatprep.mubr.msk.f32.mxu1 %vm10969_vm1, %v10968_v2 }
0x2248   :  { %10435 = vmatmul.mubr.msk.f32.gmra.mrb[176].mxu1 %vm119_vm2, %v12613_v32 }
0x2249   :  { %10457 = vmatprep.mubr.msk.f32.mxu1 %vm10969_vm1, %v10968_v2 }
0x224c   :  { %10458 = vmatmul.mubr.msk.f32.vlgmr.msra.gmra.mrb[178].mxu1 %vm119_vm2, %v12654_v62 }
0x224d   :  { %10682 = vmatpush3.bf16.xpose.msk.msra.mxu1 %vm11173_vm4, %v10680_v20  ;;  %10477 = vmatprep.mubr.msk.f32.mxu1 %vm10969_vm1, %v10968_v2  ;;  %v9257_v20 = vld [vmem:[%s12932_s9 + $0x88] sm:$0xff] }
0x224e   :  { %10475 = vmatprep.subr.mxu1 %v10968_v2 }
0x2255   :  { %10476 = vmatpush3.xpose.msk.msra.mxu1 %vm385_vm3, %v7661_v49 }
0x2256   :  { %10489 = vmatprep.subr.mxu1 %v10968_v2 }
0x230f   :  { %v7222_v36 = vpop.f32.mrb[170].mxu1 }
0x2310   :  { %v7223_v3 = vadd.f32 %v9239_v23, %v7222_v36  ;;  %v10425_v55 = vpop.f32.mrb[171].mxu1 }
0x2312   :  { %10444 = vmatmul.mubr.msk.f32.vlgmr.msra.gmra.mrb[164].mxu0 %vm385_vm3, %v7223_v3 }
0x2313   :  { %v7302_v13 = vpop.f32.mrb[172].mxu1  ;;  %10452 = vmatprep.mubr.msk.f32.mxu0 %vm10969_vm1, %v10968_v2 }
0x2314   :  { %v10430_v54 = vpop.f32.mrb[173].mxu1  ;;  %v7303_v28 = vadd.f32 %v9243_v48, %v7302_v13 }
0x2315   :  { %v9287_v54 = vld [vmem:[%s12929_s6 + $0x13] ss:$0 sm:$0xff] }
0x2317   :  { %v7307_v24 = vpop.f32.mrb[174].mxu1 }
0x2318   :  { %v7308_v30 = vadd.f32 %v9243_v48, %v7307_v24  ;;  %v10433_v39 = vpop.f32.mrb[175].mxu1 }
0x231a   :  { %v10677_v35 = vpack.c.bf16 %v7308_v30, %v7303_v28 }
0x231b   :  { %v7312_v47 = vpop.f32.mrb[176].mxu1 }
0x231c   :  { %v10436_v38 = vpop.f32.mrb[177].mxu1  ;;  %10678 = vmatpush3.bf16.msra.mxu0 %v10677_v35  ;;  %v7313_v42 = vadd.f32 %v9243_v48, %v7312_v47 }
0x231d   :  { %10450 = vmatprep.subr.mxu0 %v10968_v2  ;;  %v9259_v38 = vld [vmem:[%s12933_s10 + $0x11] ss:$0 sm:$0xff] }
0x231f   :  { %v7562_v25 = vpop.f32.mrb[178].mxu1 }
0x2320   :  { %v7563_v46 = vadd.f32 %v9255_v40, %v7562_v25  ;;  %10451 = vmatpush3.msk.msra.mxu0 %vm531_vm10, %v7313_v42  ;;  %v10459_v1 = vpop.f32.mrb[179].mxu1 }
0x2321   :  { %10460 = vmatprep.subr.mxu0 %v10968_v2 }
0x2322   :  { %10478 = vmatmul.mubr.msk.f32.vlgmr.msra.gmra.mrb[180].mxu1 %vm385_vm3, %v7563_v46 }
0x2323   :  { %10490 = vmatpush3.msra.mxu1 %v9269_v29  ;;  %10491 = vmatprep.mubr.msk.f32.mxu1 %vm10969_vm1, %v10968_v2 }
0x2324   :  { %10686 = vmatprep.subr.bf16.mxu1 %v10971_v22 }
0x2326   :  { %10492 = vmatmul.mubr.msk.f32.vlgmr.msra.gmra.mrb[182].mxu1 %vm119_vm2, %v12654_v62 }
0x2327   :  { %10511 = vmatprep.mubr.msk.f32.mxu1 %vm10969_vm1, %v10968_v2 }
0x23e5   :  { %v7394_v6 = vpop.f32.mrb[164].mxu0 }
0x23e6   :  { %v7398_v31 = vsel %vm11828_vm13, %v7394_v6, -1e+30  ;;  %v10445_v45 = vpop.f32.mrb[165].mxu0 }
0x23e7   :  { %v7399_v9 = vsel %vm12995_vm8, %v7398_v31, -inf }
0x23e8   :  { %7400 = vmax.xlane.f32.xlu0 %v7399_v9 }
0x23f5   :  { %v7737_v52 = vpop.f32.mrb[180].mxu1 }
0x23f6   :  { %v10479_v21 = vpop.f32.mrb[181].mxu1  ;;  %v7741_v53 = vsel %vm11828_vm13, %v7737_v52, -1e+30  ;;  %v9273_v52 = vld [vmem:[%s12932_s9 + $0x90] sm:$0xff] }
0x23f7   :  { %v7742_v4 = vsel %vm12996_vm14, %v7741_v53, -inf }
0x23f9   :  { %v7905_v50 = vpop.f32.mrb[182].mxu1 }
0x23fa   :  { %v10493_v19 = vpop.f32.mrb[183].mxu1  ;;  %v7906_v14 = vadd.f32 %v9271_v10, %v7905_v50 }
0x23fe   :  { %10768 = vrot.lane.b32.xlu0 %v12636_v56, %s12979_s0 }
0x241d   :  { %7743 = vmax.xlane.f32.xlu0 %v7742_v4 }
0x2433   :  { %10773 = vrot.lane.b32.xlu0 %v12636_v56, %s12980_s4 }
0x2475   :  { %v7401_v27 = vpop.xlane.xlu0 %7400 }
0x2476   :  { %v7402_v7 = vsub.f32 %v7398_v31, %v7401_v27 }
0x2478   :  { %v7403_v58 = vmul.f32 1.442695, %v7402_v7 }
0x2479   :  { %v10769_v11 = vpop.permute.xlu0 %10768 }
0x247a   :  { %10893 = vpow2.f32 %v7403_v58  ;;  %v10771_v63 = vunpack.i.h.bf16 %v10769_v11  ;;  %v10770_v37 = vunpack.i.l.bf16 %v10769_v11 }
0x247c   :  { %v10687_v15 = vpack.c.bf16 %v10771_v63, %v10770_v37 }
0x247e   :  { %10689 = vmatpush3.bf16.xpose.msk.msra.mxu1 %vm11173_vm4, %v10687_v15 }
0x247f   :  { %10509 = vmatprep.subr.mxu1 %v10968_v2 }
0x2484   :  { %v10894_v51 = vpop.eup %10893 }
0x2485   :  { %v7405_v41 = vsel %vm12997_vm15, %v10894_v51, 0.0 }
0x2486   :  { %7406 = vadd.xlane.f32.xlu1 %v7405_v41  ;;  %v9275_v41 = vld [vmem:[%s12933_s10 + $0x12] ss:$0 sm:$0xff] }
0x2497   :  { %8003 = vrot.lane.b32.xlu1 %v12642_v5, %s12979_s0 }
0x24aa   :  { %v7744_v59 = vpop.xlane.xlu0 %7743 }
0x24ab   :  { %v7745_v57 = vsub.f32 %v7741_v53, %v7744_v59 }
0x24ad   :  { %v7746_v56 = vmul.f32 1.442695, %v7745_v57 }
0x24ae   :  { %v10774_v61 = vpop.permute.xlu0 %10773 }
0x24af   :  { %10895 = vpow2.f32 %v7746_v56  ;;  %v10775_v16 = vunpack.i.l.bf16 %v10774_v61 }
0x24b9   :  { %v12731_v33 = vpop.eup %10895 }
0x24ba   :  { %v7748_v8 = vsel %vm12998_vm9, %v12731_v33, 0.0 }
0x24bb   :  { %7749 = vadd.xlane.f32.xlu1 %v7748_v8 }
0x24cc   :  { %8346 = vrot.lane.b32.xlu1 %v12642_v5, %s12980_s4  ;;  %v10776_v5 = vunpack.i.h.bf16 %v10774_v61  ;;  %v9289_v61 = vld [vmem:[%s12932_s9 + $0x98] sm:$0xff] }
0x24ce   :  { %v10694_v49 = vpack.c.bf16 %v10776_v5, %v10775_v16 }
0x2513   :  { %v7407_v60 = vpop.xlane.xlu1 %7406 }
0x2514   :  { %10897 = vrcp.f32 %v7407_v60 }
0x2517   :  { %v8004_v12 = vpop.permute.xlu1 %8003 }
0x2518   :  { %10510 = vmatpush3.xpose.msk.msra.mxu1 %vm385_vm3, %v8004_v12 }
0x2519   :  { %10523 = vmatprep.subr.mxu1 %v10968_v2 }
0x251b   :  { %10512 = vmatmul.mubr.msk.f32.vlgmr.msra.gmra.mrb[184].mxu1 %vm385_vm3, %v7906_v14 }
0x251c   :  { %10524 = vmatpush3.msra.mxu1 %v9285_v17  ;;  %10525 = vmatprep.mubr.msk.f32.mxu1 %vm10969_vm1, %v10968_v2 }
0x251d   :  { %10693 = vmatprep.subr.bf16.mxu1 %v10971_v22 }
0x251e   :  { %v10898_v43 = vpop.eup %10897 }
0x251f   :  { %v7409_v0 = vmul.f32 %v10898_v43, %v10894_v51  ;;  %10526 = vmatmul.mubr.msk.f32.vlgmr.msra.gmra.mrb[186].mxu1 %vm119_vm2, %v12654_v62 }
0x2520   :  { %10545 = vmatprep.mubr.msk.f32.mxu1 %vm10969_vm1, %v10968_v2 }
0x2521   :  { %10453 = vmatmul.mubr.msk.f32.vlgmr.msra.gmra.mrb[166].mxu0 %vm487_vm6, %v7409_v0 }
0x2522   :  { %10461 = vmatpush3.msra.mxu0 %v9257_v20  ;;  %10462 = vmatprep.mubr.msk.f32.mxu0 %vm10969_vm1, %v10968_v2 }
0x2523   :  { %10696 = vmatpush3.bf16.xpose.msk.msra.mxu1 %vm11173_vm4, %v10694_v49  ;;  %10683 = vmatprep.subr.bf16.mxu0 %v10971_v22  ;;  %vm12999_vm4 = vmmov %vm12995_vm8 }
0x2524   :  { %10543 = vmatprep.subr.mxu1 %v10968_v2  ;;  %vm13000_vm11 = vmmov %vm12999_vm4 }
0x2525   :  { %10463 = vmatmul.mubr.msk.f32.vlgmr.msra.gmra.mrb[168].mxu0 %vm119_vm2, %v12592_v26  ;;  %vm13001_vm5 = vmmov %vm12999_vm4 }
0x2526   :  { %10465 = vmatprep.mubr.msk.f32.mxu0 %vm10969_vm1, %v10968_v2 }
0x2529   :  { %10466 = vmatmul.mubr.msk.f32.gmra.mrb[170].mxu0 %vm119_vm2, %v12603_v44 }
0x252a   :  { %10468 = vmatprep.mubr.msk.f32.mxu0 %vm10969_vm1, %v10968_v2 }
0x252d   :  { %10469 = vmatmul.mubr.msk.f32.gmra.mrb[172].mxu0 %vm119_vm2, %v12613_v32 }
0x252e   :  { %10486 = vmatprep.mubr.msk.f32.mxu0 %vm10969_vm1, %v10968_v2 }
0x2548   :  { %v7750_v34 = vpop.xlane.xlu1 %7749 }
0x2549   :  { %10899 = vrcp.f32 %v7750_v34 }
0x254c   :  { %v8347_v23 = vpop.permute.xlu1 %8346 }
0x254d   :  { %10544 = vmatpush3.xpose.msk.msra.mxu1 %vm385_vm3, %v8347_v23 }
0x254e   :  { %10557 = vmatprep.subr.mxu1 %v10968_v2 }
0x2553   :  { %v10900_v6 = vpop.eup %10899 }
0x2554   :  { %v7752_v9 = vmul.f32 %v10900_v6, %v12731_v33 }
0x25ee   :  { %v8080_v36 = vpop.f32.mrb[184].mxu1 }
0x25ef   :  { %v8084_v3 = vsel %vm11828_vm13, %v8080_v36, -1e+30  ;;  %v10513_v55 = vpop.f32.mrb[185].mxu1 }
0x25f0   :  { %v8085_v13 = vsel %vm12999_vm4, %v8084_v3, -inf }
0x25f1   :  { %8086 = vmax.xlane.f32.xlu0 %v8085_v13 }
0x25f2   :  { %v8248_v48 = vpop.f32.mrb[186].mxu1 }
0x25f3   :  { %v8249_v24 = vadd.f32 %v9287_v54, %v8248_v48  ;;  %v10527_v28 = vpop.f32.mrb[187].mxu1 }
0x25f4   :  { %v12783_v30 = vpop.f32.mrb[166].mxu0 }
0x25f5   :  { %v10454_v39 = vpop.f32.mrb[167].mxu0  ;;  %10546 = vmatmul.mubr.msk.f32.vlgmr.msra.gmra.mrb[188].mxu1 %vm385_vm3, %v8249_v24 }
0x25f6   :  { %10559 = vmatprep.mubr.msk.f32.mxu1 %vm10969_vm1, %v10968_v2 }
0x25f8   :  { %v7642_v35 = vpop.f32.mrb[168].mxu0 }
0x25f9   :  { %v10464_v47 = vpop.f32.mrb[169].mxu0  ;;  %v7643_v42 = vadd.f32 %v9259_v38, %v7642_v35 }
0x25fa   :  { %v9301_v47 = vld [vmem:[%s12934_s11 + $0x20] sm:$0xff] }
0x25fb   :  { %10558 = vmatpush3.msra.mxu1 %v9301_v47 }
0x25fc   :  { %v7647_v40 = vpop.f32.mrb[170].mxu0  ;;  %10700 = vmatprep.subr.bf16.mxu1 %v10971_v22 }
0x25fd   :  { %v7648_v25 = vadd.f32 %v9259_v38, %v7647_v40  ;;  %v10467_v46 = vpop.f32.mrb[171].mxu0 }
0x25ff   :  { %v10684_v1 = vpack.c.bf16 %v7648_v25, %v7643_v42 }
0x2600   :  { %v7652_v29 = vpop.f32.mrb[172].mxu0 }
0x2601   :  { %v10470_v31 = vpop.f32.mrb[173].mxu0  ;;  %10685 = vmatpush3.bf16.msra.mxu0 %v10684_v1  ;;  %v7653_v45 = vadd.f32 %v9259_v38, %v7652_v29 }
0x2602   :  { %10484 = vmatprep.subr.mxu0 %v10968_v2 }
0x2605   :  { %10485 = vmatpush3.msk.msra.mxu0 %vm531_vm10, %v7653_v45 }
0x2606   :  { %10487 = vmatmul.mubr.msk.f32.vlgmr.msra.gmra.mrb[174].mxu0 %vm487_vm6, %v7752_v9  ;;  %10494 = vmatprep.subr.mxu0 %v10968_v2 }
0x2607   :  { %10495 = vmatpush3.msra.mxu0 %v9273_v52  ;;  %10496 = vmatprep.mubr.msk.f32.mxu0 %vm10969_vm1, %v10968_v2 }
0x2608   :  { %10690 = vmatprep.subr.bf16.mxu0 %v10971_v22 }
0x260a   :  { %10497 = vmatmul.mubr.msk.f32.vlgmr.msra.gmra.mrb[176].mxu0 %vm119_vm2, %v12592_v26 }
0x260b   :  { %10499 = vmatprep.mubr.msk.f32.mxu0 %vm10969_vm1, %v10968_v2 }
0x260e   :  { %10500 = vmatmul.mubr.msk.f32.gmra.mrb[178].mxu0 %vm119_vm2, %v12603_v44 }
0x260f   :  { %10502 = vmatprep.mubr.msk.f32.mxu0 %vm10969_vm1, %v10968_v2 }
0x2612   :  { %10503 = vmatmul.mubr.msk.f32.gmra.mrb[180].mxu0 %vm119_vm2, %v12613_v32 }
0x2613   :  { %10520 = vmatprep.mubr.msk.f32.mxu0 %vm10969_vm1, %v10968_v2 }
0x267e   :  { %v8087_v21 = vpop.xlane.xlu0 %8086 }
0x267f   :  { %v8088_v50 = vsub.f32 %v8084_v3, %v8087_v21  ;;  %v9309_v21 = vld [vmem:[%s12938_s15 + $0x20] sm:$0xff] }
0x2681   :  { %v8089_v19 = vmul.f32 1.442695, %v8088_v50  ;;  %v9310_v50 = vld [vmem:[%s12938_s15 + $0x28] sm:$0xff] }
0x2683   :  { %10901 = vpow2.f32 %v8089_v19  ;;  %v10701_v19 = vpack.c.bf16 %v9310_v50, %v9309_v21 }
0x268d   :  { %v10902_v53 = vpop.eup %10901 }
0x268e   :  { %v8091_v4 = vsel %vm13000_vm11, %v10902_v53, 0.0 }
0x268f   :  { %8092 = vadd.xlane.f32.xlu1 %v8091_v4 }
0x26c8   :  { %v8423_v27 = vpop.f32.mrb[188].mxu1 }
0x26c9   :  { %v8427_v7 = vsel %vm11828_vm13, %v8423_v27, -1e+30  ;;  %v10547_v58 = vpop.f32.mrb[189].mxu1  ;;  %vm13002_vm13 = vmmov %vm12999_vm4 }
0x26ca   :  { %v8428_v11 = vsel %vm13001_vm5, %v8427_v7, -inf }
0x26cb   :  { %8429 = vmax.xlane.f32.xlu0 %v8428_v11 }
0x26d9   :  { %v7825_v63 = vpop.f32.mrb[174].mxu0 }
0x26da   :  { %8516 = vrot.lane.b32.xlu1 %v7825_v63, %s10975_s22  ;;  %v10488_v37 = vpop.f32.mrb[175].mxu0 }
0x26dd   :  { %v7985_v15 = vpop.f32.mrb[176].mxu0 }
0x26de   :  { %v10498_v51 = vpop.f32.mrb[177].mxu0  ;;  %v7986_v57 = vadd.f32 %v9275_v41, %v7985_v15 }
0x26e1   :  { %v7990_v59 = vpop.f32.mrb[178].mxu0 }
0x26e2   :  { %v7991_v56 = vadd.f32 %v9275_v41, %v7990_v59  ;;  %v10501_v33 = vpop.f32.mrb[179].mxu0 }
0x26e4   :  { %v10691_v18 = vpack.c.bf16 %v7991_v56, %v7986_v57 }
0x26e5   :  { %v7995_v8 = vpop.f32.mrb[180].mxu0 }
0x26e6   :  { %v10504_v60 = vpop.f32.mrb[181].mxu0  ;;  %10692 = vmatpush3.bf16.msra.mxu0 %v10691_v18  ;;  %v7996_v10 = vadd.f32 %v9275_v41, %v7995_v8 }
0x26e7   :  { %10518 = vmatprep.subr.mxu0 %v10968_v2 }
0x26ea   :  { %10519 = vmatpush3.msk.msra.mxu0 %vm531_vm10, %v7996_v10 }
0x26eb   :  { %10528 = vmatprep.subr.mxu0 %v10968_v2 }
0x271c   :  { %v8093_v12 = vpop.xlane.xlu1 %8092 }
0x271d   :  { %10903 = vrcp.f32 %v8093_v12 }
0x2727   :  { %v10904_v14 = vpop.eup %10903 }
0x2728   :  { %v8095_v17 = vmul.f32 %v10904_v14, %v10902_v53  ;;  %v9307_v53 = vld [vmem:[%s12937_s14 + $0x2] ss:$0 sm:$0xff]  ;;  %s10978_s14 = smov [#allocation2]  }
0x2729   :  { %s8876_s15 = sshll.u32 %s10978_s14, 4  ;;  %s8877_s15 = int_to_ptr.vmem [resolvable:$true] %s8876_s15 }
0x272a   :  { %10521 = vmatmul.mubr.msk.f32.vlgmr.msra.gmra.mrb[182].mxu0 %vm487_vm6, %v8095_v17  ;;  %s10920_s6 = scalar_lea.vmem %s8877_s15, 32  ;;  %p10925_p1 = scmp.lt.s32.totalorder %s8877_s15, %s8877_s15 }
0x272b   :  { %10529 = vmatpush3.msra.mxu0 %v9289_v61  ;;  %10530 = vmatprep.mubr.msk.f32.mxu0 %vm10969_vm1, %v10968_v2  ;;  %p10921_p0 = scmp.ne.s32.totalorder %s8877_s15, %s10920_s6  ;;  %p10926_p2 = scmp.lt.s32.totalorder %s10920_s6, %s10920_s6 }
0x272c   :  { %10697 = vmatprep.subr.bf16.mxu0 %v10971_v22  ;;  %v9305_v22 = vld [vmem:[%s12936_s13 + $0x10] sm:$0xff] }
0x272d   :  { %p10927_p3 = por %p10926_p2, %p10925_p1 }
0x272e   :  { %10531 = vmatmul.mubr.msk.f32.vlgmr.msra.gmra.mrb[184].mxu0 %vm119_vm2, %v12592_v26 }
0x272f   :  { %10533 = vmatprep.mubr.msk.f32.mxu0 %vm10969_vm1, %v10968_v2  ;;  %p10928_p4 = pnand %p10927_p3, %p10921_p0 }
0x2732   :  { %10534 = vmatmul.mubr.msk.f32.gmra.mrb[186].mxu0 %vm119_vm2, %v12603_v44 }
0x2733   :  { %10536 = vmatprep.mubr.msk.f32.mxu0 %vm10969_vm1, %v10968_v2 }
0x2736   :  { %10537 = vmatmul.mubr.msk.f32.gmra.mrb[188].mxu0 %vm119_vm2, %v12613_v32  ;;  %v9291_v32 = vld [vmem:[%s12933_s10 + $0x13] ss:$0 sm:$0xff] }
0x2737   :  { %10554 = vmatprep.mubr.msk.f32.mxu0 %vm10969_vm1, %v10968_v2 }
0x274c   :  { %v8517_v42 = vpop.permute.xlu1 %8516 }
0x274d   :  { %v8527_v46 = vsel %vm385_vm3, %v12783_v30, %v8517_v42  ;;  %v9303_v30 = vld [vmem:[%s12935_s12 + $0x4] ss:$0 sm:$0xff] }
0x2758   :  { %v8430_v5 = vpop.xlane.xlu0 %8429 }
0x2759   :  { %v8431_v16 = vsub.f32 %v8427_v7, %v8430_v5  ;;  %v9312_v7 = vld [vmem:[%s12939_s16 + $0x2] ss:$0 sm:$0xff] }
0x275b   :  { %v8432_v43 = vmul.f32 1.442695, %v8431_v16 }
0x275d   :  { %10905 = vpow2.f32 %v8432_v43 }
0x2767   :  { %v10906_v26 = vpop.eup %10905 }
0x2768   :  { %v8434_v0 = vsel %vm13002_vm13, %v10906_v26, 0.0 }
0x2769   :  { %8435 = vadd.xlane.f32.xlu0 %v8434_v0 }
0x27f6   :  { %v8436_v20 = vpop.xlane.xlu0 %8435 }
0x27f7   :  { %10907 = vrcp.f32 %v8436_v20 }
0x27fd   :  { %v8168_v49 = vpop.f32.mrb[182].mxu0 }
0x27fe   :  { %8520 = vrot.lane.b32.xlu0 %v8168_v49, %s10976_s23  ;;  %v10522_v44 = vpop.f32.mrb[183].mxu0 }
0x2801   :  { %v8328_v34 = vpop.f32.mrb[184].mxu0  ;;  %v10908_v24 = vpop.eup %10907 }
0x2802   :  { %v10532_v23 = vpop.f32.mrb[185].mxu0  ;;  %v8329_v3 = vadd.f32 %v9291_v32, %v8328_v34  ;;  %v8438_v35 = vmul.f32 %v10908_v24, %v10906_v26 }
0x2805   :  { %v8333_v36 = vpop.f32.mrb[186].mxu0 }
0x2806   :  { %v8334_v55 = vadd.f32 %v9291_v32, %v8333_v36  ;;  %v10535_v13 = vpop.f32.mrb[187].mxu0 }
0x2808   :  { %v10698_v54 = vpack.c.bf16 %v8334_v55, %v8329_v3 }
0x2809   :  { %v8338_v48 = vpop.f32.mrb[188].mxu0 }
0x280a   :  { %v10538_v28 = vpop.f32.mrb[189].mxu0  ;;  %10699 = vmatpush3.bf16.msra.mxu0 %v10698_v54  ;;  %v8339_v39 = vadd.f32 %v9291_v32, %v8338_v48 }
0x280b   :  { %10552 = vmatprep.subr.mxu0 %v10968_v2 }
0x280e   :  { %10553 = vmatpush3.msk.msra.mxu0 %vm531_vm10, %v8339_v39 }
0x280f   :  { %10555 = vmatmul.mubr.msk.f32.vlgmr.msra.gmra.mrb[190].mxu0 %vm487_vm6, %v8438_v35  ;;  %10562 = vmatprep.subr.mxu0 %v10968_v2  ;;  %vm13003_vm6 = vmmov %vm12994_vm7 }
0x2810   :  { %10564 = vmatprep.mubr.msk.f32.mxu0 %vm10969_vm1, %v10968_v2  ;;  %10563 = vmatpush3.msra.mxu0 %v9305_v22 }
0x2811   :  { %10574 = vmatprep.subr.mxu0 %v10968_v2 }
0x2870   :  { %v8521_v25 = vpop.permute.xlu0 %8520 }
0x2871   :  { %v8528_v1 = vsel %vm103_vm0, %v8527_v46, %v8521_v25  ;;  %vm13004_vm0 = vcmask 130048  }
0x28e2   :  { %v8511_v38 = vpop.f32.mrb[190].mxu0 }
0x28e3   :  { %8524 = vrot.lane.b32.xlu1 %v8511_v38, %s10977_s29  ;;  %v10556_v40 = vpop.f32.mrb[191].mxu0 }
0x2955   :  { %v8525_v29 = vpop.permute.xlu1 %8524 }
0x2956   :  { %v8529_v6 = vsel %vm13003_vm6, %v8528_v1, %v8525_v29 }
0x2957   :  { %10560 = vmatmul.mubr.msk.f32.vlgmr.msra.gmra.mrb[190].mxu1 %vm119_vm2, %v8529_v6 }
0x2958   :  { %10571 = vmatprep.mubr.msk.f32.mxu1 %vm10969_vm1, %v10968_v2  ;;  %10702 = vmatpush3.bf16.msra.mxu1 %v10701_v19 }
0x2a2a   :  { %v8609_v31 = vpop.f32.mrb[190].mxu1 }
0x2a2b   :  { %v8610_v45 = vadd.f32 %v9303_v30, %v8609_v31  ;;  %v10561_v9 = vpop.f32.mrb[191].mxu1 }
0x2a2d   :  { %v8613_v52 = vadd.f32 %v8610_v45, %v12654_v62 }
0x2a2f   :  { %10565 = vmatmul.mubr.msk.f32.vlgmr.msra.gmra.mrb[192].mxu0 %vm119_vm2, %v8613_v52 }
0x2a30   :  { %10576 = vmatprep.mubr.msk.f32.mxu0 %vm10969_vm1, %v10968_v2  ;;  %v8782_v2 = vld [vmem:[%s12940_s17] sm:$0xff] }
0x2a31   :  { %10575 = vmatpush3.msra.mxu0 %v8782_v2 }
0x2b02   :  { %v8693_v62 = vpop.f32.mrb[192].mxu0 }
0x2b03   :  { %v8694_v4 = vadd.f32 %v9307_v53, %v8693_v62  ;;  %v10566_v27 = vpop.f32.mrb[193].mxu0 }
0x2b05   :  { %10572 = vmatmul.mubr.msk.f32.vlgmr.msra.gmra.mrb[192].mxu1 %vm13004_vm0, %v8694_v4 }
0x2bd8   :  { %v8777_v58 = vpop.f32.mrb[192].mxu1 }
0x2bd9   :  { %v8778_v11 = vadd.f32 %v9312_v7, %v8777_v58  ;;  %v10573_v63 = vpop.f32.mrb[193].mxu1 }
0x2bdb   :  { %v8781_v37 = vadd.f32 %v8778_v11, %v8613_v52 }
0x2bdd   :  { %10577 = vmatmul.mubr.msk.f32.vlgmr.msra.gmra.mrb[194].mxu0 %vm119_vm2, %v8781_v37 }
0x2bde   :  { %10931 = shalt.err (!%p10928_p4)
}
0x2bdf   :  { %s10932_s16 = scalar_lea.hbm %s12942_s19, 32 }
0x2be0   :  { %p10933_p5 = scmp.ne.s32.totalorder %s12942_s19, %s10932_s16  ;;  %p10936_p6 = scmp.lt.u32.totalorder %s10932_s16, %s12942_s19 }
0x2be2   :  { %p10938_p7 = pnand %p10936_p6, %p10933_p5 }
0x2be4   :  { %10941 = shalt.err (!%p10938_p7)
}
0x2be5   :  { %8879 = dma.vmem_to_hbm [thread:$0]  %s8877_s15, 32, %s12942_s19, [#allocation3]   ;;  %v9314_v15 = vld [vmem:[%s12941_s18] ss:$0 sm:$0xff] }
0x2be6   :  { %s10979_s11 = smov [#allocation4]  }
0x2be7   :  { %s8886_s25 = sshll.u32 %s10979_s11, 4  ;;  %s8887_s25 = int_to_ptr.vmem [resolvable:$true] %s8886_s25 }
0x2be8   :  { %s10942_s19 = scalar_lea.vmem %s8887_s25, 32  ;;  %p10947_p9 = scmp.lt.s32.totalorder %s8887_s25, %s8887_s25 }
0x2be9   :  { %p10943_p8 = scmp.ne.s32.totalorder %s8887_s25, %s10942_s19  ;;  %p10948_p10 = scmp.lt.s32.totalorder %s10942_s19, %s10942_s19 }
0x2beb   :  { %p10949_p11 = por %p10948_p10, %p10947_p9 }
0x2bed   :  { %p10950_p12 = pnand %p10949_p11, %p10943_p8 }
0x2cb0   :  { %v8859_v51 = vpop.f32.mrb[194].mxu0 }
0x2cb1   :  { %v8860_v41 = vadd.f32 %v9314_v15, %v8859_v51  ;;  %v10578_v59 = vpop.f32.mrb[195].mxu0 }
0x2cb3   :  { %v8863_v57 = vsub.f32 0.0, %v8860_v41 }
0x2cb5   :  { %v8864_v56 = vmul.f32 1.442695, %v8863_v57 }
0x2cb7   :  { %10909 = vpow2.f32 %v8864_v56 }
0x2cc1   :  { %v10910_v33 = vpop.eup %10909 }
0x2cc2   :  { %v8866_v18 = vadd.f32 1.0, %v10910_v33 }
0x2cc4   :  { %10911 = vrcp.f32 %v8866_v18 }
0x2cce   :  { %v10912_v8 = vpop.eup %10911 }
0x2ccf   :  { %8869 = vst.msk [vmem:[#allocation4] sm:$0x3] %vm4435_vm12, %v10912_v8 }
0x2cd0   :  { %10953 = shalt.err (!%p10950_p12)
}
0x2cd1   :  { %s10954_s7 = scalar_lea.hbm %s12943_s20, 32 }
0x2cd2   :  { %p10955_p13 = scmp.ne.s32.totalorder %s12943_s20, %s10954_s7  ;;  %p10958_p0 = scmp.lt.u32.totalorder %s10954_s7, %s12943_s20 }
0x2cd4   :  { %p10960_p1 = pnand %p10958_p0, %p10955_p13 }
0x2cd6   :  { %10963 = shalt.err (!%p10960_p1)
}
0x2cd7   :  { %8889 = dma.vmem_to_hbm [thread:$0]  %s8887_s25, 32, %s12943_s20, [#allocation5]  }
0x2cd8   :  { %10964 = dma.done.wait [#allocation3], 32  }
0x2cd9   :  { %10965 = vsyncadd [#allocation3], 4294967264 }
0x2cda   :  { %10966 = dma.done.wait [#allocation5], 32  }
0x2cdb   :  { %10967 = vsyncadd [#allocation5], 4294967264 }
0x2cdc   :  { %8896 = vsyncpa [#allocation3], 1 }
0x2cdd   :  { %8897 = vsyncpa [#allocation5], 1 }

</bundles_post_ra>
